<compile_context>
chip_gen: v7x
topology: tpu7x:2x2x1
jax: 0.10.0
libtpu: 0.0.40
codegen_flags: <defaults>
</compile_context>

<pallas_src>
import functools
import math
from typing import NamedTuple, Tuple

import jax
import jax.numpy as jnp
from jax.experimental import pallas as pl
from jax.experimental.pallas import tpu as pltpu


class AViTConfig(NamedTuple):
    num_heads: int
    expected_depth: int
    halt_beta: float
    halt_gamma: float
    halt_eps: float
    ln_eps: float


class LayerParams(NamedTuple):
    wq: jax.Array  # [E, E] bf16 (already transposed to [in, out])
    wk: jax.Array
    wv: jax.Array
    wo: jax.Array
    bq: jax.Array  # [E] f32
    bk: jax.Array
    bv: jax.Array
    bo: jax.Array
    ln1_g: jax.Array
    ln1_b: jax.Array
    ln2_g: jax.Array
    ln2_b: jax.Array
    w1: jax.Array  # [E, H] bf16
    b1: jax.Array  # [H] f32
    w2: jax.Array  # [H, E] bf16
    b2: jax.Array  # [E] f32


# Row indices inside the packed lane-dense [B, 8, S] per-token halting state.
_ROW_MASK, _ROW_CUM, _ROW_REM, _ROW_RHO, _ROW_CNT, _ROW_HALT = 0, 1, 2, 3, 4, 5
_NUM_STATE_ROWS = 8


# ----------------------------------------------------------------------------
# Shared math helpers (used by BOTH the Pallas kernel and the pure-JAX reference
# so the self-test tolerances stay tight).
# ----------------------------------------------------------------------------
def _erf_approx(z):
    # Abramowitz & Stegun 7.1.26, |error| <= 1.5e-7.
    a1, a2, a3, a4, a5 = (0.254829592, -0.284496736, 1.421413741,
                          -1.453152027, 1.061405429)
    p = 0.3275911
    sgn = jnp.where(z >= 0.0, 1.0, -1.0)
    az = jnp.abs(z)
    t = 1.0 / (1.0 + p * az)
    poly = ((((a5 * t + a4) * t + a3) * t + a2) * t + a1) * t
    return sgn * (1.0 - poly * jnp.exp(-az * az))


def _gelu_exact(z):
    # Exact (erf-based) GELU, matching torch.nn.GELU() default.
    return 0.5 * z * (1.0 + _erf_approx(z * 0.7071067811865476))


def _sigmoid(z):
    return 1.0 / (1.0 + jnp.exp(-z))


def _layer_norm(v, g, b, eps):
    mu = jnp.mean(v, axis=-1, keepdims=True)
    c = v - mu
    var = jnp.mean(c * c, axis=-1, keepdims=True)
    return c * jax.lax.rsqrt(var + eps) * g + b


# ----------------------------------------------------------------------------
# Per-generation / per-capability configuration helpers.
# ----------------------------------------------------------------------------
@functools.lru_cache(maxsize=None)
def _weight_pipeline_mode():
    """pl.Buffered(1) for resident weights (constant index_map => no double buffer).

    Probed once with a trivial kernel; returns None (default buffering) if the running
    JAX/Mosaic build does not support single-buffered pipeline_mode.
    """
    try:
        def k(x_ref, o_ref):
            o_ref[...] = x_ref[...] + 1.0

        mode = pl.Buffered(1)
        f = pl.pallas_call(
            k,
            out_shape=jax.ShapeDtypeStruct((8, 128), jnp.float32),
            grid=(2,),
            in_specs=[pl.BlockSpec((8, 128), lambda i: (0, 0),
                                   pipeline_mode=mode)],
            out_specs=pl.BlockSpec((8, 128), lambda i: (0, 0)),
        )
        jax.block_until_ready(f(jnp.zeros((8, 128), jnp.float32)))
        return mode
    except Exception:
        return None


@functools.lru_cache(maxsize=None)
def _vmem_limit_bytes():
    """~75% of physical VMEM: ~96 MiB on v5e/v6e (128 MiB), ~48 MiB on v7x (64 MiB)."""
    cap = 128 * 1024 * 1024
    try:
        cap = int(pltpu.get_tpu_info().vmem_capacity_bytes)
    except Exception:
        pass
    return int(min(100 * 1024 * 1024, (cap * 3) // 4))


@functools.lru_cache(maxsize=None)
def _dim_semantics(batch: int):
    """Batch axis is data-parallel; on v7x shard it across the 2 TensorCores."""
    try:
        kind = jax.devices()[0].device_kind.lower()
    except Exception:
        kind = ""
    if ("v7" in kind or "7x" in kind) and batch % 2 == 0:
        core_parallel = getattr(pltpu, "CORE_PARALLEL", None)
        if core_parallel is not None:
            return (core_parallel,)
    return ("parallel",)


# ----------------------------------------------------------------------------
# Fused AViT layer kernel: transformer block + halting bookkeeping, one batch
# element per grid step.
# ----------------------------------------------------------------------------
def _avit_layer_kernel(
    # inputs
    h_ref, state_ref, acc_ref,
    wq_ref, wk_ref, wv_ref, wo_ref, w1_ref, w2_ref,
    vecs_ref, b1_ref,
    # outputs
    h_out_ref, acc_out_ref, state_out_ref,
    # scratch
    ctx_ref,
    *, num_heads, head_dim, sm_scale, ln_eps,
    halt_gamma, halt_beta, halt_eps, is_last):
    f32 = jnp.float32
    bf16 = jnp.bfloat16

    st = state_ref[0]                                   # [8, S] lane-dense state
    mask_row = st[_ROW_MASK:_ROW_MASK + 1, :]           # [1, S]
    cum_row = st[_ROW_CUM:_ROW_CUM + 1, :]
    rem_row = st[_ROW_REM:_ROW_REM + 1, :]
    rho_row = st[_ROW_RHO:_ROW_RHO + 1, :]
    cnt_row = st[_ROW_CNT:_ROW_CNT + 1, :]

    mask_col = jnp.transpose(mask_row)                  # [S, 1]  (tiny XLU transpose)

    vecs = vecs_ref[...]                                # [9, E] packed bias/LN table
    bq, bk, bv, bo = vecs[0:1], vecs[1:2], vecs[2:3], vecs[3:4]
    g1, be1, g2, be2 = vecs[4:5], vecs[5:6], vecs[6:7], vecs[7:8]
    b2 = vecs[8:9]
    b1 = b1_ref[...]                                    # [1, H]

    def mm(a, w):
        # bf16 MXU operands, f32 accumulation.
        return jax.lax.dot_general(a.astype(bf16), w, (((1,), (0,)), ((), ())),
                                   preferred_element_type=f32)

    x = h_ref[0].astype(f32) * mask_col                 # hidden_states * mask

    # ------------------ attention branch ------------------
    n1 = _layer_norm(x, g1, be1, ln_eps) * mask_col     # x already masked (mask is 0/1)
    q = mm(n1, wq_ref[...]) + bq
    k = mm(n1, wk_ref[...]) + bk
    v = mm(n1, wv_ref[...]) + bv

    # Additive attention mask over keys: (1 - mask) * -1e8, broadcast over queries.
    add_mask = (1.0 - mask_row) * (-1e8)                # [1, S]

    for hh in range(num_heads):
        lo = hh * head_dim
        qh = q[:, lo:lo + head_dim].astype(bf16)
        kh = k[:, lo:lo + head_dim].astype(bf16)
        vh = v[:, lo:lo + head_dim].astype(bf16)
        s = jax.lax.dot_general(qh, kh, (((1,), (1,)), ((), ())),
                                preferred_element_type=f32) * sm_scale
        s = s + add_mask
        p = jnp.exp(s - jnp.max(s, axis=-1, keepdims=True))
        p = p * pl.reciprocal(jnp.sum(p, axis=-1, keepdims=True), approx=True)
        # Per-head context goes straight into a VMEM scratch (no lane concatenate).
        ctx_ref[:, lo:lo + head_dim] = jax.lax.dot_general(
            p.astype(bf16), vh, (((1,), (0,)), ((), ())),
            preferred_element_type=f32)

    x = x + (mm(ctx_ref[...], wo_ref[...]) + bo)        # drop_path = identity (eval)

    # ------------------ MLP branch ------------------
    n2 = _layer_norm(x * mask_col, g2, be2, ln_eps) * mask_col
    hdn = _gelu_exact(mm(n2, w1_ref[...]) + b1)
    x = x + (mm(hdn, w2_ref[...]) + b2)

    h_out_ref[0] = x.astype(h_out_ref.dtype)            # bf16 inter-layer activation

    # ------------------ AViT halting bookkeeping ------------------
    if is_last:
        halting_row = jnp.ones_like(mask_row)
    else:
        z = x[:, 0:1] * halt_gamma + halt_beta           # [S, 1]
        halting_col = pl.reciprocal(1.0 + jnp.exp(-z), approx=True)   # sigmoid
        halting_row = jnp.transpose(halting_col)         # [1, S]

    cum_new = cum_row + halting_row
    rho_new = rho_row + mask_row
    reached = (cum_new >= 1.0 - halt_eps).astype(f32)
    not_reached = 1.0 - reached
    rho_new = rho_new + rem_row * reached * mask_row
    # out_hidden delta: x * (rem_old*reached + halting*not_reached)  (matches the spec)
    w_row = rem_row * reached + halting_row * not_reached
    rem_new = rem_row - halting_row * not_reached
    cnt_new = cnt_row + not_reached

    acc_new = acc_ref[0].astype(f32) + x * jnp.transpose(w_row)
    acc_out_ref[0] = acc_new.astype(acc_out_ref.dtype)

    zero_row = jnp.zeros_like(mask_row)
    state_out_ref[0] = jnp.concatenate(
        [not_reached, cum_new, rem_new, rho_new, cnt_new, halting_row,
         zero_row, zero_row], axis=0)                    # one dense [8, S] store


def _avit_layer_pallas(h, state, acc, lp: LayerParams, cfg: AViTConfig,
                       is_last: bool):
    B, S, E = h.shape
    H = lp.w1.shape[1]
    nh = cfg.num_heads
    hd = E // nh

    spec_act = pl.BlockSpec((1, S, E), lambda b: (b, 0, 0))
    spec_state = pl.BlockSpec((1, _NUM_STATE_ROWS, S), lambda b: (b, 0, 0))

    wmode = _weight_pipeline_mode()

    def spec_w(shape):
        idx = lambda b: (0,) * len(shape)
        if wmode is None:
            return pl.BlockSpec(shape, idx)
        return pl.BlockSpec(shape, idx, pipeline_mode=wmode)

    # Pack the nine (E,)-sized bias / LayerNorm vectors into one resident [9, E] table.
    vecs = jnp.stack([lp.bq, lp.bk, lp.bv, lp.bo,
                      lp.ln1_g, lp.ln1_b, lp.ln2_g, lp.ln2_b, lp.b2], axis=0)
    b1 = lp.b1.reshape(1, H)

    kernel = functools.partial(
        _avit_layer_kernel, num_heads=nh, head_dim=hd,
        sm_scale=1.0 / math.sqrt(hd), ln_eps=cfg.ln_eps,
        halt_gamma=cfg.halt_gamma, halt_beta=cfg.halt_beta,
        halt_eps=cfg.halt_eps, is_last=is_last)

    flops = int(B * (8 * S * E * E + 4 * S * S * E + 4 * S * E * H))
    transcendentals = int(B * (nh * S * S + S * H + S))
    bytes_accessed = int(2 * 4 * B * S * E                    # h, acc (bf16, in+out)
                         + 2 * 4 * B * _NUM_STATE_ROWS * S    # packed state (f32 in+out)
                         + 2 * (4 * E * E + 2 * E * H)        # bf16 weights
                         + 4 * (9 * E + H))                   # bias/LN table
    cost = pl.CostEstimate(flops=flops, transcendentals=transcendentals,
                           bytes_accessed=bytes_accessed)

    out_shape = (
        jax.ShapeDtypeStruct((B, S, E), h.dtype),              # h_out (bf16)
        jax.ShapeDtypeStruct((B, S, E), acc.dtype),             # out_hidden acc (bf16)
        jax.ShapeDtypeStruct((B, _NUM_STATE_ROWS, S), jnp.float32),  # packed state
    )

    return pl.pallas_call(
        kernel,
        out_shape=out_shape,
        grid=(B,),
        in_specs=[
            spec_act,       # hidden_states
            spec_state,     # packed per-token halting state
            spec_act,       # out_hidden accumulator
            spec_w((E, E)), spec_w((E, E)), spec_w((E, E)), spec_w((E, E)),
            spec_w((E, H)), spec_w((H, E)),
            spec_w((9, E)), spec_w((1, H)),
        ],
        out_specs=(spec_act, spec_act, spec_state),
        scratch_shapes=[pltpu.VMEM((S, E), jnp.float32)],       # per-head context
        input_output_aliases={0: 0, 2: 1, 1: 2},                # h, acc, state in-place
        compiler_params=pltpu.CompilerParams(
            dimension_semantics=_dim_semantics(B),
            vmem_limit_bytes=_vmem_limit_bytes()),
        cost_estimate=cost,
    )(h, state, acc, lp.wq, lp.wk, lp.wv, lp.wo, lp.w1, lp.w2, vecs, b1)


def _halting_target(depth: int, expected_depth: float):
    d = jnp.arange(depth, dtype=jnp.float32)
    logp = -0.5 * (d - float(expected_depth)) ** 2 - 0.5 * math.log(2 * math.pi)
    target = jnp.exp(logp)
    target = target / jnp.sum(target)
    return jnp.clip(target, 0.01, 0.99)


@functools.partial(jax.jit, static_argnums=(2,))
def avit_encoder_forward(hidden_states, params: Tuple[LayerParams, ...],
                         cfg: AViTConfig):
    """Pallas-backed equivalent of AViTEncoder.forward (eval mode)."""
    B, S, E = hidden_states.shape
    f32 = jnp.float32
    depth = len(params)

    h = hidden_states.astype(jnp.bfloat16)
    acc = jnp.zeros((B, S, E), jnp.bfloat16)

    def row(v):
        return jnp.full((B, 1, S), v, f32)

    # rows: mask=1, cum=0, rem=1, rhos=0, counter=1, halting=0, pad, pad
    state = jnp.concatenate([row(1.0), row(0.0), row(1.0), row(0.0), row(1.0),
                             row(0.0), row(0.0), row(0.0)], axis=1)

    distr_entries = []
    for i, lp in enumerate(params):
        h, acc, state = _avit_layer_pallas(h, state, acc, lp, cfg,
                                           is_last=(i == depth - 1))
        distr_entries.append(jnp.mean(state[0, _ROW_HALT, 1:]))

    distr = jnp.stack(distr_entries)
    distr = distr / jnp.sum(distr)
    distr = jnp.clip(distr, 0.01, 0.99)

    return {
        "hidden_states": acc.astype(f32),
        "rhos": state[:, _ROW_RHO, :],
        "halting_score_distr": distr,
        "halting_score_distr_target": _halting_target(depth, cfg.expected_depth),
        "counter": state[:, _ROW_CNT, :],
    }


# ----------------------------------------------------------------------------
# Pure-JAX reference mirroring the kernel numerics (bf16 MXU operands, bf16
# inter-layer activations / accumulator, f32 math).
# ----------------------------------------------------------------------------
def _reference_forward(hidden_states, params, cfg: AViTConfig):
    B, S, E = hidden_states.shape
    nh = cfg.num_heads
    hd = E // nh
    scale = 1.0 / math.sqrt(hd)
    f32, bf16 = jnp.float32, jnp.bfloat16
    depth = len(params)

    def mm(a, w):
        return jnp.einsum("bse,eo->bso", a.astype(bf16), w,
                          preferred_element_type=f32)

    h = hidden_states.astype(bf16)
    out_hidden = jnp.zeros((B, S, E), bf16)
    mask = jnp.ones((B, S), f32)
    cum = jnp.zeros((B, S), f32)
    rem = jnp.ones((B, S), f32)
    rhos = jnp.zeros((B, S), f32)
    cnt = jnp.ones((B, S), f32)
    distr = []

    for i, lp in enumerate(params):
        m3 = mask[:, :, None]
        x = h.astype(f32) * m3
        n1 = _layer_norm(x, lp.ln1_g, lp.ln1_b, cfg.ln_eps) * m3
        q = mm(n1, lp.wq) + lp.bq
        k = mm(n1, lp.wk) + lp.bk
        v = mm(n1, lp.wv) + lp.bv
        qh = q.reshape(B, S, nh, hd).transpose(0, 2, 1, 3)
        kh = k.reshape(B, S, nh, hd).transpose(0, 2, 1, 3)
        vh = v.reshape(B, S, nh, hd).transpose(0, 2, 1, 3)
        s = jnp.einsum("bhqd,bhkd->bhqk", qh.astype(bf16), kh.astype(bf16),
                       preferred_element_type=f32) * scale
        s = s + ((1.0 - mask) * (-1e8))[:, None, None, :]
        s_max = jnp.max(s, axis=-1, keepdims=True)
        p = jnp.exp(s - s_max)
        p = p / jnp.sum(p, axis=-1, keepdims=True)
        ctx = jnp.einsum("bhqk,bhkd->bhqd", p.astype(bf16), vh.astype(bf16),
                         preferred_element_type=f32)
        ctx = ctx.transpose(0, 2, 1, 3).reshape(B, S, E)
        x = x + (mm(ctx, lp.wo) + lp.bo)
        n2 = _layer_norm(x * m3, lp.ln2_g, lp.ln2_b, cfg.ln_eps) * m3
        x = x + (mm(_gelu_exact(mm(n2, lp.w1) + lp.b1), lp.w2) + lp.b2)

        if i < depth - 1:
            halting = _sigmoid(x[:, :, 0] * cfg.halt_gamma + cfg.halt_beta)
        else:
            halting = jnp.ones_like(mask)
        distr.append(jnp.mean(halting[0, 1:]))
        cum = cum + halting
        rhos = rhos + mask
        reached = (cum >= 1.0 - cfg.halt_eps).astype(f32)
        not_reached = 1.0 - reached
        rhos = rhos + rem * reached * mask
        w = rem * reached + halting * not_reached
        out_hidden = (out_hidden.astype(f32) + x * w[:, :, None]).astype(bf16)
        rem = rem - halting * not_reached
        mask = not_reached
        cnt = cnt + not_reached
        h = x.astype(bf16)

    distr = jnp.stack(distr)
    distr = distr / jnp.sum(distr)
    distr = jnp.clip(distr, 0.01, 0.99)
    return {
        "hidden_states": out_hidden.astype(f32),
        "rhos": rhos,
        "halting_score_distr": distr,
        "halting_score_distr_target": _halting_target(depth, cfg.expected_depth),
        "counter": cnt,
    }


def init_avit_params(key, depth, E, H, attn_bias):
    bf16 = jnp.bfloat16
    layers = []

    def lin(k, fan_in, fan_out, std=0.05, with_bias=True):
        kw, kb = jax.random.split(k)
        w = jax.random.normal(kw, (fan_out, fan_in), jnp.float32) * std  # torch [out,in]
        b = (jax.random.normal(kb, (fan_out,), jnp.float32) * 0.02
             if with_bias else jnp.zeros((fan_out,), jnp.float32))
        return w.T.astype(bf16), b          # -> [in,out] bf16, bias f32

    for _ in range(depth):
        key, kq, kk, kv, ko, k1, k2, kl1, kl2 = jax.random.split(key, 9)
        wq, bq = lin(kq, E, E, with_bias=attn_bias)
        wk, bk = lin(kk, E, E, with_bias=attn_bias)
        wv, bv = lin(kv, E, E, with_bias=attn_bias)
        wo, bo = lin(ko, E, E, with_bias=True)
        w1, b1 = lin(k1, E, H, with_bias=True)
        w2, b2 = lin(k2, H, E, with_bias=True)
        g1k, b1k = jax.random.split(kl1)
        g2k, b2k = jax.random.split(kl2)
        ln1_g = 1.0 + 0.1 * jax.random.normal(g1k, (E,), jnp.float32)
        ln1_b = 0.05 * jax.random.normal(b1k, (E,), jnp.float32)
        ln2_g = 1.0 + 0.1 * jax.random.normal(g2k, (E,), jnp.float32)
        ln2_b = 0.05 * jax.random.normal(b2k, (E,), jnp.float32)
        layers.append(LayerParams(wq, wk, wv, wo, bq, bk, bv, bo,
                                  ln1_g, ln1_b, ln2_g, ln2_b, w1, b1, w2, b2))
    return tuple(layers)


if __name__ == "__main__":
    # Small config consistent with the module.
    B, S, E = 2, 8, 32
    num_heads = 4
    mlp_ratio = 4.0
    H = int(E * mlp_ratio)
    depth = 3
    expected_depth = 2
    attn_bias = True
    # halt_beta chosen so cumulative halting scores stay far from the 1 - eps threshold
    # (robust to bf16 matmul / bf16 activation rounding).
    cfg = AViTConfig(num_heads=num_heads, expected_depth=expected_depth,
                     halt_beta=-3.0, halt_gamma=0.5, halt_eps=0.01, ln_eps=1e-6)

    key = jax.random.PRNGKey(0)
    k_x, k_p = jax.random.split(key)
    hidden_states = jax.random.normal(k_x, (B, S, E), dtype=jnp.float32)
    params = init_avit_params(k_p, depth, E, H, attn_bias)

    # Warm the Buffered(1) capability probe outside of jit tracing.
    _weight_pipeline_mode()

    out = avit_encoder_forward(hidden_states, params, cfg)
    out = jax.block_until_ready(out)

    assert out["hidden_states"].shape == (B, S, E)
    assert out["rhos"].shape == (B, S)
    assert out["counter"].shape == (B, S)
    assert out["halting_score_distr"].shape == (depth,)
    assert out["halting_score_distr_target"].shape == (depth,)

    ref = _reference_forward(hidden_states, params, cfg)
    for name in ("hidden_states", "rhos", "counter",
                 "halting_score_distr", "halting_score_distr_target"):
        a, b = out[name], ref[name]
        assert a.shape == b.shape, (name, a.shape, b.shape)
        assert jnp.allclose(a, b, atol=3e-2, rtol=3e-2), (
            name, float(jnp.max(jnp.abs(a - b))))

    print("KERNEL_OK")
</pallas_src>

<mosaic_0001>
module attributes {stable_mosaic.version = 11 : i64} {
  func.func @k(%arg0: i32, %arg1: memref<8x128xf32, #tpu.memory_space<vmem>>, %arg2: memref<8x128xf32, #tpu.memory_space<vmem>>) attributes {dimension_semantics = [#tpu.dimension_semantics<arbitrary>], iteration_bounds = array<i64: 2>, scalar_prefetch = 0 : i64, scratch_operands = 0 : i64, tpu.core_type = #tpu.core_type<tc>, window_params = [{pipeline_mode = #tpu.pipeline_mode<synchronous>, transform_indices = @transform_0, window_bounds = array<i64: 8, 128>}, {pipeline_mode = #tpu.pipeline_mode<synchronous>, transform_indices = @transform_1, window_bounds = array<i64: 8, 128>}]} {
    %c0 = arith.constant 0 : index
    %c0_0 = arith.constant 0 : index
    %0 = vector.load %arg1[%c0, %c0_0] : memref<8x128xf32, #tpu.memory_space<vmem>>, vector<8x128xf32>
    %cst = arith.constant 1.000000e+00 : f32
    %1 = vector.broadcast %cst : f32 to vector<8x128xf32>
    %2 = arith.addf %0, %1 : vector<8x128xf32>
    %c0_1 = arith.constant 0 : index
    %c0_2 = arith.constant 0 : index
    %3 = vector.load %arg2[%c0_1, %c0_2] : memref<8x128xf32, #tpu.memory_space<vmem>>, vector<8x128xf32>
    tpu.vector_store %arg2[%c0_1, %c0_2], %2 {strides = array<i32>} : memref<8x128xf32, #tpu.memory_space<vmem>>, vector<8x128xf32>,
    return
  }
  func.func @transform_0(%arg0: i32) -> (i32, i32) {
    %c0_i32 = arith.constant 0 : i32
    %c0_i32_0 = arith.constant 0 : i32
    %c0_i32_1 = arith.constant 0 : i32
    return %c0_i32, %c0_i32_0 : i32, i32
  }
  func.func @transform_1(%arg0: i32) -> (i32, i32) {
    %c0_i32 = arith.constant 0 : i32
    %c0_i32_0 = arith.constant 0 : i32
    %c0_i32_1 = arith.constant 0 : i32
    return %c0_i32, %c0_i32_0 : i32, i32
  }
}

module attributes {stable_mosaic.version = 11 : i64} {
  func.func @_avit_layer_kernel(%arg0: i32, %arg1: memref<1x8x32xbf16, #tpu.memory_space<vmem>>, %arg2: memref<1x8x8xf32, #tpu.memory_space<vmem>>, %arg3: memref<1x8x32xbf16, #tpu.memory_space<vmem>>, %arg4: memref<32x32xbf16, #tpu.memory_space<vmem>>, %arg5: memref<32x32xbf16, #tpu.memory_space<vmem>>, %arg6: memref<32x32xbf16, #tpu.memory_space<vmem>>, %arg7: memref<32x32xbf16, #tpu.memory_space<vmem>>, %arg8: memref<32x128xbf16, #tpu.memory_space<vmem>>, %arg9: memref<128x32xbf16, #tpu.memory_space<vmem>>, %arg10: memref<9x32xf32, #tpu.memory_space<vmem>>, %arg11: memref<1x128xf32, #tpu.memory_space<vmem>>, %arg12: memref<1x8x32xbf16, #tpu.memory_space<vmem>>, %arg13: memref<1x8x32xbf16, #tpu.memory_space<vmem>>, %arg14: memref<1x8x8xf32, #tpu.memory_space<vmem>>, %arg15: memref<8x32xf32, #tpu.memory_space<vmem>>) attributes {dimension_semantics = [#tpu.dimension_semantics<parallel>], iteration_bounds = array<i64: 2>, scalar_prefetch = 0 : i64, scratch_operands = 1 : i64, tpu.core_type = #tpu.core_type<tc>, window_params = [{transform_indices = @transform_0, window_bounds = array<i64: 1, 8, 32>}, {transform_indices = @transform_1, window_bounds = array<i64: 1, 8, 8>}, {transform_indices = @transform_2, window_bounds = array<i64: 1, 8, 32>}, {pipeline_mode = #tpu.pipeline_mode<synchronous>, transform_indices = @transform_3, window_bounds = array<i64: 32, 32>}, {pipeline_mode = #tpu.pipeline_mode<synchronous>, transform_indices = @transform_4, window_bounds = array<i64: 32, 32>}, {pipeline_mode = #tpu.pipeline_mode<synchronous>, transform_indices = @transform_5, window_bounds = array<i64: 32, 32>}, {pipeline_mode = #tpu.pipeline_mode<synchronous>, transform_indices = @transform_6, window_bounds = array<i64: 32, 32>}, {pipeline_mode = #tpu.pipeline_mode<synchronous>, transform_indices = @transform_7, window_bounds = array<i64: 32, 128>}, {pipeline_mode = #tpu.pipeline_mode<synchronous>, transform_indices = @transform_8, window_bounds = array<i64: 128, 32>}, {pipeline_mode = #tpu.pipeline_mode<synchronous>, transform_indices = @transform_9, window_bounds = array<i64: 9, 32>}, {pipeline_mode = #tpu.pipeline_mode<synchronous>, transform_indices = @transform_10, window_bounds = array<i64: 1, 128>}, {transform_indices = @transform_11, window_bounds = array<i64: 1, 8, 32>}, {transform_indices = @transform_12, window_bounds = array<i64: 1, 8, 32>}, {transform_indices = @transform_13, window_bounds = array<i64: 1, 8, 8>}]} {
    %c0 = arith.constant 0 : index
    %c0_0 = arith.constant 0 : index
    %c0_1 = arith.constant 0 : index
    %0 = vector.load %arg2[%c0, %c0_0, %c0_1] : memref<1x8x8xf32, #tpu.memory_space<vmem>>, vector<1x8x8xf32>
    %1 = vector.shape_cast %0 : vector<1x8x8xf32> to vector<8x8xf32>
    %2 = vector.extract_strided_slice %1 {offsets = [0, 0], sizes = [1, 8], strides = [1, 1]} : vector<8x8xf32> to vector<1x8xf32>
    %3 = vector.extract_strided_slice %1 {offsets = [1, 0], sizes = [1, 8], strides = [1, 1]} : vector<8x8xf32> to vector<1x8xf32>
    %4 = vector.extract_strided_slice %1 {offsets = [2, 0], sizes = [1, 8], strides = [1, 1]} : vector<8x8xf32> to vector<1x8xf32>
    %5 = vector.extract_strided_slice %1 {offsets = [3, 0], sizes = [1, 8], strides = [1, 1]} : vector<8x8xf32> to vector<1x8xf32>
    %6 = vector.extract_strided_slice %1 {offsets = [4, 0], sizes = [1, 8], strides = [1, 1]} : vector<8x8xf32> to vector<1x8xf32>
    %7 = tpu.transpose %2, [1, 0] : vector<1x8xf32> -> vector<8x1xf32>
    %c0_2 = arith.constant 0 : index
    %c0_3 = arith.constant 0 : index
    %8 = vector.load %arg10[%c0_2, %c0_3] : memref<9x32xf32, #tpu.memory_space<vmem>>, vector<9x32xf32>
    %9 = vector.extract_strided_slice %8 {offsets = [0, 0], sizes = [1, 32], strides = [1, 1]} : vector<9x32xf32> to vector<1x32xf32>
    %10 = vector.extract_strided_slice %8 {offsets = [1, 0], sizes = [1, 32], strides = [1, 1]} : vector<9x32xf32> to vector<1x32xf32>
    %11 = vector.extract_strided_slice %8 {offsets = [2, 0], sizes = [1, 32], strides = [1, 1]} : vector<9x32xf32> to vector<1x32xf32>
    %12 = vector.extract_strided_slice %8 {offsets = [3, 0], sizes = [1, 32], strides = [1, 1]} : vector<9x32xf32> to vector<1x32xf32>
    %13 = vector.extract_strided_slice %8 {offsets = [4, 0], sizes = [1, 32], strides = [1, 1]} : vector<9x32xf32> to vector<1x32xf32>
    %14 = vector.extract_strided_slice %8 {offsets = [5, 0], sizes = [1, 32], strides = [1, 1]} : vector<9x32xf32> to vector<1x32xf32>
    %15 = vector.extract_strided_slice %8 {offsets = [6, 0], sizes = [1, 32], strides = [1, 1]} : vector<9x32xf32> to vector<1x32xf32>
    %16 = vector.extract_strided_slice %8 {offsets = [7, 0], sizes = [1, 32], strides = [1, 1]} : vector<9x32xf32> to vector<1x32xf32>
    %17 = vector.extract_strided_slice %8 {offsets = [8, 0], sizes = [1, 32], strides = [1, 1]} : vector<9x32xf32> to vector<1x32xf32>
    %c0_4 = arith.constant 0 : index
    %c0_5 = arith.constant 0 : index
    %18 = vector.load %arg11[%c0_4, %c0_5] : memref<1x128xf32, #tpu.memory_space<vmem>>, vector<1x128xf32>
    %c0_6 = arith.constant 0 : index
    %c0_7 = arith.constant 0 : index
    %c0_8 = arith.constant 0 : index
    %19 = vector.load %arg1[%c0_6, %c0_7, %c0_8] : memref<1x8x32xbf16, #tpu.memory_space<vmem>>, vector<1x8x32xbf16>
    %20 = vector.shape_cast %19 : vector<1x8x32xbf16> to vector<8x32xbf16>
    %21 = arith.extf %20 : vector<8x32xbf16> to vector<8x32xf32>
    %22 = vector.broadcast %7 : vector<8x1xf32> to vector<8x32xf32>
    %23 = arith.mulf %21, %22 : vector<8x32xf32>
    %cst = arith.constant dense<0.000000e+00> : vector<8xf32>
    %24 = vector.multi_reduction <add>, %23, %cst [1] : vector<8x32xf32> to vector<8xf32>
    %25 = vector.shape_cast %24 : vector<8xf32> to vector<8x1xf32>
    %cst_9 = arith.constant 3.200000e+01 : f32
    %26 = vector.broadcast %cst_9 : f32 to vector<8x1xf32>
    %27 = arith.divf %25, %26 : vector<8x1xf32>
    %28 = vector.broadcast %27 : vector<8x1xf32> to vector<8x32xf32>
    %29 = arith.subf %23, %28 : vector<8x32xf32>
    %30 = arith.mulf %29, %29 : vector<8x32xf32>
    %cst_10 = arith.constant dense<0.000000e+00> : vector<8xf32>
    %31 = vector.multi_reduction <add>, %30, %cst_10 [1] : vector<8x32xf32> to vector<8xf32>
    %32 = vector.shape_cast %31 : vector<8xf32> to vector<8x1xf32>
    %cst_11 = arith.constant 3.200000e+01 : f32
    %33 = vector.broadcast %cst_11 : f32 to vector<8x1xf32>
    %34 = arith.divf %32, %33 : vector<8x1xf32>
    %cst_12 = arith.constant 9.99999997E-7 : f32
    %35 = vector.broadcast %cst_12 : f32 to vector<8x1xf32>
    %36 = arith.addf %34, %35 : vector<8x1xf32>
    %37 = math.rsqrt %36 : vector<8x1xf32>
    %38 = vector.broadcast %37 : vector<8x1xf32> to vector<8x32xf32>
    %39 = arith.mulf %29, %38 : vector<8x32xf32>
    %40 = vector.broadcast %13 : vector<1x32xf32> to vector<8x32xf32>
    %41 = arith.mulf %39, %40 : vector<8x32xf32>
    %42 = vector.broadcast %14 : vector<1x32xf32> to vector<8x32xf32>
    %43 = arith.addf %41, %42 : vector<8x32xf32>
    %44 = vector.broadcast %7 : vector<8x1xf32> to vector<8x32xf32>
    %45 = arith.mulf %43, %44 : vector<8x32xf32>
    %c0_13 = arith.constant 0 : index
    %c0_14 = arith.constant 0 : index
    %46 = vector.load %arg4[%c0_13, %c0_14] : memref<32x32xbf16, #tpu.memory_space<vmem>>, vector<32x32xbf16>
    %47 = arith.truncf %45 : vector<8x32xf32> to vector<8x32xbf16>
    %cst_15 = arith.constant dense<0.000000e+00> : vector<8x32xf32>
    %48 = tpu.matmul %47, %46, %cst_15 {dimension_numbers = #tpu.dot_dimension_numbers<[1], [0], [0], [1], [0, 0, 1, 1], [], []>} : vector<8x32xbf16>, vector<32x32xbf16>, vector<8x32xf32> -> vector<8x32xf32>
    %49 = vector.broadcast %9 : vector<1x32xf32> to vector<8x32xf32>
    %50 = arith.addf %48, %49 : vector<8x32xf32>
    %c0_16 = arith.constant 0 : index
    %c0_17 = arith.constant 0 : index
    %51 = vector.load %arg5[%c0_16, %c0_17] : memref<32x32xbf16, #tpu.memory_space<vmem>>, vector<32x32xbf16>
    %52 = arith.truncf %45 : vector<8x32xf32> to vector<8x32xbf16>
    %cst_18 = arith.constant dense<0.000000e+00> : vector<8x32xf32>
    %53 = tpu.matmul %52, %51, %cst_18 {dimension_numbers = #tpu.dot_dimension_numbers<[1], [0], [0], [1], [0, 0, 1, 1], [], []>} : vector<8x32xbf16>, vector<32x32xbf16>, vector<8x32xf32> -> vector<8x32xf32>
    %54 = vector.broadcast %10 : vector<1x32xf32> to vector<8x32xf32>
    %55 = arith.addf %53, %54 : vector<8x32xf32>
    %c0_19 = arith.constant 0 : index
    %c0_20 = arith.constant 0 : index
    %56 = vector.load %arg6[%c0_19, %c0_20] : memref<32x32xbf16, #tpu.memory_space<vmem>>, vector<32x32xbf16>
    %57 = arith.truncf %45 : vector<8x32xf32> to vector<8x32xbf16>
    %cst_21 = arith.constant dense<0.000000e+00> : vector<8x32xf32>
    %58 = tpu.matmul %57, %56, %cst_21 {dimension_numbers = #tpu.dot_dimension_numbers<[1], [0], [0], [1], [0, 0, 1, 1], [], []>} : vector<8x32xbf16>, vector<32x32xbf16>, vector<8x32xf32> -> vector<8x32xf32>
    %59 = vector.broadcast %11 : vector<1x32xf32> to vector<8x32xf32>
    %60 = arith.addf %58, %59 : vector<8x32xf32>
    %cst_22 = arith.constant 1.000000e+00 : f32
    %61 = vector.broadcast %cst_22 : f32 to vector<1x8xf32>
    %62 = arith.subf %61, %2 : vector<1x8xf32>
    %cst_23 = arith.constant -1.000000e+08 : f32
    %63 = vector.broadcast %cst_23 : f32 to vector<1x8xf32>
    %64 = arith.mulf %62, %63 : vector<1x8xf32>
    %65 = vector.extract_strided_slice %50 {offsets = [0, 0], sizes = [8, 8], strides = [1, 1]} : vector<8x32xf32> to vector<8x8xf32>
    %66 = arith.truncf %65 : vector<8x8xf32> to vector<8x8xbf16>
    %67 = vector.extract_strided_slice %55 {offsets = [0, 0], sizes = [8, 8], strides = [1, 1]} : vector<8x32xf32> to vector<8x8xf32>
    %68 = arith.truncf %67 : vector<8x8xf32> to vector<8x8xbf16>
    %69 = vector.extract_strided_slice %60 {offsets = [0, 0], sizes = [8, 8], strides = [1, 1]} : vector<8x32xf32> to vector<8x8xf32>
    %70 = arith.truncf %69 : vector<8x8xf32> to vector<8x8xbf16>
    %cst_24 = arith.constant dense<0.000000e+00> : vector<8x8xf32>
    %71 = tpu.matmul %66, %68, %cst_24 {dimension_numbers = #tpu.dot_dimension_numbers<[1], [1], [0], [0], [0, 0, 1, 0], [], []>} : vector<8x8xbf16>, vector<8x8xbf16>, vector<8x8xf32> -> vector<8x8xf32>
    %cst_25 = arith.constant 0.353553385 : f32
    %72 = vector.broadcast %cst_25 : f32 to vector<8x8xf32>
    %73 = arith.mulf %71, %72 : vector<8x8xf32>
    %74 = vector.broadcast %64 : vector<1x8xf32> to vector<8x8xf32>
    %75 = arith.addf %73, %74 : vector<8x8xf32>
    %cst_26 = arith.constant dense<0xFF800000> : vector<8xf32>
    %76 = vector.multi_reduction <maximumf>, %75, %cst_26 [1] : vector<8x8xf32> to vector<8xf32>
    %77 = vector.shape_cast %76 : vector<8xf32> to vector<8x1xf32>
    %78 = vector.broadcast %77 : vector<8x1xf32> to vector<8x8xf32>
    %79 = arith.subf %75, %78 : vector<8x8xf32>
    %80 = math.exp %79 : vector<8x8xf32>
    %cst_27 = arith.constant dense<0.000000e+00> : vector<8xf32>
    %81 = vector.multi_reduction <add>, %80, %cst_27 [1] : vector<8x8xf32> to vector<8xf32>
    %82 = vector.shape_cast %81 : vector<8xf32> to vector<8x1xf32>
    %83 = tpu.reciprocal %82 {approx = true} : vector<8x1xf32> -> vector<8x1xf32>
    %84 = vector.broadcast %83 : vector<8x1xf32> to vector<8x8xf32>
    %85 = arith.mulf %80, %84 : vector<8x8xf32>
    %86 = arith.truncf %85 : vector<8x8xf32> to vector<8x8xbf16>
    %cst_28 = arith.constant dense<0.000000e+00> : vector<8x8xf32>
    %87 = tpu.matmul %86, %70, %cst_28 {dimension_numbers = #tpu.dot_dimension_numbers<[1], [0], [0], [1], [0, 0, 1, 1], [], []>} : vector<8x8xbf16>, vector<8x8xbf16>, vector<8x8xf32> -> vector<8x8xf32>
    %c0_29 = arith.constant 0 : index
    %c0_30 = arith.constant 0 : index
    %88 = vector.load %arg15[%c0_29, %c0_30] : memref<8x32xf32, #tpu.memory_space<vmem>>, vector<8x8xf32>
    tpu.vector_store %arg15[%c0_29, %c0_30], %87 {strides = array<i32>} : memref<8x32xf32, #tpu.memory_space<vmem>>, vector<8x8xf32>,
    %89 = vector.extract_strided_slice %50 {offsets = [0, 8], sizes = [8, 8], strides = [1, 1]} : vector<8x32xf32> to vector<8x8xf32>
    %90 = arith.truncf %89 : vector<8x8xf32> to vector<8x8xbf16>
    %91 = vector.extract_strided_slice %55 {offsets = [0, 8], sizes = [8, 8], strides = [1, 1]} : vector<8x32xf32> to vector<8x8xf32>
    %92 = arith.truncf %91 : vector<8x8xf32> to vector<8x8xbf16>
    %93 = vector.extract_strided_slice %60 {offsets = [0, 8], sizes = [8, 8], strides = [1, 1]} : vector<8x32xf32> to vector<8x8xf32>
    %94 = arith.truncf %93 : vector<8x8xf32> to vector<8x8xbf16>
    %cst_31 = arith.constant dense<0.000000e+00> : vector<8x8xf32>
    %95 = tpu.matmul %90, %92, %cst_31 {dimension_numbers = #tpu.dot_dimension_numbers<[1], [1], [0], [0], [0, 0, 1, 0], [], []>} : vector<8x8xbf16>, vector<8x8xbf16>, vector<8x8xf32> -> vector<8x8xf32>
    %cst_32 = arith.constant 0.353553385 : f32
    %96 = vector.broadcast %cst_32 : f32 to vector<8x8xf32>
    %97 = arith.mulf %95, %96 : vector<8x8xf32>
    %98 = vector.broadcast %64 : vector<1x8xf32> to vector<8x8xf32>
    %99 = arith.addf %97, %98 : vector<8x8xf32>
    %cst_33 = arith.constant dense<0xFF800000> : vector<8xf32>
    %100 = vector.multi_reduction <maximumf>, %99, %cst_33 [1] : vector<8x8xf32> to vector<8xf32>
    %101 = vector.shape_cast %100 : vector<8xf32> to vector<8x1xf32>
    %102 = vector.broadcast %101 : vector<8x1xf32> to vector<8x8xf32>
    %103 = arith.subf %99, %102 : vector<8x8xf32>
    %104 = math.exp %103 : vector<8x8xf32>
    %cst_34 = arith.constant dense<0.000000e+00> : vector<8xf32>
    %105 = vector.multi_reduction <add>, %104, %cst_34 [1] : vector<8x8xf32> to vector<8xf32>
    %106 = vector.shape_cast %105 : vector<8xf32> to vector<8x1xf32>
    %107 = tpu.reciprocal %106 {approx = true} : vector<8x1xf32> -> vector<8x1xf32>
    %108 = vector.broadcast %107 : vector<8x1xf32> to vector<8x8xf32>
    %109 = arith.mulf %104, %108 : vector<8x8xf32>
    %110 = arith.truncf %109 : vector<8x8xf32> to vector<8x8xbf16>
    %cst_35 = arith.constant dense<0.000000e+00> : vector<8x8xf32>
    %111 = tpu.matmul %110, %94, %cst_35 {dimension_numbers = #tpu.dot_dimension_numbers<[1], [0], [0], [1], [0, 0, 1, 1], [], []>} : vector<8x8xbf16>, vector<8x8xbf16>, vector<8x8xf32> -> vector<8x8xf32>
    %c0_36 = arith.constant 0 : index
    %c8 = arith.constant 8 : index
    %112 = vector.load %arg15[%c0_36, %c8] : memref<8x32xf32, #tpu.memory_space<vmem>>, vector<8x8xf32>
    tpu.vector_store %arg15[%c0_36, %c8], %111 {strides = array<i32>} : memref<8x32xf32, #tpu.memory_space<vmem>>, vector<8x8xf32>,
    %113 = vector.extract_strided_slice %50 {offsets = [0, 16], sizes = [8, 8], strides = [1, 1]} : vector<8x32xf32> to vector<8x8xf32>
    %114 = arith.truncf %113 : vector<8x8xf32> to vector<8x8xbf16>
    %115 = vector.extract_strided_slice %55 {offsets = [0, 16], sizes = [8, 8], strides = [1, 1]} : vector<8x32xf32> to vector<8x8xf32>
    %116 = arith.truncf %115 : vector<8x8xf32> to vector<8x8xbf16>
    %117 = vector.extract_strided_slice %60 {offsets = [0, 16], sizes = [8, 8], strides = [1, 1]} : vector<8x32xf32> to vector<8x8xf32>
    %118 = arith.truncf %117 : vector<8x8xf32> to vector<8x8xbf16>
    %cst_37 = arith.constant dense<0.000000e+00> : vector<8x8xf32>
    %119 = tpu.matmul %114, %116, %cst_37 {dimension_numbers = #tpu.dot_dimension_numbers<[1], [1], [0], [0], [0, 0, 1, 0], [], []>} : vector<8x8xbf16>, vector<8x8xbf16>, vector<8x8xf32> -> vector<8x8xf32>
    %cst_38 = arith.constant 0.353553385 : f32
    %120 = vector.broadcast %cst_38 : f32 to vector<8x8xf32>
    %121 = arith.mulf %119, %120 : vector<8x8xf32>
    %122 = vector.broadcast %64 : vector<1x8xf32> to vector<8x8xf32>
    %123 = arith.addf %121, %122 : vector<8x8xf32>
    %cst_39 = arith.constant dense<0xFF800000> : vector<8xf32>
    %124 = vector.multi_reduction <maximumf>, %123, %cst_39 [1] : vector<8x8xf32> to vector<8xf32>
    %125 = vector.shape_cast %124 : vector<8xf32> to vector<8x1xf32>
    %126 = vector.broadcast %125 : vector<8x1xf32> to vector<8x8xf32>
    %127 = arith.subf %123, %126 : vector<8x8xf32>
    %128 = math.exp %127 : vector<8x8xf32>
    %cst_40 = arith.constant dense<0.000000e+00> : vector<8xf32>
    %129 = vector.multi_reduction <add>, %128, %cst_40 [1] : vector<8x8xf32> to vector<8xf32>
    %130 = vector.shape_cast %129 : vector<8xf32> to vector<8x1xf32>
    %131 = tpu.reciprocal %130 {approx = true} : vector<8x1xf32> -> vector<8x1xf32>
    %132 = vector.broadcast %131 : vector<8x1xf32> to vector<8x8xf32>
    %133 = arith.mulf %128, %132 : vector<8x8xf32>
    %134 = arith.truncf %133 : vector<8x8xf32> to vector<8x8xbf16>
    %cst_41 = arith.constant dense<0.000000e+00> : vector<8x8xf32>
    %135 = tpu.matmul %134, %118, %cst_41 {dimension_numbers = #tpu.dot_dimension_numbers<[1], [0], [0], [1], [0, 0, 1, 1], [], []>} : vector<8x8xbf16>, vector<8x8xbf16>, vector<8x8xf32> -> vector<8x8xf32>
    %c0_42 = arith.constant 0 : index
    %c16 = arith.constant 16 : index
    %136 = vector.load %arg15[%c0_42, %c16] : memref<8x32xf32, #tpu.memory_space<vmem>>, vector<8x8xf32>
    tpu.vector_store %arg15[%c0_42, %c16], %135 {strides = array<i32>} : memref<8x32xf32, #tpu.memory_space<vmem>>, vector<8x8xf32>,
    %137 = vector.extract_strided_slice %50 {offsets = [0, 24], sizes = [8, 8], strides = [1, 1]} : vector<8x32xf32> to vector<8x8xf32>
    %138 = arith.truncf %137 : vector<8x8xf32> to vector<8x8xbf16>
    %139 = vector.extract_strided_slice %55 {offsets = [0, 24], sizes = [8, 8], strides = [1, 1]} : vector<8x32xf32> to vector<8x8xf32>
    %140 = arith.truncf %139 : vector<8x8xf32> to vector<8x8xbf16>
    %141 = vector.extract_strided_slice %60 {offsets = [0, 24], sizes = [8, 8], strides = [1, 1]} : vector<8x32xf32> to vector<8x8xf32>
    %142 = arith.truncf %141 : vector<8x8xf32> to vector<8x8xbf16>
    %cst_43 = arith.constant dense<0.000000e+00> : vector<8x8xf32>
    %143 = tpu.matmul %138, %140, %cst_43 {dimension_numbers = #tpu.dot_dimension_numbers<[1], [1], [0], [0], [0, 0, 1, 0], [], []>} : vector<8x8xbf16>, vector<8x8xbf16>, vector<8x8xf32> -> vector<8x8xf32>
    %cst_44 = arith.constant 0.353553385 : f32
    %144 = vector.broadcast %cst_44 : f32 to vector<8x8xf32>
    %145 = arith.mulf %143, %144 : vector<8x8xf32>
    %146 = vector.broadcast %64 : vector<1x8xf32> to vector<8x8xf32>
    %147 = arith.addf %145, %146 : vector<8x8xf32>
    %cst_45 = arith.constant dense<0xFF800000> : vector<8xf32>
    %148 = vector.multi_reduction <maximumf>, %147, %cst_45 [1] : vector<8x8xf32> to vector<8xf32>
    %149 = vector.shape_cast %148 : vector<8xf32> to vector<8x1xf32>
    %150 = vector.broadcast %149 : vector<8x1xf32> to vector<8x8xf32>
    %151 = arith.subf %147, %150 : vector<8x8xf32>
    %152 = math.exp %151 : vector<8x8xf32>
    %cst_46 = arith.constant dense<0.000000e+00> : vector<8xf32>
    %153 = vector.multi_reduction <add>, %152, %cst_46 [1] : vector<8x8xf32> to vector<8xf32>
    %154 = vector.shape_cast %153 : vector<8xf32> to vector<8x1xf32>
    %155 = tpu.reciprocal %154 {approx = true} : vector<8x1xf32> -> vector<8x1xf32>
    %156 = vector.broadcast %155 : vector<8x1xf32> to vector<8x8xf32>
    %157 = arith.mulf %152, %156 : vector<8x8xf32>
    %158 = arith.truncf %157 : vector<8x8xf32> to vector<8x8xbf16>
    %cst_47 = arith.constant dense<0.000000e+00> : vector<8x8xf32>
    %159 = tpu.matmul %158, %142, %cst_47 {dimension_numbers = #tpu.dot_dimension_numbers<[1], [0], [0], [1], [0, 0, 1, 1], [], []>} : vector<8x8xbf16>, vector<8x8xbf16>, vector<8x8xf32> -> vector<8x8xf32>
    %c0_48 = arith.constant 0 : index
    %c24 = arith.constant 24 : index
    %160 = vector.load %arg15[%c0_48, %c24] : memref<8x32xf32, #tpu.memory_space<vmem>>, vector<8x8xf32>
    tpu.vector_store %arg15[%c0_48, %c24], %159 {strides = array<i32>} : memref<8x32xf32, #tpu.memory_space<vmem>>, vector<8x8xf32>,
    %c0_49 = arith.constant 0 : index
    %c0_50 = arith.constant 0 : index
    %161 = vector.load %arg15[%c0_49, %c0_50] : memref<8x32xf32, #tpu.memory_space<vmem>>, vector<8x32xf32>
    %c0_51 = arith.constant 0 : index
    %c0_52 = arith.constant 0 : index
    %162 = vector.load %arg7[%c0_51, %c0_52] : memref<32x32xbf16, #tpu.memory_space<vmem>>, vector<32x32xbf16>
    %163 = arith.truncf %161 : vector<8x32xf32> to vector<8x32xbf16>
    %cst_53 = arith.constant dense<0.000000e+00> : vector<8x32xf32>
    %164 = tpu.matmul %163, %162, %cst_53 {dimension_numbers = #tpu.dot_dimension_numbers<[1], [0], [0], [1], [0, 0, 1, 1], [], []>} : vector<8x32xbf16>, vector<32x32xbf16>, vector<8x32xf32> -> vector<8x32xf32>
    %165 = vector.broadcast %12 : vector<1x32xf32> to vector<8x32xf32>
    %166 = arith.addf %164, %165 : vector<8x32xf32>
    %167 = arith.addf %23, %166 : vector<8x32xf32>
    %168 = vector.broadcast %7 : vector<8x1xf32> to vector<8x32xf32>
    %169 = arith.mulf %167, %168 : vector<8x32xf32>
    %cst_54 = arith.constant dense<0.000000e+00> : vector<8xf32>
    %170 = vector.multi_reduction <add>, %169, %cst_54 [1] : vector<8x32xf32> to vector<8xf32>
    %171 = vector.shape_cast %170 : vector<8xf32> to vector<8x1xf32>
    %cst_55 = arith.constant 3.200000e+01 : f32
    %172 = vector.broadcast %cst_55 : f32 to vector<8x1xf32>
    %173 = arith.divf %171, %172 : vector<8x1xf32>
    %174 = vector.broadcast %173 : vector<8x1xf32> to vector<8x32xf32>
    %175 = arith.subf %169, %174 : vector<8x32xf32>
    %176 = arith.mulf %175, %175 : vector<8x32xf32>
    %cst_56 = arith.constant dense<0.000000e+00> : vector<8xf32>
    %177 = vector.multi_reduction <add>, %176, %cst_56 [1] : vector<8x32xf32> to vector<8xf32>
    %178 = vector.shape_cast %177 : vector<8xf32> to vector<8x1xf32>
    %cst_57 = arith.constant 3.200000e+01 : f32
    %179 = vector.broadcast %cst_57 : f32 to vector<8x1xf32>
    %180 = arith.divf %178, %179 : vector<8x1xf32>
    %cst_58 = arith.constant 9.99999997E-7 : f32
    %181 = vector.broadcast %cst_58 : f32 to vector<8x1xf32>
    %182 = arith.addf %180, %181 : vector<8x1xf32>
    %183 = math.rsqrt %182 : vector<8x1xf32>
    %184 = vector.broadcast %183 : vector<8x1xf32> to vector<8x32xf32>
    %185 = arith.mulf %175, %184 : vector<8x32xf32>
    %186 = vector.broadcast %15 : vector<1x32xf32> to vector<8x32xf32>
    %187 = arith.mulf %185, %186 : vector<8x32xf32>
    %188 = vector.broadcast %16 : vector<1x32xf32> to vector<8x32xf32>
    %189 = arith.addf %187, %188 : vector<8x32xf32>
    %190 = vector.broadcast %7 : vector<8x1xf32> to vector<8x32xf32>
    %191 = arith.mulf %189, %190 : vector<8x32xf32>
    %c0_59 = arith.constant 0 : index
    %c0_60 = arith.constant 0 : index
    %192 = vector.load %arg8[%c0_59, %c0_60] : memref<32x128xbf16, #tpu.memory_space<vmem>>, vector<32x128xbf16>
    %193 = arith.truncf %191 : vector<8x32xf32> to vector<8x32xbf16>
    %cst_61 = arith.constant dense<0.000000e+00> : vector<8x128xf32>
    %194 = tpu.matmul %193, %192, %cst_61 {dimension_numbers = #tpu.dot_dimension_numbers<[1], [0], [0], [1], [0, 0, 1, 1], [], []>} : vector<8x32xbf16>, vector<32x128xbf16>, vector<8x128xf32> -> vector<8x128xf32>
    %195 = vector.broadcast %18 : vector<1x128xf32> to vector<8x128xf32>
    %196 = arith.addf %194, %195 : vector<8x128xf32>
    %cst_62 = arith.constant 5.000000e-01 : f32
    %197 = vector.broadcast %cst_62 : f32 to vector<8x128xf32>
    %198 = arith.mulf %197, %196 : vector<8x128xf32>
    %cst_63 = arith.constant 0.707106769 : f32
    %199 = vector.broadcast %cst_63 : f32 to vector<8x128xf32>
    %200 = arith.mulf %196, %199 : vector<8x128xf32>
    %cst_64 = arith.constant 0.000000e+00 : f32
    %201 = vector.broadcast %cst_64 : f32 to vector<8x128xf32>
    %202 = arith.cmpf oge, %200, %201 : vector<8x128xf32>
    %cst_65 = arith.constant 1.000000e+00 : f32
    %cst_66 = arith.constant -1.000000e+00 : f32
    %203 = vector.broadcast %cst_65 : f32 to vector<8x128xf32>
    %204 = vector.broadcast %cst_66 : f32 to vector<8x128xf32>
    %205 = arith.select %202, %203, %204 : vector<8x128xi1>, vector<8x128xf32>
    %206 = math.absf %200 : vector<8x128xf32>
    %cst_67 = arith.constant 0.327591091 : f32
    %207 = vector.broadcast %cst_67 : f32 to vector<8x128xf32>
    %208 = arith.mulf %207, %206 : vector<8x128xf32>
    %cst_68 = arith.constant 1.000000e+00 : f32
    %209 = vector.broadcast %cst_68 : f32 to vector<8x128xf32>
    %210 = arith.addf %209, %208 : vector<8x128xf32>
    %cst_69 = arith.constant 1.000000e+00 : f32
    %211 = vector.broadcast %cst_69 : f32 to vector<8x128xf32>
    %212 = arith.divf %211, %210 : vector<8x128xf32>
    %cst_70 = arith.constant 1.06140542 : f32
    %213 = vector.broadcast %cst_70 : f32 to vector<8x128xf32>
    %214 = arith.mulf %213, %212 : vector<8x128xf32>
    %cst_71 = arith.constant -1.45315206 : f32
    %215 = vector.broadcast %cst_71 : f32 to vector<8x128xf32>
    %216 = arith.addf %214, %215 : vector<8x128xf32>
    %217 = arith.mulf %216, %212 : vector<8x128xf32>
    %cst_72 = arith.constant 1.42141378 : f32
    %218 = vector.broadcast %cst_72 : f32 to vector<8x128xf32>
    %219 = arith.addf %217, %218 : vector<8x128xf32>
    %220 = arith.mulf %219, %212 : vector<8x128xf32>
    %cst_73 = arith.constant -0.284496725 : f32
    %221 = vector.broadcast %cst_73 : f32 to vector<8x128xf32>
    %222 = arith.addf %220, %221 : vector<8x128xf32>
    %223 = arith.mulf %222, %212 : vector<8x128xf32>
    %cst_74 = arith.constant 0.254829586 : f32
    %224 = vector.broadcast %cst_74 : f32 to vector<8x128xf32>
    %225 = arith.addf %223, %224 : vector<8x128xf32>
    %226 = arith.mulf %225, %212 : vector<8x128xf32>
    %cst_75 = arith.constant 0.000000e+00 : f32
    %227 = vector.broadcast %cst_75 : f32 to vector<8x128xf32>
    %228 = arith.subf %227, %206 : vector<8x128xf32>
    %229 = arith.mulf %228, %206 : vector<8x128xf32>
    %230 = math.exp %229 : vector<8x128xf32>
    %231 = arith.mulf %226, %230 : vector<8x128xf32>
    %cst_76 = arith.constant 1.000000e+00 : f32
    %232 = vector.broadcast %cst_76 : f32 to vector<8x128xf32>
    %233 = arith.subf %232, %231 : vector<8x128xf32>
    %234 = arith.mulf %205, %233 : vector<8x128xf32>
    %cst_77 = arith.constant 1.000000e+00 : f32
    %235 = vector.broadcast %cst_77 : f32 to vector<8x128xf32>
    %236 = arith.addf %235, %234 : vector<8x128xf32>
    %237 = arith.mulf %198, %236 : vector<8x128xf32>
    %c0_78 = arith.constant 0 : index
    %c0_79 = arith.constant 0 : index
    %238 = vector.load %arg9[%c0_78, %c0_79] : memref<128x32xbf16, #tpu.memory_space<vmem>>, vector<128x32xbf16>
    %239 = arith.truncf %237 : vector<8x128xf32> to vector<8x128xbf16>
    %cst_80 = arith.constant dense<0.000000e+00> : vector<8x32xf32>
    %240 = tpu.matmul %239, %238, %cst_80 {dimension_numbers = #tpu.dot_dimension_numbers<[1], [0], [0], [1], [0, 0, 1, 1], [], []>} : vector<8x128xbf16>, vector<128x32xbf16>, vector<8x32xf32> -> vector<8x32xf32>
    %241 = vector.broadcast %17 : vector<1x32xf32> to vector<8x32xf32>
    %242 = arith.addf %240, %241 : vector<8x32xf32>
    %243 = arith.addf %167, %242 : vector<8x32xf32>
    %244 = arith.truncf %243 : vector<8x32xf32> to vector<8x32xbf16>
    %c0_81 = arith.constant 0 : index
    %c0_82 = arith.constant 0 : index
    %c0_83 = arith.constant 0 : index
    %245 = vector.load %arg12[%c0_81, %c0_82, %c0_83] : memref<1x8x32xbf16, #tpu.memory_space<vmem>>, vector<1x8x32xbf16>
    %246 = vector.shape_cast %245 : vector<1x8x32xbf16> to vector<8x32xbf16>
    %247 = vector.shape_cast %244 : vector<8x32xbf16> to vector<1x8x32xbf16>
    tpu.vector_store %arg12[%c0_81, %c0_82, %c0_83], %247 {strides = array<i32>} : memref<1x8x32xbf16, #tpu.memory_space<vmem>>, vector<1x8x32xbf16>,
    %248 = vector.extract_strided_slice %243 {offsets = [0, 0], sizes = [8, 1], strides = [1, 1]} : vector<8x32xf32> to vector<8x1xf32>
    %cst_84 = arith.constant 5.000000e-01 : f32
    %249 = vector.broadcast %cst_84 : f32 to vector<8x1xf32>
    %250 = arith.mulf %248, %249 : vector<8x1xf32>
    %cst_85 = arith.constant -3.000000e+00 : f32
    %251 = vector.broadcast %cst_85 : f32 to vector<8x1xf32>
    %252 = arith.addf %250, %251 : vector<8x1xf32>
    %cst_86 = arith.constant 0.000000e+00 : f32
    %253 = vector.broadcast %cst_86 : f32 to vector<8x1xf32>
    %254 = arith.subf %253, %252 : vector<8x1xf32>
    %255 = math.exp %254 : vector<8x1xf32>
    %cst_87 = arith.constant 1.000000e+00 : f32
    %256 = vector.broadcast %cst_87 : f32 to vector<8x1xf32>
    %257 = arith.addf %256, %255 : vector<8x1xf32>
    %258 = tpu.reciprocal %257 {approx = true} : vector<8x1xf32> -> vector<8x1xf32>
    %259 = tpu.transpose %258, [1, 0] : vector<8x1xf32> -> vector<1x8xf32>
    %260 = arith.addf %3, %259 : vector<1x8xf32>
    %261 = arith.addf %5, %2 : vector<1x8xf32>
    %cst_88 = arith.constant 9.900000e-01 : f32
    %262 = vector.broadcast %cst_88 : f32 to vector<1x8xf32>
    %263 = arith.cmpf oge, %260, %262 : vector<1x8xf32>
    %264 = arith.extui %263 : vector<1x8xi1> to vector<1x8xi32>
    %265 = arith.sitofp %264 : vector<1x8xi32> to vector<1x8xf32>
    %cst_89 = arith.constant 1.000000e+00 : f32
    %266 = vector.broadcast %cst_89 : f32 to vector<1x8xf32>
    %267 = arith.subf %266, %265 : vector<1x8xf32>
    %268 = arith.mulf %4, %265 : vector<1x8xf32>
    %269 = arith.mulf %268, %2 : vector<1x8xf32>
    %270 = arith.addf %261, %269 : vector<1x8xf32>
    %271 = arith.mulf %4, %265 : vector<1x8xf32>
    %272 = arith.mulf %259, %267 : vector<1x8xf32>
    %273 = arith.addf %271, %272 : vector<1x8xf32>
    %274 = arith.mulf %259, %267 : vector<1x8xf32>
    %275 = arith.subf %4, %274 : vector<1x8xf32>
    %276 = arith.addf %6, %267 : vector<1x8xf32>
    %c0_90 = arith.constant 0 : index
    %c0_91 = arith.constant 0 : index
    %c0_92 = arith.constant 0 : index
    %277 = vector.load %arg3[%c0_90, %c0_91, %c0_92] : memref<1x8x32xbf16, #tpu.memory_space<vmem>>, vector<1x8x32xbf16>
    %278 = vector.shape_cast %277 : vector<1x8x32xbf16> to vector<8x32xbf16>
    %279 = arith.extf %278 : vector<8x32xbf16> to vector<8x32xf32>
    %280 = tpu.transpose %273, [1, 0] : vector<1x8xf32> -> vector<8x1xf32>
    %281 = vector.broadcast %280 : vector<8x1xf32> to vector<8x32xf32>
    %282 = arith.mulf %243, %281 : vector<8x32xf32>
    %283 = arith.addf %279, %282 : vector<8x32xf32>
    %284 = arith.truncf %283 : vector<8x32xf32> to vector<8x32xbf16>
    %c0_93 = arith.constant 0 : index
    %c0_94 = arith.constant 0 : index
    %c0_95 = arith.constant 0 : index
    %285 = vector.load %arg13[%c0_93, %c0_94, %c0_95] : memref<1x8x32xbf16, #tpu.memory_space<vmem>>, vector<1x8x32xbf16>
    %286 = vector.shape_cast %285 : vector<1x8x32xbf16> to vector<8x32xbf16>
    %287 = vector.shape_cast %284 : vector<8x32xbf16> to vector<1x8x32xbf16>
    tpu.vector_store %arg13[%c0_93, %c0_94, %c0_95], %287 {strides = array<i32>} : memref<1x8x32xbf16, #tpu.memory_space<vmem>>, vector<1x8x32xbf16>,
    %cst_96 = arith.constant 0.000000e+00 : f32
    %288 = vector.broadcast %cst_96 : f32 to vector<1x8xf32>
    %289 = tpu.concatenate %267, %260, %275, %270, %276, %259, %288, %288 in 0 : vector<1x8xf32>, vector<1x8xf32>, vector<1x8xf32>, vector<1x8xf32>, vector<1x8xf32>, vector<1x8xf32>, vector<1x8xf32>, vector<1x8xf32> -> vector<8x8xf32>
    %c0_97 = arith.constant 0 : index
    %c0_98 = arith.constant 0 : index
    %c0_99 = arith.constant 0 : index
    %290 = vector.load %arg14[%c0_97, %c0_98, %c0_99] : memref<1x8x8xf32, #tpu.memory_space<vmem>>, vector<1x8x8xf32>
    %291 = vector.shape_cast %290 : vector<1x8x8xf32> to vector<8x8xf32>
    %292 = vector.shape_cast %289 : vector<8x8xf32> to vector<1x8x8xf32>
    tpu.vector_store %arg14[%c0_97, %c0_98, %c0_99], %292 {strides = array<i32>} : memref<1x8x8xf32, #tpu.memory_space<vmem>>, vector<1x8x8xf32>,
    return
  }
  func.func @transform_0(%arg0: i32) -> (i32, i32, i32) {
    %c0_i32 = arith.constant 0 : i32
    %c0_i32_0 = arith.constant 0 : i32
    %c0_i32_1 = arith.constant 0 : i32
    return %arg0, %c0_i32, %c0_i32_0 : i32, i32, i32
  }
  func.func @transform_1(%arg0: i32) -> (i32, i32, i32) {
    %c0_i32 = arith.constant 0 : i32
    %c0_i32_0 = arith.constant 0 : i32
    %c0_i32_1 = arith.constant 0 : i32
    return %arg0, %c0_i32, %c0_i32_0 : i32, i32, i32
  }
  func.func @transform_2(%arg0: i32) -> (i32, i32, i32) {
    %c0_i32 = arith.constant 0 : i32
    %c0_i32_0 = arith.constant 0 : i32
    %c0_i32_1 = arith.constant 0 : i32
    return %arg0, %c0_i32, %c0_i32_0 : i32, i32, i32
  }
  func.func @transform_3(%arg0: i32) -> (i32, i32) {
    %c0_i32 = arith.constant 0 : i32
    %c0_i32_0 = arith.constant 0 : i32
    %c0_i32_1 = arith.constant 0 : i32
    return %c0_i32, %c0_i32_0 : i32, i32
  }
  func.func @transform_4(%arg0: i32) -> (i32, i32) {
    %c0_i32 = arith.constant 0 : i32
    %c0_i32_0 = arith.constant 0 : i32
    %c0_i32_1 = arith.constant 0 : i32
    return %c0_i32, %c0_i32_0 : i32, i32
  }
  func.func @transform_5(%arg0: i32) -> (i32, i32) {
    %c0_i32 = arith.constant 0 : i32
    %c0_i32_0 = arith.constant 0 : i32
    %c0_i32_1 = arith.constant 0 : i32
    return %c0_i32, %c0_i32_0 : i32, i32
  }
  func.func @transform_6(%arg0: i32) -> (i32, i32) {
    %c0_i32 = arith.constant 0 : i32
    %c0_i32_0 = arith.constant 0 : i32
    %c0_i32_1 = arith.constant 0 : i32
    return %c0_i32, %c0_i32_0 : i32, i32
  }
  func.func @transform_7(%arg0: i32) -> (i32, i32) {
    %c0_i32 = arith.constant 0 : i32
    %c0_i32_0 = arith.constant 0 : i32
    %c0_i32_1 = arith.constant 0 : i32
    return %c0_i32, %c0_i32_0 : i32, i32
  }
  func.func @transform_8(%arg0: i32) -> (i32, i32) {
    %c0_i32 = arith.constant 0 : i32
    %c0_i32_0 = arith.constant 0 : i32
    %c0_i32_1 = arith.constant 0 : i32
    return %c0_i32, %c0_i32_0 : i32, i32
  }
  func.func @transform_9(%arg0: i32) -> (i32, i32) {
    %c0_i32 = arith.constant 0 : i32
    %c0_i32_0 = arith.constant 0 : i32
    %c0_i32_1 = arith.constant 0 : i32
    return %c0_i32, %c0_i32_0 : i32, i32
  }
  func.func @transform_10(%arg0: i32) -> (i32, i32) {
    %c0_i32 = arith.constant 0 : i32
    %c0_i32_0 = arith.constant 0 : i32
    %c0_i32_1 = arith.constant 0 : i32
    return %c0_i32, %c0_i32_0 : i32, i32
  }
  func.func @transform_11(%arg0: i32) -> (i32, i32, i32) {
    %c0_i32 = arith.constant 0 : i32
    %c0_i32_0 = arith.constant 0 : i32
    %c0_i32_1 = arith.constant 0 : i32
    return %arg0, %c0_i32, %c0_i32_0 : i32, i32, i32
  }
  func.func @transform_12(%arg0: i32) -> (i32, i32, i32) {
    %c0_i32 = arith.constant 0 : i32
    %c0_i32_0 = arith.constant 0 : i32
    %c0_i32_1 = arith.constant 0 : i32
    return %arg0, %c0_i32, %c0_i32_0 : i32, i32, i32
  }
  func.func @transform_13(%arg0: i32) -> (i32, i32, i32) {
    %c0_i32 = arith.constant 0 : i32
    %c0_i32_0 = arith.constant 0 : i32
    %c0_i32_1 = arith.constant 0 : i32
    return %arg0, %c0_i32, %c0_i32_0 : i32, i32, i32
  }
}

module attributes {stable_mosaic.version = 11 : i64} {
  func.func @_avit_layer_kernel(%arg0: i32, %arg1: memref<1x8x32xbf16, #tpu.memory_space<vmem>>, %arg2: memref<1x8x8xf32, #tpu.memory_space<vmem>>, %arg3: memref<1x8x32xbf16, #tpu.memory_space<vmem>>, %arg4: memref<32x32xbf16, #tpu.memory_space<vmem>>, %arg5: memref<32x32xbf16, #tpu.memory_space<vmem>>, %arg6: memref<32x32xbf16, #tpu.memory_space<vmem>>, %arg7: memref<32x32xbf16, #tpu.memory_space<vmem>>, %arg8: memref<32x128xbf16, #tpu.memory_space<vmem>>, %arg9: memref<128x32xbf16, #tpu.memory_space<vmem>>, %arg10: memref<9x32xf32, #tpu.memory_space<vmem>>, %arg11: memref<1x128xf32, #tpu.memory_space<vmem>>, %arg12: memref<1x8x32xbf16, #tpu.memory_space<vmem>>, %arg13: memref<1x8x32xbf16, #tpu.memory_space<vmem>>, %arg14: memref<1x8x8xf32, #tpu.memory_space<vmem>>, %arg15: memref<8x32xf32, #tpu.memory_space<vmem>>) attributes {dimension_semantics = [#tpu.dimension_semantics<parallel>], iteration_bounds = array<i64: 2>, scalar_prefetch = 0 : i64, scratch_operands = 1 : i64, tpu.core_type = #tpu.core_type<tc>, window_params = [{transform_indices = @transform_0, window_bounds = array<i64: 1, 8, 32>}, {transform_indices = @transform_1, window_bounds = array<i64: 1, 8, 8>}, {transform_indices = @transform_2, window_bounds = array<i64: 1, 8, 32>}, {pipeline_mode = #tpu.pipeline_mode<synchronous>, transform_indices = @transform_3, window_bounds = array<i64: 32, 32>}, {pipeline_mode = #tpu.pipeline_mode<synchronous>, transform_indices = @transform_4, window_bounds = array<i64: 32, 32>}, {pipeline_mode = #tpu.pipeline_mode<synchronous>, transform_indices = @transform_5, window_bounds = array<i64: 32, 32>}, {pipeline_mode = #tpu.pipeline_mode<synchronous>, transform_indices = @transform_6, window_bounds = array<i64: 32, 32>}, {pipeline_mode = #tpu.pipeline_mode<synchronous>, transform_indices = @transform_7, window_bounds = array<i64: 32, 128>}, {pipeline_mode = #tpu.pipeline_mode<synchronous>, transform_indices = @transform_8, window_bounds = array<i64: 128, 32>}, {pipeline_mode = #tpu.pipeline_mode<synchronous>, transform_indices = @transform_9, window_bounds = array<i64: 9, 32>}, {pipeline_mode = #tpu.pipeline_mode<synchronous>, transform_indices = @transform_10, window_bounds = array<i64: 1, 128>}, {transform_indices = @transform_11, window_bounds = array<i64: 1, 8, 32>}, {transform_indices = @transform_12, window_bounds = array<i64: 1, 8, 32>}, {transform_indices = @transform_13, window_bounds = array<i64: 1, 8, 8>}]} {
    %c0 = arith.constant 0 : index
    %c0_0 = arith.constant 0 : index
    %c0_1 = arith.constant 0 : index
    %0 = vector.load %arg2[%c0, %c0_0, %c0_1] : memref<1x8x8xf32, #tpu.memory_space<vmem>>, vector<1x8x8xf32>
    %1 = vector.shape_cast %0 : vector<1x8x8xf32> to vector<8x8xf32>
    %2 = vector.extract_strided_slice %1 {offsets = [0, 0], sizes = [1, 8], strides = [1, 1]} : vector<8x8xf32> to vector<1x8xf32>
    %3 = vector.extract_strided_slice %1 {offsets = [1, 0], sizes = [1, 8], strides = [1, 1]} : vector<8x8xf32> to vector<1x8xf32>
    %4 = vector.extract_strided_slice %1 {offsets = [2, 0], sizes = [1, 8], strides = [1, 1]} : vector<8x8xf32> to vector<1x8xf32>
    %5 = vector.extract_strided_slice %1 {offsets = [3, 0], sizes = [1, 8], strides = [1, 1]} : vector<8x8xf32> to vector<1x8xf32>
    %6 = vector.extract_strided_slice %1 {offsets = [4, 0], sizes = [1, 8], strides = [1, 1]} : vector<8x8xf32> to vector<1x8xf32>
    %7 = tpu.transpose %2, [1, 0] : vector<1x8xf32> -> vector<8x1xf32>
    %c0_2 = arith.constant 0 : index
    %c0_3 = arith.constant 0 : index
    %8 = vector.load %arg10[%c0_2, %c0_3] : memref<9x32xf32, #tpu.memory_space<vmem>>, vector<9x32xf32>
    %9 = vector.extract_strided_slice %8 {offsets = [0, 0], sizes = [1, 32], strides = [1, 1]} : vector<9x32xf32> to vector<1x32xf32>
    %10 = vector.extract_strided_slice %8 {offsets = [1, 0], sizes = [1, 32], strides = [1, 1]} : vector<9x32xf32> to vector<1x32xf32>
    %11 = vector.extract_strided_slice %8 {offsets = [2, 0], sizes = [1, 32], strides = [1, 1]} : vector<9x32xf32> to vector<1x32xf32>
    %12 = vector.extract_strided_slice %8 {offsets = [3, 0], sizes = [1, 32], strides = [1, 1]} : vector<9x32xf32> to vector<1x32xf32>
    %13 = vector.extract_strided_slice %8 {offsets = [4, 0], sizes = [1, 32], strides = [1, 1]} : vector<9x32xf32> to vector<1x32xf32>
    %14 = vector.extract_strided_slice %8 {offsets = [5, 0], sizes = [1, 32], strides = [1, 1]} : vector<9x32xf32> to vector<1x32xf32>
    %15 = vector.extract_strided_slice %8 {offsets = [6, 0], sizes = [1, 32], strides = [1, 1]} : vector<9x32xf32> to vector<1x32xf32>
    %16 = vector.extract_strided_slice %8 {offsets = [7, 0], sizes = [1, 32], strides = [1, 1]} : vector<9x32xf32> to vector<1x32xf32>
    %17 = vector.extract_strided_slice %8 {offsets = [8, 0], sizes = [1, 32], strides = [1, 1]} : vector<9x32xf32> to vector<1x32xf32>
    %c0_4 = arith.constant 0 : index
    %c0_5 = arith.constant 0 : index
    %18 = vector.load %arg11[%c0_4, %c0_5] : memref<1x128xf32, #tpu.memory_space<vmem>>, vector<1x128xf32>
    %c0_6 = arith.constant 0 : index
    %c0_7 = arith.constant 0 : index
    %c0_8 = arith.constant 0 : index
    %19 = vector.load %arg1[%c0_6, %c0_7, %c0_8] : memref<1x8x32xbf16, #tpu.memory_space<vmem>>, vector<1x8x32xbf16>
    %20 = vector.shape_cast %19 : vector<1x8x32xbf16> to vector<8x32xbf16>
    %21 = arith.extf %20 : vector<8x32xbf16> to vector<8x32xf32>
    %22 = vector.broadcast %7 : vector<8x1xf32> to vector<8x32xf32>
    %23 = arith.mulf %21, %22 : vector<8x32xf32>
    %cst = arith.constant dense<0.000000e+00> : vector<8xf32>
    %24 = vector.multi_reduction <add>, %23, %cst [1] : vector<8x32xf32> to vector<8xf32>
    %25 = vector.shape_cast %24 : vector<8xf32> to vector<8x1xf32>
    %cst_9 = arith.constant 3.200000e+01 : f32
    %26 = vector.broadcast %cst_9 : f32 to vector<8x1xf32>
    %27 = arith.divf %25, %26 : vector<8x1xf32>
    %28 = vector.broadcast %27 : vector<8x1xf32> to vector<8x32xf32>
    %29 = arith.subf %23, %28 : vector<8x32xf32>
    %30 = arith.mulf %29, %29 : vector<8x32xf32>
    %cst_10 = arith.constant dense<0.000000e+00> : vector<8xf32>
    %31 = vector.multi_reduction <add>, %30, %cst_10 [1] : vector<8x32xf32> to vector<8xf32>
    %32 = vector.shape_cast %31 : vector<8xf32> to vector<8x1xf32>
    %cst_11 = arith.constant 3.200000e+01 : f32
    %33 = vector.broadcast %cst_11 : f32 to vector<8x1xf32>
    %34 = arith.divf %32, %33 : vector<8x1xf32>
    %cst_12 = arith.constant 9.99999997E-7 : f32
    %35 = vector.broadcast %cst_12 : f32 to vector<8x1xf32>
    %36 = arith.addf %34, %35 : vector<8x1xf32>
    %37 = math.rsqrt %36 : vector<8x1xf32>
    %38 = vector.broadcast %37 : vector<8x1xf32> to vector<8x32xf32>
    %39 = arith.mulf %29, %38 : vector<8x32xf32>
    %40 = vector.broadcast %13 : vector<1x32xf32> to vector<8x32xf32>
    %41 = arith.mulf %39, %40 : vector<8x32xf32>
    %42 = vector.broadcast %14 : vector<1x32xf32> to vector<8x32xf32>
    %43 = arith.addf %41, %42 : vector<8x32xf32>
    %44 = vector.broadcast %7 : vector<8x1xf32> to vector<8x32xf32>
    %45 = arith.mulf %43, %44 : vector<8x32xf32>
    %c0_13 = arith.constant 0 : index
    %c0_14 = arith.constant 0 : index
    %46 = vector.load %arg4[%c0_13, %c0_14] : memref<32x32xbf16, #tpu.memory_space<vmem>>, vector<32x32xbf16>
    %47 = arith.truncf %45 : vector<8x32xf32> to vector<8x32xbf16>
    %cst_15 = arith.constant dense<0.000000e+00> : vector<8x32xf32>
    %48 = tpu.matmul %47, %46, %cst_15 {dimension_numbers = #tpu.dot_dimension_numbers<[1], [0], [0], [1], [0, 0, 1, 1], [], []>} : vector<8x32xbf16>, vector<32x32xbf16>, vector<8x32xf32> -> vector<8x32xf32>
    %49 = vector.broadcast %9 : vector<1x32xf32> to vector<8x32xf32>
    %50 = arith.addf %48, %49 : vector<8x32xf32>
    %c0_16 = arith.constant 0 : index
    %c0_17 = arith.constant 0 : index
    %51 = vector.load %arg5[%c0_16, %c0_17] : memref<32x32xbf16, #tpu.memory_space<vmem>>, vector<32x32xbf16>
    %52 = arith.truncf %45 : vector<8x32xf32> to vector<8x32xbf16>
    %cst_18 = arith.constant dense<0.000000e+00> : vector<8x32xf32>
    %53 = tpu.matmul %52, %51, %cst_18 {dimension_numbers = #tpu.dot_dimension_numbers<[1], [0], [0], [1], [0, 0, 1, 1], [], []>} : vector<8x32xbf16>, vector<32x32xbf16>, vector<8x32xf32> -> vector<8x32xf32>
    %54 = vector.broadcast %10 : vector<1x32xf32> to vector<8x32xf32>
    %55 = arith.addf %53, %54 : vector<8x32xf32>
    %c0_19 = arith.constant 0 : index
    %c0_20 = arith.constant 0 : index
    %56 = vector.load %arg6[%c0_19, %c0_20] : memref<32x32xbf16, #tpu.memory_space<vmem>>, vector<32x32xbf16>
    %57 = arith.truncf %45 : vector<8x32xf32> to vector<8x32xbf16>
    %cst_21 = arith.constant dense<0.000000e+00> : vector<8x32xf32>
    %58 = tpu.matmul %57, %56, %cst_21 {dimension_numbers = #tpu.dot_dimension_numbers<[1], [0], [0], [1], [0, 0, 1, 1], [], []>} : vector<8x32xbf16>, vector<32x32xbf16>, vector<8x32xf32> -> vector<8x32xf32>
    %59 = vector.broadcast %11 : vector<1x32xf32> to vector<8x32xf32>
    %60 = arith.addf %58, %59 : vector<8x32xf32>
    %cst_22 = arith.constant 1.000000e+00 : f32
    %61 = vector.broadcast %cst_22 : f32 to vector<1x8xf32>
    %62 = arith.subf %61, %2 : vector<1x8xf32>
    %cst_23 = arith.constant -1.000000e+08 : f32
    %63 = vector.broadcast %cst_23 : f32 to vector<1x8xf32>
    %64 = arith.mulf %62, %63 : vector<1x8xf32>
    %65 = vector.extract_strided_slice %50 {offsets = [0, 0], sizes = [8, 8], strides = [1, 1]} : vector<8x32xf32> to vector<8x8xf32>
    %66 = arith.truncf %65 : vector<8x8xf32> to vector<8x8xbf16>
    %67 = vector.extract_strided_slice %55 {offsets = [0, 0], sizes = [8, 8], strides = [1, 1]} : vector<8x32xf32> to vector<8x8xf32>
    %68 = arith.truncf %67 : vector<8x8xf32> to vector<8x8xbf16>
    %69 = vector.extract_strided_slice %60 {offsets = [0, 0], sizes = [8, 8], strides = [1, 1]} : vector<8x32xf32> to vector<8x8xf32>
    %70 = arith.truncf %69 : vector<8x8xf32> to vector<8x8xbf16>
    %cst_24 = arith.constant dense<0.000000e+00> : vector<8x8xf32>
    %71 = tpu.matmul %66, %68, %cst_24 {dimension_numbers = #tpu.dot_dimension_numbers<[1], [1], [0], [0], [0, 0, 1, 0], [], []>} : vector<8x8xbf16>, vector<8x8xbf16>, vector<8x8xf32> -> vector<8x8xf32>
    %cst_25 = arith.constant 0.353553385 : f32
    %72 = vector.broadcast %cst_25 : f32 to vector<8x8xf32>
    %73 = arith.mulf %71, %72 : vector<8x8xf32>
    %74 = vector.broadcast %64 : vector<1x8xf32> to vector<8x8xf32>
    %75 = arith.addf %73, %74 : vector<8x8xf32>
    %cst_26 = arith.constant dense<0xFF800000> : vector<8xf32>
    %76 = vector.multi_reduction <maximumf>, %75, %cst_26 [1] : vector<8x8xf32> to vector<8xf32>
    %77 = vector.shape_cast %76 : vector<8xf32> to vector<8x1xf32>
    %78 = vector.broadcast %77 : vector<8x1xf32> to vector<8x8xf32>
    %79 = arith.subf %75, %78 : vector<8x8xf32>
    %80 = math.exp %79 : vector<8x8xf32>
    %cst_27 = arith.constant dense<0.000000e+00> : vector<8xf32>
    %81 = vector.multi_reduction <add>, %80, %cst_27 [1] : vector<8x8xf32> to vector<8xf32>
    %82 = vector.shape_cast %81 : vector<8xf32> to vector<8x1xf32>
    %83 = tpu.reciprocal %82 {approx = true} : vector<8x1xf32> -> vector<8x1xf32>
    %84 = vector.broadcast %83 : vector<8x1xf32> to vector<8x8xf32>
    %85 = arith.mulf %80, %84 : vector<8x8xf32>
    %86 = arith.truncf %85 : vector<8x8xf32> to vector<8x8xbf16>
    %cst_28 = arith.constant dense<0.000000e+00> : vector<8x8xf32>
    %87 = tpu.matmul %86, %70, %cst_28 {dimension_numbers = #tpu.dot_dimension_numbers<[1], [0], [0], [1], [0, 0, 1, 1], [], []>} : vector<8x8xbf16>, vector<8x8xbf16>, vector<8x8xf32> -> vector<8x8xf32>
    %c0_29 = arith.constant 0 : index
    %c0_30 = arith.constant 0 : index
    %88 = vector.load %arg15[%c0_29, %c0_30] : memref<8x32xf32, #tpu.memory_space<vmem>>, vector<8x8xf32>
    tpu.vector_store %arg15[%c0_29, %c0_30], %87 {strides = array<i32>} : memref<8x32xf32, #tpu.memory_space<vmem>>, vector<8x8xf32>,
    %89 = vector.extract_strided_slice %50 {offsets = [0, 8], sizes = [8, 8], strides = [1, 1]} : vector<8x32xf32> to vector<8x8xf32>
    %90 = arith.truncf %89 : vector<8x8xf32> to vector<8x8xbf16>
    %91 = vector.extract_strided_slice %55 {offsets = [0, 8], sizes = [8, 8], strides = [1, 1]} : vector<8x32xf32> to vector<8x8xf32>
    %92 = arith.truncf %91 : vector<8x8xf32> to vector<8x8xbf16>
    %93 = vector.extract_strided_slice %60 {offsets = [0, 8], sizes = [8, 8], strides = [1, 1]} : vector<8x32xf32> to vector<8x8xf32>
    %94 = arith.truncf %93 : vector<8x8xf32> to vector<8x8xbf16>
    %cst_31 = arith.constant dense<0.000000e+00> : vector<8x8xf32>
    %95 = tpu.matmul %90, %92, %cst_31 {dimension_numbers = #tpu.dot_dimension_numbers<[1], [1], [0], [0], [0, 0, 1, 0], [], []>} : vector<8x8xbf16>, vector<8x8xbf16>, vector<8x8xf32> -> vector<8x8xf32>
    %cst_32 = arith.constant 0.353553385 : f32
    %96 = vector.broadcast %cst_32 : f32 to vector<8x8xf32>
    %97 = arith.mulf %95, %96 : vector<8x8xf32>
    %98 = vector.broadcast %64 : vector<1x8xf32> to vector<8x8xf32>
    %99 = arith.addf %97, %98 : vector<8x8xf32>
    %cst_33 = arith.constant dense<0xFF800000> : vector<8xf32>
    %100 = vector.multi_reduction <maximumf>, %99, %cst_33 [1] : vector<8x8xf32> to vector<8xf32>
    %101 = vector.shape_cast %100 : vector<8xf32> to vector<8x1xf32>
    %102 = vector.broadcast %101 : vector<8x1xf32> to vector<8x8xf32>
    %103 = arith.subf %99, %102 : vector<8x8xf32>
    %104 = math.exp %103 : vector<8x8xf32>
    %cst_34 = arith.constant dense<0.000000e+00> : vector<8xf32>
    %105 = vector.multi_reduction <add>, %104, %cst_34 [1] : vector<8x8xf32> to vector<8xf32>
    %106 = vector.shape_cast %105 : vector<8xf32> to vector<8x1xf32>
    %107 = tpu.reciprocal %106 {approx = true} : vector<8x1xf32> -> vector<8x1xf32>
    %108 = vector.broadcast %107 : vector<8x1xf32> to vector<8x8xf32>
    %109 = arith.mulf %104, %108 : vector<8x8xf32>
    %110 = arith.truncf %109 : vector<8x8xf32> to vector<8x8xbf16>
    %cst_35 = arith.constant dense<0.000000e+00> : vector<8x8xf32>
    %111 = tpu.matmul %110, %94, %cst_35 {dimension_numbers = #tpu.dot_dimension_numbers<[1], [0], [0], [1], [0, 0, 1, 1], [], []>} : vector<8x8xbf16>, vector<8x8xbf16>, vector<8x8xf32> -> vector<8x8xf32>
    %c0_36 = arith.constant 0 : index
    %c8 = arith.constant 8 : index
    %112 = vector.load %arg15[%c0_36, %c8] : memref<8x32xf32, #tpu.memory_space<vmem>>, vector<8x8xf32>
    tpu.vector_store %arg15[%c0_36, %c8], %111 {strides = array<i32>} : memref<8x32xf32, #tpu.memory_space<vmem>>, vector<8x8xf32>,
    %113 = vector.extract_strided_slice %50 {offsets = [0, 16], sizes = [8, 8], strides = [1, 1]} : vector<8x32xf32> to vector<8x8xf32>
    %114 = arith.truncf %113 : vector<8x8xf32> to vector<8x8xbf16>
    %115 = vector.extract_strided_slice %55 {offsets = [0, 16], sizes = [8, 8], strides = [1, 1]} : vector<8x32xf32> to vector<8x8xf32>
    %116 = arith.truncf %115 : vector<8x8xf32> to vector<8x8xbf16>
    %117 = vector.extract_strided_slice %60 {offsets = [0, 16], sizes = [8, 8], strides = [1, 1]} : vector<8x32xf32> to vector<8x8xf32>
    %118 = arith.truncf %117 : vector<8x8xf32> to vector<8x8xbf16>
    %cst_37 = arith.constant dense<0.000000e+00> : vector<8x8xf32>
    %119 = tpu.matmul %114, %116, %cst_37 {dimension_numbers = #tpu.dot_dimension_numbers<[1], [1], [0], [0], [0, 0, 1, 0], [], []>} : vector<8x8xbf16>, vector<8x8xbf16>, vector<8x8xf32> -> vector<8x8xf32>
    %cst_38 = arith.constant 0.353553385 : f32
    %120 = vector.broadcast %cst_38 : f32 to vector<8x8xf32>
    %121 = arith.mulf %119, %120 : vector<8x8xf32>
    %122 = vector.broadcast %64 : vector<1x8xf32> to vector<8x8xf32>
    %123 = arith.addf %121, %122 : vector<8x8xf32>
    %cst_39 = arith.constant dense<0xFF800000> : vector<8xf32>
    %124 = vector.multi_reduction <maximumf>, %123, %cst_39 [1] : vector<8x8xf32> to vector<8xf32>
    %125 = vector.shape_cast %124 : vector<8xf32> to vector<8x1xf32>
    %126 = vector.broadcast %125 : vector<8x1xf32> to vector<8x8xf32>
    %127 = arith.subf %123, %126 : vector<8x8xf32>
    %128 = math.exp %127 : vector<8x8xf32>
    %cst_40 = arith.constant dense<0.000000e+00> : vector<8xf32>
    %129 = vector.multi_reduction <add>, %128, %cst_40 [1] : vector<8x8xf32> to vector<8xf32>
    %130 = vector.shape_cast %129 : vector<8xf32> to vector<8x1xf32>
    %131 = tpu.reciprocal %130 {approx = true} : vector<8x1xf32> -> vector<8x1xf32>
    %132 = vector.broadcast %131 : vector<8x1xf32> to vector<8x8xf32>
    %133 = arith.mulf %128, %132 : vector<8x8xf32>
    %134 = arith.truncf %133 : vector<8x8xf32> to vector<8x8xbf16>
    %cst_41 = arith.constant dense<0.000000e+00> : vector<8x8xf32>
    %135 = tpu.matmul %134, %118, %cst_41 {dimension_numbers = #tpu.dot_dimension_numbers<[1], [0], [0], [1], [0, 0, 1, 1], [], []>} : vector<8x8xbf16>, vector<8x8xbf16>, vector<8x8xf32> -> vector<8x8xf32>
    %c0_42 = arith.constant 0 : index
    %c16 = arith.constant 16 : index
    %136 = vector.load %arg15[%c0_42, %c16] : memref<8x32xf32, #tpu.memory_space<vmem>>, vector<8x8xf32>
    tpu.vector_store %arg15[%c0_42, %c16], %135 {strides = array<i32>} : memref<8x32xf32, #tpu.memory_space<vmem>>, vector<8x8xf32>,
    %137 = vector.extract_strided_slice %50 {offsets = [0, 24], sizes = [8, 8], strides = [1, 1]} : vector<8x32xf32> to vector<8x8xf32>
    %138 = arith.truncf %137 : vector<8x8xf32> to vector<8x8xbf16>
    %139 = vector.extract_strided_slice %55 {offsets = [0, 24], sizes = [8, 8], strides = [1, 1]} : vector<8x32xf32> to vector<8x8xf32>
    %140 = arith.truncf %139 : vector<8x8xf32> to vector<8x8xbf16>
    %141 = vector.extract_strided_slice %60 {offsets = [0, 24], sizes = [8, 8], strides = [1, 1]} : vector<8x32xf32> to vector<8x8xf32>
    %142 = arith.truncf %141 : vector<8x8xf32> to vector<8x8xbf16>
    %cst_43 = arith.constant dense<0.000000e+00> : vector<8x8xf32>
    %143 = tpu.matmul %138, %140, %cst_43 {dimension_numbers = #tpu.dot_dimension_numbers<[1], [1], [0], [0], [0, 0, 1, 0], [], []>} : vector<8x8xbf16>, vector<8x8xbf16>, vector<8x8xf32> -> vector<8x8xf32>
    %cst_44 = arith.constant 0.353553385 : f32
    %144 = vector.broadcast %cst_44 : f32 to vector<8x8xf32>
    %145 = arith.mulf %143, %144 : vector<8x8xf32>
    %146 = vector.broadcast %64 : vector<1x8xf32> to vector<8x8xf32>
    %147 = arith.addf %145, %146 : vector<8x8xf32>
    %cst_45 = arith.constant dense<0xFF800000> : vector<8xf32>
    %148 = vector.multi_reduction <maximumf>, %147, %cst_45 [1] : vector<8x8xf32> to vector<8xf32>
    %149 = vector.shape_cast %148 : vector<8xf32> to vector<8x1xf32>
    %150 = vector.broadcast %149 : vector<8x1xf32> to vector<8x8xf32>
    %151 = arith.subf %147, %150 : vector<8x8xf32>
    %152 = math.exp %151 : vector<8x8xf32>
    %cst_46 = arith.constant dense<0.000000e+00> : vector<8xf32>
    %153 = vector.multi_reduction <add>, %152, %cst_46 [1] : vector<8x8xf32> to vector<8xf32>
    %154 = vector.shape_cast %153 : vector<8xf32> to vector<8x1xf32>
    %155 = tpu.reciprocal %154 {approx = true} : vector<8x1xf32> -> vector<8x1xf32>
    %156 = vector.broadcast %155 : vector<8x1xf32> to vector<8x8xf32>
    %157 = arith.mulf %152, %156 : vector<8x8xf32>
    %158 = arith.truncf %157 : vector<8x8xf32> to vector<8x8xbf16>
    %cst_47 = arith.constant dense<0.000000e+00> : vector<8x8xf32>
    %159 = tpu.matmul %158, %142, %cst_47 {dimension_numbers = #tpu.dot_dimension_numbers<[1], [0], [0], [1], [0, 0, 1, 1], [], []>} : vector<8x8xbf16>, vector<8x8xbf16>, vector<8x8xf32> -> vector<8x8xf32>
    %c0_48 = arith.constant 0 : index
    %c24 = arith.constant 24 : index
    %160 = vector.load %arg15[%c0_48, %c24] : memref<8x32xf32, #tpu.memory_space<vmem>>, vector<8x8xf32>
    tpu.vector_store %arg15[%c0_48, %c24], %159 {strides = array<i32>} : memref<8x32xf32, #tpu.memory_space<vmem>>, vector<8x8xf32>,
    %c0_49 = arith.constant 0 : index
    %c0_50 = arith.constant 0 : index
    %161 = vector.load %arg15[%c0_49, %c0_50] : memref<8x32xf32, #tpu.memory_space<vmem>>, vector<8x32xf32>
    %c0_51 = arith.constant 0 : index
    %c0_52 = arith.constant 0 : index
    %162 = vector.load %arg7[%c0_51, %c0_52] : memref<32x32xbf16, #tpu.memory_space<vmem>>, vector<32x32xbf16>
    %163 = arith.truncf %161 : vector<8x32xf32> to vector<8x32xbf16>
    %cst_53 = arith.constant dense<0.000000e+00> : vector<8x32xf32>
    %164 = tpu.matmul %163, %162, %cst_53 {dimension_numbers = #tpu.dot_dimension_numbers<[1], [0], [0], [1], [0, 0, 1, 1], [], []>} : vector<8x32xbf16>, vector<32x32xbf16>, vector<8x32xf32> -> vector<8x32xf32>
    %165 = vector.broadcast %12 : vector<1x32xf32> to vector<8x32xf32>
    %166 = arith.addf %164, %165 : vector<8x32xf32>
    %167 = arith.addf %23, %166 : vector<8x32xf32>
    %168 = vector.broadcast %7 : vector<8x1xf32> to vector<8x32xf32>
    %169 = arith.mulf %167, %168 : vector<8x32xf32>
    %cst_54 = arith.constant dense<0.000000e+00> : vector<8xf32>
    %170 = vector.multi_reduction <add>, %169, %cst_54 [1] : vector<8x32xf32> to vector<8xf32>
    %171 = vector.shape_cast %170 : vector<8xf32> to vector<8x1xf32>
    %cst_55 = arith.constant 3.200000e+01 : f32
    %172 = vector.broadcast %cst_55 : f32 to vector<8x1xf32>
    %173 = arith.divf %171, %172 : vector<8x1xf32>
    %174 = vector.broadcast %173 : vector<8x1xf32> to vector<8x32xf32>
    %175 = arith.subf %169, %174 : vector<8x32xf32>
    %176 = arith.mulf %175, %175 : vector<8x32xf32>
    %cst_56 = arith.constant dense<0.000000e+00> : vector<8xf32>
    %177 = vector.multi_reduction <add>, %176, %cst_56 [1] : vector<8x32xf32> to vector<8xf32>
    %178 = vector.shape_cast %177 : vector<8xf32> to vector<8x1xf32>
    %cst_57 = arith.constant 3.200000e+01 : f32
    %179 = vector.broadcast %cst_57 : f32 to vector<8x1xf32>
    %180 = arith.divf %178, %179 : vector<8x1xf32>
    %cst_58 = arith.constant 9.99999997E-7 : f32
    %181 = vector.broadcast %cst_58 : f32 to vector<8x1xf32>
    %182 = arith.addf %180, %181 : vector<8x1xf32>
    %183 = math.rsqrt %182 : vector<8x1xf32>
    %184 = vector.broadcast %183 : vector<8x1xf32> to vector<8x32xf32>
    %185 = arith.mulf %175, %184 : vector<8x32xf32>
    %186 = vector.broadcast %15 : vector<1x32xf32> to vector<8x32xf32>
    %187 = arith.mulf %185, %186 : vector<8x32xf32>
    %188 = vector.broadcast %16 : vector<1x32xf32> to vector<8x32xf32>
    %189 = arith.addf %187, %188 : vector<8x32xf32>
    %190 = vector.broadcast %7 : vector<8x1xf32> to vector<8x32xf32>
    %191 = arith.mulf %189, %190 : vector<8x32xf32>
    %c0_59 = arith.constant 0 : index
    %c0_60 = arith.constant 0 : index
    %192 = vector.load %arg8[%c0_59, %c0_60] : memref<32x128xbf16, #tpu.memory_space<vmem>>, vector<32x128xbf16>
    %193 = arith.truncf %191 : vector<8x32xf32> to vector<8x32xbf16>
    %cst_61 = arith.constant dense<0.000000e+00> : vector<8x128xf32>
    %194 = tpu.matmul %193, %192, %cst_61 {dimension_numbers = #tpu.dot_dimension_numbers<[1], [0], [0], [1], [0, 0, 1, 1], [], []>} : vector<8x32xbf16>, vector<32x128xbf16>, vector<8x128xf32> -> vector<8x128xf32>
    %195 = vector.broadcast %18 : vector<1x128xf32> to vector<8x128xf32>
    %196 = arith.addf %194, %195 : vector<8x128xf32>
    %cst_62 = arith.constant 5.000000e-01 : f32
    %197 = vector.broadcast %cst_62 : f32 to vector<8x128xf32>
    %198 = arith.mulf %197, %196 : vector<8x128xf32>
    %cst_63 = arith.constant 0.707106769 : f32
    %199 = vector.broadcast %cst_63 : f32 to vector<8x128xf32>
    %200 = arith.mulf %196, %199 : vector<8x128xf32>
    %cst_64 = arith.constant 0.000000e+00 : f32
    %201 = vector.broadcast %cst_64 : f32 to vector<8x128xf32>
    %202 = arith.cmpf oge, %200, %201 : vector<8x128xf32>
    %cst_65 = arith.constant 1.000000e+00 : f32
    %cst_66 = arith.constant -1.000000e+00 : f32
    %203 = vector.broadcast %cst_65 : f32 to vector<8x128xf32>
    %204 = vector.broadcast %cst_66 : f32 to vector<8x128xf32>
    %205 = arith.select %202, %203, %204 : vector<8x128xi1>, vector<8x128xf32>
    %206 = math.absf %200 : vector<8x128xf32>
    %cst_67 = arith.constant 0.327591091 : f32
    %207 = vector.broadcast %cst_67 : f32 to vector<8x128xf32>
    %208 = arith.mulf %207, %206 : vector<8x128xf32>
    %cst_68 = arith.constant 1.000000e+00 : f32
    %209 = vector.broadcast %cst_68 : f32 to vector<8x128xf32>
    %210 = arith.addf %209, %208 : vector<8x128xf32>
    %cst_69 = arith.constant 1.000000e+00 : f32
    %211 = vector.broadcast %cst_69 : f32 to vector<8x128xf32>
    %212 = arith.divf %211, %210 : vector<8x128xf32>
    %cst_70 = arith.constant 1.06140542 : f32
    %213 = vector.broadcast %cst_70 : f32 to vector<8x128xf32>
    %214 = arith.mulf %213, %212 : vector<8x128xf32>
    %cst_71 = arith.constant -1.45315206 : f32
    %215 = vector.broadcast %cst_71 : f32 to vector<8x128xf32>
    %216 = arith.addf %214, %215 : vector<8x128xf32>
    %217 = arith.mulf %216, %212 : vector<8x128xf32>
    %cst_72 = arith.constant 1.42141378 : f32
    %218 = vector.broadcast %cst_72 : f32 to vector<8x128xf32>
    %219 = arith.addf %217, %218 : vector<8x128xf32>
    %220 = arith.mulf %219, %212 : vector<8x128xf32>
    %cst_73 = arith.constant -0.284496725 : f32
    %221 = vector.broadcast %cst_73 : f32 to vector<8x128xf32>
    %222 = arith.addf %220, %221 : vector<8x128xf32>
    %223 = arith.mulf %222, %212 : vector<8x128xf32>
    %cst_74 = arith.constant 0.254829586 : f32
    %224 = vector.broadcast %cst_74 : f32 to vector<8x128xf32>
    %225 = arith.addf %223, %224 : vector<8x128xf32>
    %226 = arith.mulf %225, %212 : vector<8x128xf32>
    %cst_75 = arith.constant 0.000000e+00 : f32
    %227 = vector.broadcast %cst_75 : f32 to vector<8x128xf32>
    %228 = arith.subf %227, %206 : vector<8x128xf32>
    %229 = arith.mulf %228, %206 : vector<8x128xf32>
    %230 = math.exp %229 : vector<8x128xf32>
    %231 = arith.mulf %226, %230 : vector<8x128xf32>
    %cst_76 = arith.constant 1.000000e+00 : f32
    %232 = vector.broadcast %cst_76 : f32 to vector<8x128xf32>
    %233 = arith.subf %232, %231 : vector<8x128xf32>
    %234 = arith.mulf %205, %233 : vector<8x128xf32>
    %cst_77 = arith.constant 1.000000e+00 : f32
    %235 = vector.broadcast %cst_77 : f32 to vector<8x128xf32>
    %236 = arith.addf %235, %234 : vector<8x128xf32>
    %237 = arith.mulf %198, %236 : vector<8x128xf32>
    %c0_78 = arith.constant 0 : index
    %c0_79 = arith.constant 0 : index
    %238 = vector.load %arg9[%c0_78, %c0_79] : memref<128x32xbf16, #tpu.memory_space<vmem>>, vector<128x32xbf16>
    %239 = arith.truncf %237 : vector<8x128xf32> to vector<8x128xbf16>
    %cst_80 = arith.constant dense<0.000000e+00> : vector<8x32xf32>
    %240 = tpu.matmul %239, %238, %cst_80 {dimension_numbers = #tpu.dot_dimension_numbers<[1], [0], [0], [1], [0, 0, 1, 1], [], []>} : vector<8x128xbf16>, vector<128x32xbf16>, vector<8x32xf32> -> vector<8x32xf32>
    %241 = vector.broadcast %17 : vector<1x32xf32> to vector<8x32xf32>
    %242 = arith.addf %240, %241 : vector<8x32xf32>
    %243 = arith.addf %167, %242 : vector<8x32xf32>
    %244 = arith.truncf %243 : vector<8x32xf32> to vector<8x32xbf16>
    %c0_81 = arith.constant 0 : index
    %c0_82 = arith.constant 0 : index
    %c0_83 = arith.constant 0 : index
    %245 = vector.load %arg12[%c0_81, %c0_82, %c0_83] : memref<1x8x32xbf16, #tpu.memory_space<vmem>>, vector<1x8x32xbf16>
    %246 = vector.shape_cast %245 : vector<1x8x32xbf16> to vector<8x32xbf16>
    %247 = vector.shape_cast %244 : vector<8x32xbf16> to vector<1x8x32xbf16>
    tpu.vector_store %arg12[%c0_81, %c0_82, %c0_83], %247 {strides = array<i32>} : memref<1x8x32xbf16, #tpu.memory_space<vmem>>, vector<1x8x32xbf16>,
    %cst_84 = arith.constant 1.000000e+00 : f32
    %248 = vector.broadcast %cst_84 : f32 to vector<1x8xf32>
    %249 = arith.addf %3, %248 : vector<1x8xf32>
    %250 = arith.addf %5, %2 : vector<1x8xf32>
    %cst_85 = arith.constant 9.900000e-01 : f32
    %251 = vector.broadcast %cst_85 : f32 to vector<1x8xf32>
    %252 = arith.cmpf oge, %249, %251 : vector<1x8xf32>
    %253 = arith.extui %252 : vector<1x8xi1> to vector<1x8xi32>
    %254 = arith.sitofp %253 : vector<1x8xi32> to vector<1x8xf32>
    %cst_86 = arith.constant 1.000000e+00 : f32
    %255 = vector.broadcast %cst_86 : f32 to vector<1x8xf32>
    %256 = arith.subf %255, %254 : vector<1x8xf32>
    %257 = arith.mulf %4, %254 : vector<1x8xf32>
    %258 = arith.mulf %257, %2 : vector<1x8xf32>
    %259 = arith.addf %250, %258 : vector<1x8xf32>
    %260 = arith.mulf %4, %254 : vector<1x8xf32>
    %261 = arith.mulf %248, %256 : vector<1x8xf32>
    %262 = arith.addf %260, %261 : vector<1x8xf32>
    %263 = arith.mulf %248, %256 : vector<1x8xf32>
    %264 = arith.subf %4, %263 : vector<1x8xf32>
    %265 = arith.addf %6, %256 : vector<1x8xf32>
    %c0_87 = arith.constant 0 : index
    %c0_88 = arith.constant 0 : index
    %c0_89 = arith.constant 0 : index
    %266 = vector.load %arg3[%c0_87, %c0_88, %c0_89] : memref<1x8x32xbf16, #tpu.memory_space<vmem>>, vector<1x8x32xbf16>
    %267 = vector.shape_cast %266 : vector<1x8x32xbf16> to vector<8x32xbf16>
    %268 = arith.extf %267 : vector<8x32xbf16> to vector<8x32xf32>
    %269 = tpu.transpose %262, [1, 0] : vector<1x8xf32> -> vector<8x1xf32>
    %270 = vector.broadcast %269 : vector<8x1xf32> to vector<8x32xf32>
    %271 = arith.mulf %243, %270 : vector<8x32xf32>
    %272 = arith.addf %268, %271 : vector<8x32xf32>
    %273 = arith.truncf %272 : vector<8x32xf32> to vector<8x32xbf16>
    %c0_90 = arith.constant 0 : index
    %c0_91 = arith.constant 0 : index
    %c0_92 = arith.constant 0 : index
    %274 = vector.load %arg13[%c0_90, %c0_91, %c0_92] : memref<1x8x32xbf16, #tpu.memory_space<vmem>>, vector<1x8x32xbf16>
    %275 = vector.shape_cast %274 : vector<1x8x32xbf16> to vector<8x32xbf16>
    %276 = vector.shape_cast %273 : vector<8x32xbf16> to vector<1x8x32xbf16>
    tpu.vector_store %arg13[%c0_90, %c0_91, %c0_92], %276 {strides = array<i32>} : memref<1x8x32xbf16, #tpu.memory_space<vmem>>, vector<1x8x32xbf16>,
    %cst_93 = arith.constant 0.000000e+00 : f32
    %277 = vector.broadcast %cst_93 : f32 to vector<1x8xf32>
    %278 = tpu.concatenate %256, %249, %264, %259, %265, %248, %277, %277 in 0 : vector<1x8xf32>, vector<1x8xf32>, vector<1x8xf32>, vector<1x8xf32>, vector<1x8xf32>, vector<1x8xf32>, vector<1x8xf32>, vector<1x8xf32> -> vector<8x8xf32>
    %c0_94 = arith.constant 0 : index
    %c0_95 = arith.constant 0 : index
    %c0_96 = arith.constant 0 : index
    %279 = vector.load %arg14[%c0_94, %c0_95, %c0_96] : memref<1x8x8xf32, #tpu.memory_space<vmem>>, vector<1x8x8xf32>
    %280 = vector.shape_cast %279 : vector<1x8x8xf32> to vector<8x8xf32>
    %281 = vector.shape_cast %278 : vector<8x8xf32> to vector<1x8x8xf32>
    tpu.vector_store %arg14[%c0_94, %c0_95, %c0_96], %281 {strides = array<i32>} : memref<1x8x8xf32, #tpu.memory_space<vmem>>, vector<1x8x8xf32>,
    return
  }
  func.func @transform_0(%arg0: i32) -> (i32, i32, i32) {
    %c0_i32 = arith.constant 0 : i32
    %c0_i32_0 = arith.constant 0 : i32
    %c0_i32_1 = arith.constant 0 : i32
    return %arg0, %c0_i32, %c0_i32_0 : i32, i32, i32
  }
  func.func @transform_1(%arg0: i32) -> (i32, i32, i32) {
    %c0_i32 = arith.constant 0 : i32
    %c0_i32_0 = arith.constant 0 : i32
    %c0_i32_1 = arith.constant 0 : i32
    return %arg0, %c0_i32, %c0_i32_0 : i32, i32, i32
  }
  func.func @transform_2(%arg0: i32) -> (i32, i32, i32) {
    %c0_i32 = arith.constant 0 : i32
    %c0_i32_0 = arith.constant 0 : i32
    %c0_i32_1 = arith.constant 0 : i32
    return %arg0, %c0_i32, %c0_i32_0 : i32, i32, i32
  }
  func.func @transform_3(%arg0: i32) -> (i32, i32) {
    %c0_i32 = arith.constant 0 : i32
    %c0_i32_0 = arith.constant 0 : i32
    %c0_i32_1 = arith.constant 0 : i32
    return %c0_i32, %c0_i32_0 : i32, i32
  }
  func.func @transform_4(%arg0: i32) -> (i32, i32) {
    %c0_i32 = arith.constant 0 : i32
    %c0_i32_0 = arith.constant 0 : i32
    %c0_i32_1 = arith.constant 0 : i32
    return %c0_i32, %c0_i32_0 : i32, i32
  }
  func.func @transform_5(%arg0: i32) -> (i32, i32) {
    %c0_i32 = arith.constant 0 : i32
    %c0_i32_0 = arith.constant 0 : i32
    %c0_i32_1 = arith.constant 0 : i32
    return %c0_i32, %c0_i32_0 : i32, i32
  }
  func.func @transform_6(%arg0: i32) -> (i32, i32) {
    %c0_i32 = arith.constant 0 : i32
    %c0_i32_0 = arith.constant 0 : i32
    %c0_i32_1 = arith.constant 0 : i32
    return %c0_i32, %c0_i32_0 : i32, i32
  }
  func.func @transform_7(%arg0: i32) -> (i32, i32) {
    %c0_i32 = arith.constant 0 : i32
    %c0_i32_0 = arith.constant 0 : i32
    %c0_i32_1 = arith.constant 0 : i32
    return %c0_i32, %c0_i32_0 : i32, i32
  }
  func.func @transform_8(%arg0: i32) -> (i32, i32) {
    %c0_i32 = arith.constant 0 : i32
    %c0_i32_0 = arith.constant 0 : i32
    %c0_i32_1 = arith.constant 0 : i32
    return %c0_i32, %c0_i32_0 : i32, i32
  }
  func.func @transform_9(%arg0: i32) -> (i32, i32) {
    %c0_i32 = arith.constant 0 : i32
    %c0_i32_0 = arith.constant 0 : i32
    %c0_i32_1 = arith.constant 0 : i32
    return %c0_i32, %c0_i32_0 : i32, i32
  }
  func.func @transform_10(%arg0: i32) -> (i32, i32) {
    %c0_i32 = arith.constant 0 : i32
    %c0_i32_0 = arith.constant 0 : i32
    %c0_i32_1 = arith.constant 0 : i32
    return %c0_i32, %c0_i32_0 : i32, i32
  }
  func.func @transform_11(%arg0: i32) -> (i32, i32, i32) {
    %c0_i32 = arith.constant 0 : i32
    %c0_i32_0 = arith.constant 0 : i32
    %c0_i32_1 = arith.constant 0 : i32
    return %arg0, %c0_i32, %c0_i32_0 : i32, i32, i32
  }
  func.func @transform_12(%arg0: i32) -> (i32, i32, i32) {
    %c0_i32 = arith.constant 0 : i32
    %c0_i32_0 = arith.constant 0 : i32
    %c0_i32_1 = arith.constant 0 : i32
    return %arg0, %c0_i32, %c0_i32_0 : i32, i32, i32
  }
  func.func @transform_13(%arg0: i32) -> (i32, i32, i32) {
    %c0_i32 = arith.constant 0 : i32
    %c0_i32_0 = arith.constant 0 : i32
    %c0_i32_1 = arith.constant 0 : i32
    return %arg0, %c0_i32, %c0_i32_0 : i32, i32, i32
  }
}

</mosaic_0001>

<bundles_post_ra>
// kernel: tpu_custom_call.1
= control target key start
LH: loop header
LB: loop body
LE: loop exit
PB: predicated region body
PF: predicated region fallthrough
CT: control target
= control target key end

     0   :  { %6 = vsyncpa [#allocation3], 0  ;;  %s341_s0 = inlined_call_operand.hbm [shape: f32[8,128], index: 0, kind: input, shape index: {}]   ;;  %s342_s1 = inlined_call_operand.hbm [shape: f32[8,128], index: 1, kind: output, shape index: {}]  }
   0x1   :  { %7 = vsyncpa [#allocation4], 0  ;;  %s262_s6 = smov 0  }
   0x2 LB: > { %s145_s7 = sadd.s32 4294967295, %s248_s6   ;;  %p146_p0 = scmp.ge.s32.totalorder %s248_s6, 1  ;;  %s248_s6 = sphi %s262_s6, %s13_s6  }
   0x3   : > { %p60_p1 = scmp.lt.s32.totalorder %s248_s6, 3  ;;  %p276_p3 = scmp.eq.s32.totalorder %s145_s7, 0 }
   0x4   : > { %s250_s10 = smov [#allocation2]   ;;  %s180_s15 = scalar_lea.hbm %s341_s0, 128 }
   0x5   : > { %p270_p2 = pnand %p146_p0, %p60_p1  ;;  %s73_s11 = sshll.u32 %s250_s10, 4  ;;  %s74_s11 = int_to_ptr.vmem [resolvable:$true] %s73_s11 }
   0x6   : > { %s347_s9 = scalar_select %p276_p3, 1, 0 }
   0x7   : > { %s346_s8 = scalar_select %p270_p2, 1, 0 }
   0x8   : > { %p162_p4 = pneg %p270_p2  ;;  %p181_p6 = scmp.ne.s32.totalorder %s341_s0, %s180_s15 }
   0x9   : > { %p187_p10 = scmp.lt.u32.totalorder %s180_s15, %s341_s0 }
   0xa   : > { %p284_p5 = pnand %p276_p3, %p162_p4 }
   0xc   : > { %p182_p7 = pneg %p284_p5 }
   0xe   : > { %p183_p8 = pnand %p182_p7, %p181_p6 }
  0x10   : > { %p184_p9 = pneg %p183_p8 }
  0x12   : > { %p189_p11 = pnand %p187_p10, %p184_p9 }
  0x14   : > { %192 = shalt.err (!%p189_p11)
}
  0x15   : > { %s193_s20 = scalar_lea.vmem %s74_s11, 128  ;;  %p201_p1 = scmp.lt.s32.totalorder %s74_s11, %s74_s11 }
  0x16   : > { %p194_p12 = scmp.ne.s32.totalorder %s74_s11, %s193_s20  ;;  %p202_p4 = scmp.lt.s32.totalorder %s193_s20, %s193_s20 }
  0x18   : > { %p196_p13 = pnand %p194_p12, %p182_p7  ;;  %p203_p3 = por %p202_p4, %p201_p1 }
  0x1a   : > { %p197_p0 = pneg %p196_p13 }
  0x1c   : > { %p204_p2 = pnand %p203_p3, %p197_p0 }
  0x1e   : > { %207 = shalt.err (!%p204_p2)
}
  0x1f   : > { %165 = dma.hbm_to_vmem [thread:$0]  (!%p284_p5), %s341_s0, 128, %s74_s11, [#allocation3]  }
  0x20   : > { %p349_p6 = scmp.ne.s32.totalorder %s346_s8, 0 }
  0x21   : > { %p350_p8 = scmp.ne.s32.totalorder (!%p349_p6), %s347_s9, 0 }
  0x22   : > { %86 = sbr.rel (%p349_p6) target bundleno = 67 (0x43), region = 24 }
  0x29   : > { %239 = dma.done.wait (%p350_p8), [#allocation3], 128  }
  0x2a   : > { %241 = vsyncadd (%p350_p8), [#allocation3], 4294967168  ;;  %s251_s23 = smov [#allocation5]   ;;  %v96_v0 = vld [vmem:[#allocation2] sm:$0xff]  ;;  %p312_p2 = scmp.eq.s32.totalorder %s145_s7, 1 }
  0x2b   : > { %s106_s24 = sshll.u32 %s251_s23, 4  ;;  %v97_v1 = vadd.f32 1.0, %v96_v0  ;;  %s107_s24 = int_to_ptr.vmem [resolvable:$true] %s106_s24 }
  0x2c   : > { %s208_s26 = scalar_lea.vmem %s107_s24, 128  ;;  %p215_p9 = scmp.lt.s32.totalorder %s107_s24, %s107_s24 }
  0x2d   : > { %98 = vst [vmem:[#allocation5] sm:$0xff] %v97_v1  ;;  %p209_p3 = scmp.ne.s32.totalorder %s107_s24, %s208_s26  ;;  %p216_p10 = scmp.lt.s32.totalorder %s208_s26, %s208_s26 }
  0x2f   : > { %p210_p5 = pnand %p209_p3, %p312_p2  ;;  %p217_p11 = por %p216_p10, %p215_p9 }
  0x31   : > { %p211_p7 = pneg %p210_p5 }
  0x33   : > { %p218_p12 = pnand %p217_p11, %p211_p7 }
  0x35   : > { %221 = shalt.err (!%p218_p12)
}
  0x36   : > { %s222_s29 = scalar_lea.hbm %s342_s1, 128 }
  0x37   : > { %p223_p13 = scmp.ne.s32.totalorder %s342_s1, %s222_s29  ;;  %p228_p4 = scmp.lt.u32.totalorder %s222_s29, %s342_s1 }
  0x39   : > { %p224_p0 = pnand %p223_p13, %p312_p2 }
  0x3b   : > { %p225_p1 = pneg %p224_p0 }
  0x3d   : > { %p230_p6 = pnand %p228_p4, %p225_p1 }
  0x3f   : > { %233 = shalt.err (!%p230_p6)
}
  0x40   : > { %159 = dma.vmem_to_hbm [thread:$0]  (%p312_p2), %s107_s24, 128, %s342_s1, [#allocation4]  }
  0x41   : > { %243 = dma.done.wait (%p312_p2), [#allocation4], 128  }
  0x42   : > { %245 = vsyncadd (%p312_p2), [#allocation4], 4294967168 }
  0x43 PF: > { %s13_s6 = sadd.s32 1, %s248_s6  }
  0x44   : > { %p10_p8 = scmp.ge.s32.totalorder %s13_s6, 4  }
  0x46   :  { %12 = sbr.rel (!%p10_p8) target bundleno = 2 (0x2), region = 53 }
  0x4d   :  { %119 = vsyncpa [#allocation3], 1 }
  0x4e   :  { %121 = vsyncpa [#allocation3 + $0x1], 1 }
  0x4f   :  { %122 = vsyncpa [#allocation4], 1 }
  0x50   :  { %124 = vsyncpa [#allocation4 + $0x1], 1 }

// kernel: avit_encoder_forward.3
= control target key start
LH: loop header
LB: loop body
LE: loop exit
PB: predicated region body
PF: predicated region fallthrough
CT: control target
= control target key end

     0   :  { %s3817_s0 = inlined_call_operand.hbm [shape: bf16[2,8,32], index: 0, kind: input, shape index: {}, may-alias: {0,11}]   ;;  %s3818_s1 = inlined_call_operand.hbm [shape: f32[2,8,8], index: 1, kind: input, shape index: {}, may-alias: {1,13}]   ;;  %s3819_s2 = inlined_call_operand.hbm [shape: bf16[2,8,32], index: 2, kind: input, shape index: {}, may-alias: {2,12}]   ;;  %s3820_s3 = inlined_call_operand.hbm [shape: bf16[32,32], index: 3, kind: input, shape index: {}]   ;;  %s3821_s4 = inlined_call_operand.hbm [shape: bf16[32,32], index: 4, kind: input, shape index: {}]   ;;  %s3822_s5 = inlined_call_operand.hbm [shape: bf16[32,32], index: 5, kind: input, shape index: {}]   ;;  %s3823_s6 = inlined_call_operand.hbm [shape: bf16[32,32], index: 6, kind: input, shape index: {}]   ;;  %s3824_s7 = inlined_call_operand.hbm [shape: bf16[32,128], index: 7, kind: input, shape index: {}]   ;;  %s3825_s8 = inlined_call_operand.hbm [shape: bf16[128,32], index: 8, kind: input, shape index: {}]   ;;  %s3826_s9 = inlined_call_operand.hbm [shape: f32[9,32], index: 9, kind: input, shape index: {}]   ;;  %s3827_s10 = inlined_call_operand.hbm [shape: f32[1,128], index: 10, kind: input, shape index: {}]   ;;  %s3828_s11 = inlined_call_operand.hbm [shape: bf16[2,8,32], index: 11, kind: output, shape index: {0}, may-alias: {0,11}]   ;;  %s3829_s12 = inlined_call_operand.hbm [shape: bf16[2,8,32], index: 12, kind: output, shape index: {1}, may-alias: {2,12}]   ;;  %s3830_s13 = inlined_call_operand.hbm [shape: f32[2,8,8], index: 13, kind: output, shape index: {2}, may-alias: {1,13}]  }
   0x1   :  { %3856 = sst [smem:[#allocation37_spill]] %s3818_s1 }
   0x2   :  { %3857 = sst [smem:[#allocation38_spill]] %s3819_s2 }
   0x3   :  { %3858 = sst [smem:[#allocation39_spill]] %s3820_s3 }
   0x4   :  { %3859 = sst [smem:[#allocation40_spill]] %s3821_s4 }
   0x5   :  { %3860 = sst [smem:[#allocation41_spill]] %s3822_s5 }
   0x6   :  { %3861 = sst [smem:[#allocation42_spill]] %s3824_s7 }
   0x7   :  { %3862 = sst [smem:[#allocation43_spill]] %s3826_s9 }
   0x8   :  { %3863 = sst [smem:[#allocation44_spill]] %s3828_s11 }
   0x9   :  { %3864 = sst [smem:[#allocation45_spill]] %s3829_s12 }
   0xa   :  { %3865 = sst [smem:[#allocation46_spill]] %s3830_s13 }
   0xb   :  { %19 = vsyncpa [#allocation4], 0 }
   0xc   :  { %21 = vsyncpa [#allocation4 + $0x1], 0 }
   0xd   :  { %22 = vsyncpa [#allocation7], 0 }
   0xe   :  { %24 = vsyncpa [#allocation7 + $0x1], 0 }
   0xf   :  { %25 = vsyncpa [#allocation10], 0 }
  0x10   :  { %26 = vsyncpa [#allocation13], 0 }
  0x11   :  { %27 = vsyncpa [#allocation16], 0 }
  0x12   :  { %28 = vsyncpa [#allocation19], 0 }
  0x13   :  { %29 = vsyncpa [#allocation5], 0 }
  0x14   :  { %31 = vsyncpa [#allocation5 + $0x1], 0 }
  0x15   :  { %32 = vsyncpa [#allocation23], 0 }
  0x16   :  { %34 = vsyncpa [#allocation23 + $0x1], 0  ;;  %s3112_s25 = smov 0   ;;  %s3114_s26 = smov 0  }
  0x17   :  { %s3116_s27 = smov 0   ;;  %s3118_s28 = smov 0  }
  0x18 LB: > { %3866 = sst [smem:[#allocation33_spill]] %s3008_s27  ;;  %s3014_s29 = smov [#allocation9]   ;;  %s3012_s28 = sphi %s3118_s28, %s3911_s28   ;;  %s3008_s27 = sphi %s3116_s27, %s3913_s27   ;;  %s3004_s26 = sphi %s3114_s26, %s3915_s26   ;;  %s3000_s25 = sphi %s3112_s25, %s3914_s25  }
  0x19   : > { %s381_s30 = sshll.u32 %s3014_s29, 4  ;;  %s3133_s14 = sadd.s32 4294967295, %s3012_s28   ;;  %s3138_s30 = int_to_ptr.vmem [resolvable:$true] %s381_s30 }
  0x1a   : > { %p2123_p0 = scmp.ge.s32.totalorder %s3012_s28, 1  ;;  %p3836_p1 = scmp.eq.s32.totalorder %s3133_s14, 0 }
  0x1b   : > { %p369_p2 = scmp.lt.s32.totalorder %s3012_s28, 3  ;;  %s3015_s16 = smov [#allocation12]  }
  0x1c   : > { %s407_s17 = sshll.u32 %s3015_s16, 4  ;;  %s3016_s19 = smov [#allocation15]   ;;  %s3153_s17 = int_to_ptr.vmem [resolvable:$true] %s407_s17 }
  0x1d   : > { %p3140_p3 = pnand %p2123_p0, %p369_p2  ;;  %s433_s20 = sshll.u32 %s3016_s19, 4  ;;  %s3155_s20 = int_to_ptr.vmem [resolvable:$true] %s433_s20 }
  0x1e   : > { %s3870_s3 = sld [smem:[#allocation39_spill]] }
  0x1f   : > { %s3867_s15 = scalar_select %p3140_p3, 1, 0 }
  0x20   : > { %p2388_p5 = pneg %p3140_p3 }
  0x21   : > { %3868 = sst [smem:[#allocation34_spill]] %s3867_s15 }
  0x22   : > { %p3149_p6 = pnand %p2388_p5, %p3836_p1 }
  0x24   : > { %s3869_s18 = scalar_select %p3149_p6, 1, 0 }
  0x25   : > { %s2552_s23 = scalar_lea.hbm %s3870_s3, 256  ;;  %p3165_p8 = pneg %p3149_p6 }
  0x26   : > { %p2553_p7 = scmp.ne.s32.totalorder %s3870_s3, %s2552_s23  ;;  %p2559_p11 = scmp.lt.u32.totalorder %s2552_s23, %s3870_s3 }
  0x27   : > { %s3871_s16 = scalar_select %p3165_p8, 1, 0 }
  0x28   : > { %p2555_p9 = pnand %p3165_p8, %p2553_p7 }
  0x2a   : > { %p2556_p10 = pneg %p2555_p9 }
  0x2c   : > { %p2561_p12 = pnand %p2559_p11, %p2556_p10 }
  0x2e   : > { %2564 = shalt.err (!%p2561_p12)
}
  0x2f   : > { %s2565_s21 = scalar_lea.vmem %s3138_s30, 256  ;;  %p2573_p5 = scmp.lt.s32.totalorder %s3138_s30, %s3138_s30 }
  0x30   : > { %p2566_p13 = scmp.ne.s32.totalorder %s3138_s30, %s2565_s21  ;;  %p2574_p4 = scmp.lt.s32.totalorder %s2565_s21, %s2565_s21 }
  0x32   : > { %p2568_p0 = pnand %p2566_p13, %p3165_p8  ;;  %p2575_p7 = por %p2574_p4, %p2573_p5 }
  0x34   : > { %p2569_p2 = pneg %p2568_p0 }
  0x36   : > { %p2576_p9 = pnand %p2575_p7, %p2569_p2 }
  0x38   : > { %2579 = shalt.err (!%p2576_p9)
}
  0x39   : > { %s3839_s22 = smov 64   ;;  %s3841_s13 = smov 4  }
  0x3a   : > { %2391 = dma.hbm_to_vmem [thread:$0]  (!%p3149_p6), %s3870_s3, 256, %s3138_s30, [#allocation10], %s3839_s22, %s3839_s22, %s3841_s13  }
  0x3b   : > { %s3872_s5 = sld [smem:[#allocation41_spill]] }
  0x41   : > { %s2580_s21 = scalar_lea.hbm %s3872_s5, 256 }
  0x42   : > { %p2581_p4 = scmp.ne.s32.totalorder %s3872_s5, %s2580_s21  ;;  %p2587_p12 = scmp.lt.u32.totalorder %s2580_s21, %s3872_s5 }
  0x44   : > { %p2583_p10 = pnand %p2581_p4, %p3165_p8 }
  0x46   : > { %p2584_p11 = pneg %p2583_p10 }
  0x48   : > { %p2589_p13 = pnand %p2587_p12, %p2584_p11 }
  0x4a   : > { %2592 = shalt.err (!%p2589_p13)
}
  0x4b   : > { %s2593_s30 = scalar_lea.vmem %s3153_s17, 256  ;;  %p2601_p7 = scmp.lt.s32.totalorder %s3153_s17, %s3153_s17 }
  0x4c   : > { %p2594_p0 = scmp.ne.s32.totalorder %s3153_s17, %s2593_s30  ;;  %p2602_p9 = scmp.lt.s32.totalorder %s2593_s30, %s2593_s30 }
  0x4e   : > { %p2596_p2 = pnand %p2594_p0, %p3165_p8  ;;  %p2603_p4 = por %p2602_p9, %p2601_p7 }
  0x50   : > { %p2597_p5 = pneg %p2596_p2 }
  0x52   : > { %p2604_p10 = pnand %p2603_p4, %p2597_p5 }
  0x54   : > { %2607 = shalt.err (!%p2604_p10)
}
  0x55   : > { %2397 = dma.hbm_to_vmem [thread:$0]  (!%p3149_p6), %s3872_s5, 256, %s3153_s17, [#allocation13], %s3839_s22, %s3839_s22, %s3841_s13  }
  0x56   : > { %s3873_s7 = sld [smem:[#allocation42_spill]] }
  0x5c   : > { %s2608_s23 = scalar_lea.hbm %s3873_s7, 256 }
  0x5d   : > { %p2609_p11 = scmp.ne.s32.totalorder %s3873_s7, %s2608_s23  ;;  %p2615_p0 = scmp.lt.u32.totalorder %s2608_s23, %s3873_s7 }
  0x5f   : > { %p2611_p12 = pnand %p2609_p11, %p3165_p8 }
  0x61   : > { %p2612_p13 = pneg %p2611_p12 }
  0x63   : > { %p2617_p2 = pnand %p2615_p0, %p2612_p13 }
  0x65   : > { %2620 = shalt.err (!%p2617_p2)
}
  0x66   : > { %s2621_s17 = scalar_lea.vmem %s3155_s20, 256  ;;  %p2629_p4 = scmp.lt.s32.totalorder %s3155_s20, %s3155_s20 }
  0x67   : > { %p2622_p5 = scmp.ne.s32.totalorder %s3155_s20, %s2621_s17  ;;  %p2630_p10 = scmp.lt.s32.totalorder %s2621_s17, %s2621_s17 }
  0x69   : > { %p2624_p7 = pnand %p2622_p5, %p3165_p8  ;;  %p2631_p11 = por %p2630_p10, %p2629_p4 }
  0x6b   : > { %p2625_p9 = pneg %p2624_p7 }
  0x6d   : > { %p2632_p12 = pnand %p2631_p11, %p2625_p9 }
  0x6f   : > { %2635 = shalt.err (!%p2632_p12)
}
  0x70   : > { %2403 = dma.hbm_to_vmem [thread:$0]  (!%p3149_p6), %s3873_s7, 256, %s3155_s20, [#allocation16], %s3839_s22, %s3839_s22, %s3841_s13  }
  0x71   : > { %s3019_s11 = smov [#allocation18]   ;;  %s3874_s9 = sld [smem:[#allocation43_spill]] }
  0x72   : > { %s459_s12 = sshll.u32 %s3019_s11, 4  ;;  %s460_s12 = int_to_ptr.vmem [resolvable:$true] %s459_s12 }
  0x77   : > { %s2636_s24 = scalar_lea.hbm %s3874_s9, 256 }
  0x78   : > { %p2637_p13 = scmp.ne.s32.totalorder %s3874_s9, %s2636_s24  ;;  %p2643_p5 = scmp.lt.u32.totalorder %s2636_s24, %s3874_s9 }
  0x7a   : > { %p2639_p0 = pnand %p2637_p13, %p3165_p8 }
  0x7c   : > { %p2640_p2 = pneg %p2639_p0 }
  0x7e   : > { %p2645_p7 = pnand %p2643_p5, %p2640_p2 }
  0x80   : > { %2648 = shalt.err (!%p2645_p7)
}
  0x81   : > { %s2649_s20 = scalar_lea.vmem %s460_s12, 256  ;;  %p2657_p11 = scmp.lt.s32.totalorder %s460_s12, %s460_s12 }
  0x82   : > { %p2650_p9 = scmp.ne.s32.totalorder %s460_s12, %s2649_s20  ;;  %p2658_p12 = scmp.lt.s32.totalorder %s2649_s20, %s2649_s20 }
  0x84   : > { %p2652_p4 = pnand %p2650_p9, %p3165_p8  ;;  %p2659_p1 = por %p2658_p12, %p2657_p11 }
  0x86   : > { %p2653_p10 = pneg %p2652_p4 }
  0x88   : > { %p2660_p3 = pnand %p2659_p1, %p2653_p10 }
  0x8a   : > { %2663 = shalt.err (!%p2660_p3)
}
  0x8b   : > { %s3020_s30 = smov 128   ;;  %s3021_s2 = smov 8  }
  0x8c   : > { %2409 = dma.hbm_to_vmem [thread:$0]  (!%p3149_p6), %s3874_s9, 256, %s460_s12, [#allocation19], %s3020_s30, %s3020_s30, %s3021_s2  }
  0x8d   : > { %s3838_s23 = sadd.s32 4294967294, %s3012_s28   ;;  %s3261_s24 = sadd.s32 1, %s3012_s28  }
  0x8e   : > { %3875 = sst [smem:[#allocation35_spill]] %s3261_s24  ;;  %s44_s29 = ssub.s32 %s3012_s28, %s3261_s24 }
  0x8f   : > { %s47_s19 = sadd.s32 1, %s3008_s27  ;;  %p45_p1 = scmp.eq.s32.totalorder %s44_s29, 0 }
  0x90   : > { %p54_p3 = scmp.ne.s32.totalorder %s3008_s27, %s3004_s26  ;;  %p55_p13 = scmp.eq.s32.totalorder %s3012_s28, 0 }
  0x91   : > { %p60_p0 = scmp.ne.s32.totalorder %s3004_s26, %s3000_s25  ;;  %p3877_p5 = scmp.eq.s32.totalorder %s3133_s14, 0 }
  0x92   : > { %s3272_s21 = scalar_select %p45_p1, %s3008_s27, %s47_s19  }
  0x93   : > { %p56_p2 = por %p55_p13, %p54_p3  ;;  %p3276_p7 = por %p3877_p5, %p60_p0 }
  0x94   : > { %3876 = sst [smem:[#allocation36_spill]] %s3272_s21  ;;  %p304_p9 = scmp.eq.s32.totalorder %s3133_s14, 1 }
  0x95   : > { %s3878_s17 = scalar_select %p3276_p7, 1, 0 }
  0x96   : > { %p310_p4 = scmp.eq.s32.totalorder %s3838_s23, 1  ;;  %p2441_p10 = scmp.lt.s32.totalorder %s3012_s28, 2 }
  0x97   : > { %s3285_s12 = sand.u32 1, %s3008_s27   ;;  %p3287_p11 = por %p304_p9, %p54_p3 }
  0x98   : > { %p3291_p12 = por %p310_p4, %p60_p0  ;;  %p3295_p1 = pnand %p2441_p10, %p56_p2 }
  0x99   : > { %s3879_s20 = scalar_select %p3287_p11, 1, 0 }
  0x9a   : > { %s3880_s30 = scalar_select %p3291_p12, 1, 0 }
  0x9b   : > { %s3881_s2 = scalar_select %p3295_p1, 1, 0 }
  0x9c   : > { %s502_s11 = sand.u32 1, %s3012_s28   ;;  %s2135_s15 = sshll.u32 %s3285_s12, 3 }
  0x9d   : > { %s2136_s29 = sshll.u32 %s3012_s28, 7  ;;  %s506_s19 = scalar_lea.vmem [#allocation6], %s2135_s15 }
  0x9e   : > { %s513_s23 = sshll.u32 %s506_s19, 4  ;;  %s3882_s1 = sld [smem:[#allocation37_spill]]  ;;  %s3307_s23 = int_to_ptr.vmem [resolvable:$true] %s513_s23 }
  0x9f   : > { %s3309_s5 = scalar_lea.sflag [#allocation7], %s502_s11  ;;  %p3315_p13 = pneg %p3295_p1 }
  0xa1   : > { %s3883_s9 = scalar_select %p3315_p13, 1, 0 }
  0xa4   : > { %s3305_s3 = scalar_lea.hbm %s3882_s1, %s2136_s29  ;;  %s2669_s15 = scalar_lea.hbm %s3882_s1, 256 }
  0xa5   : > { %s2664_s7 = scalar_lea.hbm %s3305_s3, 128  ;;  %p2670_p5 = scmp.lt.u32.totalorder %s3305_s3, %s3882_s1 }
  0xa6   : > { %p2665_p3 = scmp.ne.s32.totalorder %s3305_s3, %s2664_s7  ;;  %p2671_p9 = scmp.lt.u32.totalorder %s2669_s15, %s2664_s7 }
  0xa7   : > { %p2673_p10 = scmp.lt.u32.totalorder %s2664_s7, %s3305_s3 }
  0xa8   : > { %p2667_p0 = pnand %p3315_p13, %p2665_p3  ;;  %p2672_p4 = por %p2671_p9, %p2670_p5 }
  0xaa   : > { %p2668_p2 = pneg %p2667_p0  ;;  %p2674_p12 = por %p2673_p10, %p2672_p4 }
  0xac   : > { %p2675_p11 = pnand %p2674_p12, %p2668_p2 }
  0xae   : > { %2678 = shalt.err (!%p2675_p11)
}
  0xaf   : > { %s2679_s11 = scalar_lea.vmem %s3307_s23, 128  ;;  %s3022_s22 = smov [#allocation6]  }
  0xb0   : > { %p2680_p3 = scmp.ne.s32.totalorder %s3307_s23, %s2679_s11  ;;  %s2684_s13 = sshll.u32 %s3022_s22, 4  ;;  %s2685_s13 = int_to_ptr.vmem [resolvable:$false] %s2684_s13 }
  0xb1   : > { %s2686_s29 = scalar_lea.vmem %s2685_s13, 256  ;;  %p2687_p6 = scmp.lt.s32.totalorder %s3307_s23, %s2685_s13 }
  0xb2   : > { %p2682_p0 = pnand %p2680_p3, %p3315_p13  ;;  %p2688_p8 = scmp.lt.s32.totalorder %s2686_s29, %s2679_s11 }
  0xb4   : > { %p2683_p7 = pneg %p2682_p0  ;;  %p2689_p5 = por %p2688_p8, %p2687_p6 }
  0xb6   : > { %p2690_p9 = pnand %p2689_p5, %p2683_p7 }
  0xb8   : > { %2693 = shalt.err (!%p2690_p9)
}
  0xb9   : > { %2419 = dma.hbm_to_vmem [thread:$0]  (!%p3295_p1), %s3305_s3, 128, %s3307_s23, %s3309_s5  }
  0xba   : > { %s3023_s7 = smov [#allocation11]   ;;  %s3024_s19 = smov [#allocation14]  }
  0xbb   : > { %s394_s15 = sshll.u32 %s3023_s7, 4  ;;  %s420_s1 = sshll.u32 %s3024_s19, 4  ;;  %s395_s15 = int_to_ptr.vmem [resolvable:$true] %s394_s15  ;;  %s3339_s1 = int_to_ptr.vmem [resolvable:$true] %s420_s1 }
  0xbc   : > { %s3884_s4 = sld [smem:[#allocation40_spill]]  ;;  %p3885_p8 = scmp.ne.s32.totalorder %s3871_s16, 0 }
  0xc2   : > { %s2694_s11 = scalar_lea.hbm %s3884_s4, 256 }
  0xc3   : > { %p2695_p6 = scmp.ne.s32.totalorder %s3884_s4, %s2694_s11  ;;  %p2701_p12 = scmp.lt.u32.totalorder %s2694_s11, %s3884_s4 }
  0xc5   : > { %p2697_p7 = pnand %p2695_p6, %p3885_p8 }
  0xc7   : > { %p2698_p11 = pneg %p2697_p7 }
  0xc9   : > { %p2703_p2 = pnand %p2701_p12, %p2698_p11 }
  0xcb   : > { %2706 = shalt.err (!%p2703_p2)
}
  0xcc   : > { %s2707_s23 = scalar_lea.vmem %s395_s15, 256  ;;  %p2715_p0 = scmp.lt.s32.totalorder %s395_s15, %s395_s15 }
  0xcd   : > { %p2708_p4 = scmp.ne.s32.totalorder %s395_s15, %s2707_s23  ;;  %p2716_p5 = scmp.lt.s32.totalorder %s2707_s23, %s2707_s23 }
  0xcf   : > { %p2710_p10 = pnand %p2708_p4, %p3885_p8  ;;  %p2717_p9 = por %p2716_p5, %p2715_p0 }
  0xd1   : > { %p2711_p3 = pneg %p2710_p10 }
  0xd3   : > { %p2718_p1 = pnand %p2717_p9, %p2711_p3 }
  0xd5   : > { %2721 = shalt.err (!%p2718_p1)
}
  0xd6   : > { %p3886_p6 = scmp.ne.s32.totalorder %s3869_s18, 0  ;;  %s3887_s21 = smov 4  }
  0xd7   : > { %s3888_s7 = smov 64   ;;  %s2722_s11 = scalar_lea.hbm %s3823_s6, 256 }
  0xd8   : > { %2394 = dma.hbm_to_vmem [thread:$0]  (!%p3886_p6), %s3884_s4, 256, %s395_s15, [#allocation10], %s3888_s7, %s3888_s7, %s3887_s21  }
  0xd9   : > { %p2723_p7 = scmp.ne.s32.totalorder %s3823_s6, %s2722_s11  ;;  %p2729_p12 = scmp.lt.u32.totalorder %s2722_s11, %s3823_s6 }
  0xdb   : > { %p2725_p1 = pnand %p2723_p7, %p3885_p8 }
  0xdd   : > { %p2726_p11 = pneg %p2725_p1 }
  0xdf   : > { %p2731_p2 = pnand %p2729_p12, %p2726_p11 }
  0xe1   : > { %2734 = shalt.err (!%p2731_p2)
}
  0xe2   : > { %s2735_s15 = scalar_lea.vmem %s3339_s1, 256  ;;  %p2743_p0 = scmp.lt.s32.totalorder %s3339_s1, %s3339_s1 }
  0xe3   : > { %p2736_p4 = scmp.ne.s32.totalorder %s3339_s1, %s2735_s15  ;;  %p2744_p5 = scmp.lt.s32.totalorder %s2735_s15, %s2735_s15 }
  0xe5   : > { %p2738_p10 = pnand %p2736_p4, %p3885_p8  ;;  %p2745_p9 = por %p2744_p5, %p2743_p0 }
  0xe7   : > { %p2739_p3 = pneg %p2738_p10 }
  0xe9   : > { %p2746_p7 = pnand %p2745_p9, %p2739_p3 }
  0xeb   : > { %2749 = shalt.err (!%p2746_p7)
}
  0xec   : > { %2400 = dma.hbm_to_vmem [thread:$0]  (!%p3886_p6), %s3823_s6, 256, %s3339_s1, [#allocation13], %s3888_s7, %s3888_s7, %s3887_s21  }
  0xed   : > { %s3025_s19 = smov [#allocation17]   ;;  %s3026_s13 = smov [#allocation20]  }
  0xee   : > { %s446_s22 = sshll.u32 %s3025_s19, 4  ;;  %s473_s11 = sshll.u32 %s3026_s13, 4  ;;  %s447_s22 = int_to_ptr.vmem [resolvable:$true] %s446_s22  ;;  %s3388_s11 = int_to_ptr.vmem [resolvable:$true] %s473_s11 }
  0xef   : > { %s2750_s23 = scalar_lea.hbm %s3825_s8, 1024 }
  0xf0   : > { %p2751_p1 = scmp.ne.s32.totalorder %s3825_s8, %s2750_s23  ;;  %p2757_p2 = scmp.lt.u32.totalorder %s2750_s23, %s3825_s8 }
  0xf2   : > { %p2753_p11 = pnand %p2751_p1, %p3885_p8 }
  0xf4   : > { %p2754_p12 = pneg %p2753_p11 }
  0xf6   : > { %p2759_p4 = pnand %p2757_p2, %p2754_p12 }
  0xf8   : > { %2762 = shalt.err (!%p2759_p4)
}
  0xf9   : > { %s2763_s27 = scalar_lea.vmem %s447_s22, 1024  ;;  %p2771_p5 = scmp.lt.s32.totalorder %s447_s22, %s447_s22 }
  0xfa   : > { %p2764_p10 = scmp.ne.s32.totalorder %s447_s22, %s2763_s27  ;;  %p2772_p9 = scmp.lt.s32.totalorder %s2763_s27, %s2763_s27 }
  0xfc   : > { %p2766_p3 = pnand %p2764_p10, %p3885_p8  ;;  %p2773_p7 = por %p2772_p9, %p2771_p5 }
  0xfe   : > { %p2767_p0 = pneg %p2766_p3 }
 0x100   : > { %p2774_p13 = pnand %p2773_p7, %p2767_p0 }
 0x102   : > { %2777 = shalt.err (!%p2774_p13)
}
 0x103   : > { %2406 = dma.hbm_to_vmem [thread:$0]  (!%p3886_p6), %s3825_s8, 1024, %s447_s22, [#allocation16], %s3888_s7, %s3888_s7, %s3887_s21  }
 0x104   : > { %s2778_s3 = scalar_lea.hbm %s3827_s10, 16 }
 0x105   : > { %p2779_p1 = scmp.ne.s32.totalorder %s3827_s10, %s2778_s3  ;;  %p2785_p12 = scmp.lt.u32.totalorder %s2778_s3, %s3827_s10 }
 0x107   : > { %p2781_p13 = pnand %p2779_p1, %p3885_p8 }
 0x109   : > { %p2782_p11 = pneg %p2781_p13 }
 0x10b   : > { %p2787_p2 = pnand %p2785_p12, %p2782_p11 }
 0x10d   : > { %2790 = shalt.err (!%p2787_p2)
}
 0x10e   : > { %s2791_s21 = scalar_lea.vmem %s3388_s11, 16  ;;  %s2798_s7 = scalar_lea.vmem %s3388_s11, 32 }
 0x10f   : > { %p2792_p4 = scmp.ne.s32.totalorder %s3388_s11, %s2791_s21  ;;  %p2799_p0 = scmp.lt.s32.totalorder %s3388_s11, %s3388_s11 }
 0x110   : > { %p2800_p5 = scmp.lt.s32.totalorder %s2798_s7, %s2791_s21 }
 0x111   : > { %p2794_p10 = pnand %p2792_p4, %p3885_p8 }
 0x112   : > { %p2801_p9 = por %p2800_p5, %p2799_p0 }
 0x113   : > { %p2795_p3 = pneg %p2794_p10 }
 0x115   : > { %p2802_p7 = pnand %p2801_p9, %p2795_p3 }
 0x117   : > { %2805 = shalt.err (!%p2802_p7)
}
 0x118   : > { %2412 = dma.hbm_to_vmem [thread:$0]  (!%p3886_p6), %s3827_s10, 16, %s3388_s11, [#allocation19]  }
 0x119   : > { %s2133_s16 = sshll.u32 %s3285_s12, 2  ;;  %s2134_s4 = sshll.u32 %s3012_s28, 6 }
 0x11a   : > { %s3442_s29 = scalar_lea.hbm %s3817_s0, %s2134_s4  ;;  %s488_s18 = scalar_lea.vmem [#allocation3], %s2133_s16 }
 0x11b   : > { %s495_s3 = sshll.u32 %s488_s18, 4  ;;  %s485_s23 = scalar_lea.sflag [#allocation4], %s3285_s12  ;;  %s496_s3 = int_to_ptr.vmem [resolvable:$true] %s495_s3 }
 0x11c   : > { %s2806_s15 = scalar_lea.hbm %s3442_s29, 64  ;;  %p3889_p6 = scmp.ne.s32.totalorder %s3883_s9, 0 }
 0x11d   : > { %p2807_p8 = scmp.ne.s32.totalorder %s3442_s29, %s2806_s15  ;;  %s2811_s1 = scalar_lea.hbm %s3817_s0, 128 }
 0x11e   : > { %p2812_p11 = scmp.lt.u32.totalorder %s3442_s29, %s3817_s0  ;;  %p2813_p12 = scmp.lt.u32.totalorder %s2811_s1, %s2806_s15 }
 0x11f   : > { %p2809_p1 = pnand %p2807_p8, %p3889_p6  ;;  %p2815_p4 = scmp.lt.u32.totalorder %s2806_s15, %s3442_s29 }
 0x120   : > { %p2814_p2 = por %p2813_p12, %p2812_p11 }
 0x121   : > { %p2810_p13 = pneg %p2809_p1 }
 0x122   : > { %p2816_p10 = por %p2815_p4, %p2814_p2 }
 0x124   : > { %p2817_p3 = pnand %p2816_p10, %p2810_p13 }
 0x126   : > { %2820 = shalt.err (!%p2817_p3)
}
 0x127   : > { %s2821_s22 = scalar_lea.vmem %s496_s3, 64  ;;  %s3027_s27 = smov [#allocation3]  }
 0x128   : > { %p2822_p0 = scmp.ne.s32.totalorder %s496_s3, %s2821_s22  ;;  %s2826_s19 = sshll.u32 %s3027_s27, 4  ;;  %s2827_s19 = int_to_ptr.vmem [resolvable:$false] %s2826_s19 }
 0x129   : > { %s2828_s13 = scalar_lea.vmem %s2827_s19, 128  ;;  %p2829_p7 = scmp.lt.s32.totalorder %s496_s3, %s2827_s19 }
 0x12a   : > { %p2824_p5 = pnand %p2822_p0, %p3889_p6  ;;  %p2830_p8 = scmp.lt.s32.totalorder %s2828_s13, %s2821_s22 }
 0x12c   : > { %p2825_p9 = pneg %p2824_p5  ;;  %p2831_p1 = por %p2830_p8, %p2829_p7 }
 0x12e   : > { %p2832_p11 = pnand %p2831_p1, %p2825_p9 }
 0x130   : > { %2835 = shalt.err (!%p2832_p11)
}
 0x131   : > { %p3890_p12 = scmp.ne.s32.totalorder %s3881_s2, 0  ;;  %s3891_s11 = sld [smem:[#allocation38_spill]] }
 0x132   : > { %s524_s1 = scalar_lea.vmem [#allocation8], %s2133_s16 }
 0x133   : > { %2416 = dma.hbm_to_vmem [thread:$0]  (!%p3890_p12), %s3442_s29, 64, %s496_s3, %s485_s23  }
 0x134   : > { %s531_s21 = sshll.u32 %s524_s1, 4  ;;  %s532_s21 = int_to_ptr.vmem [resolvable:$true] %s531_s21 }
 0x137   : > { %s3469_s24 = scalar_lea.hbm %s3891_s11, %s2134_s4  ;;  %s2841_s23 = scalar_lea.hbm %s3891_s11, 128 }
 0x138   : > { %s2836_s7 = scalar_lea.hbm %s3469_s24, 64  ;;  %p2842_p10 = scmp.lt.u32.totalorder %s3469_s24, %s3891_s11 }
 0x139   : > { %p2837_p13 = scmp.ne.s32.totalorder %s3469_s24, %s2836_s7  ;;  %p2843_p3 = scmp.lt.u32.totalorder %s2841_s23, %s2836_s7 }
 0x13a   : > { %p2845_p5 = scmp.lt.u32.totalorder %s2836_s7, %s3469_s24 }
 0x13b   : > { %p2839_p2 = pnand %p2837_p13, %p3889_p6  ;;  %p2844_p0 = por %p2843_p3, %p2842_p10 }
 0x13d   : > { %p2840_p4 = pneg %p2839_p2  ;;  %p2846_p9 = por %p2845_p5, %p2844_p0 }
 0x13f   : > { %p2847_p7 = pnand %p2846_p9, %p2840_p4 }
 0x141   : > { %2850 = shalt.err (!%p2847_p7)
}
 0x142   : > { %s2851_s12 = scalar_lea.vmem %s532_s21, 64  ;;  %s3028_s16 = smov [#allocation8]  }
 0x143   : > { %p2852_p8 = scmp.ne.s32.totalorder %s532_s21, %s2851_s12  ;;  %s2856_s27 = sshll.u32 %s3028_s16, 4  ;;  %s2857_s27 = int_to_ptr.vmem [resolvable:$false] %s2856_s27 }
 0x144   : > { %s2858_s19 = scalar_lea.vmem %s2857_s27, 128  ;;  %p2859_p13 = scmp.lt.s32.totalorder %s532_s21, %s2857_s27 }
 0x145   : > { %p2854_p1 = pnand %p2852_p8, %p3889_p6  ;;  %p2860_p2 = scmp.lt.s32.totalorder %s2858_s19, %s2851_s12 }
 0x147   : > { %p2855_p11 = pneg %p2854_p1  ;;  %p2861_p12 = por %p2860_p2, %p2859_p13 }
 0x149   : > { %p2862_p3 = pnand %p2861_p12, %p2855_p11 }
 0x14b   : > { %2865 = shalt.err (!%p2862_p3)
}
 0x14c   : > { %p3892_p10 = scmp.ne.s32.totalorder %s3881_s2, 0  ;;  %s3893_s13 = sld [smem:[#allocation34_spill]] }
 0x14e   : > { %2422 = dma.hbm_to_vmem [thread:$0]  (!%p3892_p10), %s3469_s24, 64, %s532_s21, %s3309_s5  }
 0x152   : > { %p3894_p4 = scmp.ne.s32.totalorder %s3893_s13, 0 }
 0x153   : > { %s3494_s9 = sand.u32 (!%p3894_p4), 1, %s3004_s26   ;;  %p3895_p6 = scmp.ne.s32.totalorder (!%p3894_p4), %s3878_s17, 0 }
 0x154   : > { %540 = sbr.rel (%p3894_p4) target bundleno = 3666 (0xe52), region = 64  ;;  %s3497_s18 = sshll.u32 (!%p3894_p4), %s3494_s9, 2 }
 0x155   : > { %s543_s15 = scalar_lea.sflag (!%p3894_p4), [#allocation4], %s3494_s9  ;;  %s546_s1 = scalar_lea.vmem (!%p3894_p4), [#allocation3], %s3497_s18 }
 0x15b   : > { %2967 = dma.done.wait (%p3895_p6), %s543_s15, 64  }
 0x15c   : > { %2969 = vsyncadd (%p3895_p6), %s543_s15, 4294967232  ;;  %s551_s5 = sand.u32 1, %s3133_s14   ;;  %s2141_s2 = sshll.u32 %s3494_s9, 3 }
 0x15d   : > { %s552_s24 = scalar_lea.sflag [#allocation7], %s551_s5  ;;  %s555_s21 = scalar_lea.vmem [#allocation6], %s2141_s2 }
 0x15e   : > { %2971 = dma.done.wait (%p3895_p6), %s552_s24, 192  }
 0x15f   : > { %2973 = vsyncadd (%p3895_p6), %s552_s24, 4294967104  ;;  %s564_s7 = scalar_lea.vmem [#allocation8], %s3497_s18  ;;  %p3896_p12 = scmp.eq.s32.totalorder %s3133_s14, 0 }
 0x161   : > { %2975 = dma.done.wait (%p3896_p12), [#allocation10], 512   ;;  %p3897_p0 = pmov %p3896_p12 }
 0x163   : > { %2977 = vsyncadd (%p3897_p0), [#allocation10], 4294966784  ;;  %p3898_p5 = pmov %p3897_p0 }
 0x164   : > { %p3899_p9 = pmov %p3897_p0 }
 0x165   : > { %2979 = dma.done.wait (%p3898_p5), [#allocation13], 512  }
 0x166   : > { %2981 = vsyncadd (%p3899_p9), [#allocation13], 4294966784  ;;  %p3900_p7 = pmov %p3897_p0 }
 0x167   : > { %p3901_p8 = pmov %p3897_p0 }
 0x168   : > { %2983 = dma.done.wait (%p3900_p7), [#allocation16], 1280  }
 0x169   : > { %2985 = vsyncadd (%p3901_p8), [#allocation16], 4294966016  ;;  %p3902_p1 = pmov %p3897_p0 }
 0x16a   : > { %p3903_p11 = pmov %p3897_p0 }
 0x16b   : > { %2987 = dma.done.wait (%p3902_p1), [#allocation19], 272  }
 0x16c   : > { %2989 = vsyncadd (%p3903_p11), [#allocation19], 4294967024  ;;  %v3532_v0 = vld [vmem:[%s555_s21] sm:$0xff]  ;;  %v3029_v1 = vmov 0   ;;  %v696_v3 = vld [vmem:[%s546_s1] sm:$0xf]  ;;  %v719_v18 = vlaneseq }
 0x16d   : > { %661 = vxpose.xlu0.b32.start.end [1/1] (short) (narrow) %v3532_v0, 8  ;;  %v697_v4 = vunpack.c.l.bf16 %v696_v3  ;;  %vm704_vm0 = vcmask 261120   ;;  %v2506_v13 = vld [vmem:[#allocation9] sm:$0xff]   ;;  %v3030_v14 = vmov 0.0   ;;  %vm3031_vm1 = vmmov 0   ;;  %v2507_v15 = vld [vmem:[#allocation9 + $0x8] sm:$0xff]  }
 0x16e   : > { %2236 = vmatprep.subr.bf16.mxu0 %v3030_v14  ;;  %2240 = vmatprep.mubr.msk.bf16.mxu0 %vm3031_vm1, %v3030_v14  ;;  %v3552_v20 = vshrl.u32 %v719_v18, 7  ;;  %v3555_v22 = vld [vmem:[#allocation18] sm:$0xff]  ;;  %v2509_v33 = vld [vmem:[#allocation11 + $0x8] sm:$0xff]   ;;  %v2510_v34 = vld [vmem:[#allocation12] sm:$0xff]   ;;  %vm919_vm2 = vcmask 64512   ;;  %s3032_s17 = smov 120  }
 0x16f   : > { %2237 = vmatpush3.bf16.msra.mxu0 %v2506_v13  ;;  %2260 = vmatprep.subr.bf16.mxu1 %v3030_v14  ;;  %v2508_v31 = vld [vmem:[#allocation11] sm:$0xff]   ;;  %v2511_v35 = vld [vmem:[#allocation12 + $0x8] sm:$0xff]   ;;  %vm987_vm3 = vcmask 1043456   ;;  %s3033_s29 = smov 112   ;;  %s3034_s3 = smov 104   ;;  %vm1151_vm4 = vcmask 130112  }
 0x170   : > { %2238 = vmatprep.subr.bf16.mxu0 %v3030_v14  ;;  %2262 = vmatprep.mubr.msk.bf16.mxu1 %vm3031_vm1, %v3030_v14  ;;  %v721_v21 = vsub.s32 4, %v3552_v20  ;;  %v726_v23 = vsub.s32 5, %v3552_v20  ;;  %v800_v38 = vsub.s32 1, %v3552_v20  ;;  %v737_v40 = vsub.s32 0, %v3552_v20  ;;  %s3035_s23 = smov 8   ;;  %s3036_s22 = smov 16  }
 0x171   : > { %v860_v47 = vsub.s32 2, %v3552_v20  ;;  %s3037_s4 = smov 24   ;;  %vm1269_vm5 = vcmask 195712   ;;  %vm1387_vm6 = vcmask 261312   ;;  %vm1684_vm8 = vcmask 257024   ;;  %s644_s12 = scalar_lea.vmem [#allocation21], %s3497_s18 }
 0x172   : > { %v722_v24 = vrot.slane %v3555_v22, %v721_v21  ;;  %v727_v27 = vrot.slane %v3555_v22, %v726_v23  ;;  %v801_v42 = vrot.slane %v3555_v22, %v800_v38  ;;  %v738_v43 = vrot.slane %v3555_v22, %v737_v40  ;;  %s3694_s16 = scalar_lea.vmem [#allocation24], %s2141_s2  ;;  %s2191_s27 = sshll.u32 %s3133_s14, 6 }
 0x173   : > { %2239 = vmatpush3.bf16.msra.mxu0 %v2507_v15  ;;  %v861_v53 = vrot.slane %v3555_v22, %v860_v47  ;;  %vm1808_vm10 = vcmask 1040384   ;;  %vm1810_vm11 = vcmask 1041408   ;;  %vm1812_vm12 = vcmask 1042432   ;;  %s3904_s15 = sld [smem:[#allocation44_spill]]  ;;  %s1846_s24 = sshll.u32 %s644_s12, 4  ;;  %s1847_s24 = int_to_ptr.vmem [resolvable:$true] %s1846_s24 }
 0x174   : > { %2244 = vmatprep.subr.bf16.mxu0 %v3030_v14  ;;  %vm1815_vm13 = vcmask 1044480   ;;  %vm1817_vm14 = vcmask 1045504   ;;  %vm1819_vm15 = vcmask 1046528   ;;  %s1823_s21 = scalar_lea.sflag [#allocation5], %s3494_s9  ;;  %p3905_p2 = scmp.ne.s32.totalorder %s3879_s20, 0 }
 0x175   : > { %s3039_s2 = smov [#allocation21]  }
 0x179   : > { %s3704_s1 = scalar_lea.hbm %s3904_s15, %s2191_s27 }
 0x196   : > { %2505 = vset.pattern.permute.xlu0 %v3029_v1 }
 0x1ed   : > { %v677_v2 = vpop.trf.xlu0 }
 0x1ee   : > { %700 = vperm.xlu0 %2505, %v677_v2  }
 0x26d   : > { %v3535_v5 = vpop.permute.xlu0 %700 }
 0x26e   : > { %v3538_v6 = vmul.f32 %v3535_v5, %v697_v4 }
 0x270   : > { %v705_v7 = vsel %vm704_vm0, %v3538_v6, 0.0 }
 0x271   : > { %706 = vadd.xlane.f32.xlu1 %v705_v7 }
 0x2fe   : > { %v707_v8 = vpop.xlane.xlu1 %706 }
 0x2ff   : > { %v709_v9 = vmul.f32 0.03125, %v707_v8 }
 0x301   : > { %v710_v10 = vsub.f32 %v3538_v6, %v709_v9 }
 0x303   : > { %v711_v11 = vmul.f32 %v710_v10, %v710_v10 }
 0x305   : > { %v712_v12 = vsel %vm704_vm0, %v711_v11, 0.0 }
 0x306   : > { %713 = vadd.xlane.f32.xlu1 %v712_v12 }
 0x393   : > { %v714_v16 = vpop.xlane.xlu1 %713 }
 0x394   : > { %v715_v17 = vmul.f32 0.03125, %v714_v16 }
 0x396   : > { %v716_v19 = vadd.f32 1e-06, %v715_v17 }
 0x398   : > { %2524 = vrsqrt.f32 %v716_v19 }
 0x3a2   : > { %v2525_v25 = vpop.eup %2524 }
 0x3a3   : > { %v718_v26 = vmul.f32 %v2525_v25, %v710_v10  ;;  %v914_v10 = vsub.f32 1.0, %v3532_v0 }
 0x3a5   : > { %v723_v28 = vmul.f32 %v722_v24, %v718_v26  ;;  %v915_v11 = vmul.f32 -1e+08, %v914_v10 }
 0x3a7   : > { %v728_v29 = vadd.f32 %v727_v27, %v723_v28  ;;  %v970_v12 = vrot.slane %v915_v11, %v737_v40 }
 0x3a9   : > { %v729_v30 = vmul.f32 %v728_v29, %v3535_v5 }
 0x3ab   : > { %v734_v32 = vpack.c.bf16 %v729_v30, %v729_v30 }
 0x3ad   : > { %2241 = vmatmul.mubr.msk.bf16.vlgmr.msra.gmra.mrb[0].mxu0 %vm704_vm0, %v734_v32 }
 0x3ae   : > { %2245 = vmatpush3.bf16.msra.mxu0 %v2508_v31  ;;  %2248 = vmatprep.mubr.msk.bf16.mxu0 %vm3031_vm1, %v3030_v14 }
 0x3af   : > { %2246 = vmatprep.subr.bf16.mxu0 %v3030_v14 }
 0x3b2   : > { %2247 = vmatpush3.bf16.msra.mxu0 %v2509_v33 }
 0x3b3   : > { %2252 = vmatprep.subr.bf16.mxu0 %v3030_v14 }
 0x3b5   : > { %2249 = vmatmul.mubr.msk.bf16.vlgmr.msra.gmra.mrb[4].mxu0 %vm704_vm0, %v734_v32 }
 0x3b6   : > { %2253 = vmatpush3.bf16.msra.mxu0 %v2510_v34  ;;  %2256 = vmatprep.mubr.msk.bf16.mxu0 %vm3031_vm1, %v3030_v14 }
 0x3b7   : > { %2254 = vmatprep.subr.bf16.mxu0 %v3030_v14 }
 0x3ba   : > { %2255 = vmatpush3.bf16.msra.mxu0 %v2511_v35 }
 0x3bb   : > { %2266 = vmatprep.subr.bf16.mxu0 %v3030_v14 }
 0x3bd   : > { %2257 = vmatmul.mubr.msk.bf16.vlgmr.msra.gmra.mrb[8].mxu0 %vm704_vm0, %v734_v32 }
 0x3be   : > { %2268 = vmatprep.mubr.msk.bf16.mxu0 %vm3031_vm1, %v3030_v14 }
 0x480   : > { %v788_v36 = vpop.f32.mrb[0].mxu0 }
 0x481   : > { %v2242_v37 = vpop.f32.mrb[1].mxu0  ;;  %v789_v49 = vadd.f32 %v788_v36, %v738_v43 }
 0x482   : > { %v791_v39 = vpop.f32.mrb[2].mxu0 }
 0x483   : > { %v2243_v41 = vpop.f32.mrb[3].mxu0  ;;  %v916_v54 = vpack.c.bf16 %v789_v49, %v789_v49 }
 0x488   : > { %v848_v44 = vpop.f32.mrb[4].mxu0 }
 0x489   : > { %v849_v45 = vadd.f32 %v848_v44, %v801_v42  ;;  %v2250_v46 = vpop.f32.mrb[5].mxu0 }
 0x48a   : > { %v851_v48 = vpop.f32.mrb[6].mxu0 }
 0x48b   : > { %v917_v50 = vpack.c.bf16 %v849_v45, %v849_v45  ;;  %v2251_v51 = vpop.f32.mrb[7].mxu0 }
 0x48d   : > { %1036 = vrot.lane.b32.xlu1 %v917_v50, %s3032_s17  ;;  %v924_v52 = vsel %vm919_vm2, %v917_v50, 0 }
 0x48e   : > { %2261 = vmatpush3.bf16.xpose.msra.mxu1 %v924_v52 }
 0x48f   : > { %2272 = vmatprep.subr.bf16.mxu1 %v3030_v14 }
 0x490   : > { %v908_v55 = vpop.f32.mrb[8].mxu0 }
 0x491   : > { %v909_v56 = vadd.f32 %v908_v55, %v861_v53  ;;  %1033 = vrot.lane.b32.xlu1 %v916_v54, %s3032_s17  ;;  %v2258_v57 = vpop.f32.mrb[9].mxu0 }
 0x492   : > { %v911_v58 = vpop.f32.mrb[10].mxu0 }
 0x493   : > { %v3584_v59 = vpack.c.bf16 %v909_v56, %v909_v56  ;;  %v2259_v60 = vpop.f32.mrb[11].mxu0 }
 0x495   : > { %1155 = vrot.lane.b32.xlu1 %v917_v50, %s3033_s29  ;;  %2263 = vmatmul.mubr.msk.bf16.vlgmr.msra.gmra.mrb[0].mxu1 %vm919_vm2, %v916_v54  ;;  %v989_v61 = vsel %vm987_vm3, %v3584_v59, 0 }
 0x496   : > { %2267 = vmatpush3.bf16.msra.mxu0 %v989_v61  ;;  %2274 = vmatprep.mubr.msk.bf16.mxu1 %vm3031_vm1, %v3030_v14 }
 0x497   : > { %2278 = vmatprep.subr.bf16.mxu0 %v3030_v14 }
 0x499   : > { %1153 = vrot.lane.b32.xlu1 %v916_v54, %s3033_s29 }
 0x49d   : > { %1273 = vrot.lane.b32.xlu1 %v917_v50, %s3034_s3 }
 0x4a1   : > { %1271 = vrot.lane.b32.xlu1 %v916_v54, %s3034_s3 }
 0x4ff   : > { %v1037_v62 = vpop.permute.xlu1 %1036 }
 0x500   : > { %v1042_v63 = vsel %vm919_vm2, %v1037_v62, 0 }
 0x501   : > { %2273 = vmatpush3.bf16.xpose.msra.mxu1 %v1042_v63 }
 0x502   : > { %2284 = vmatprep.subr.bf16.mxu1 %v3030_v14 }
 0x503   : > { %v1034_v1 = vpop.permute.xlu1 %1033 }
 0x507   : > { %v1156_v2 = vpop.permute.xlu1 %1155 }
 0x508   : > { %v1161_v3 = vsel %vm919_vm2, %v1156_v2, 0  ;;  %2275 = vmatmul.mubr.msk.bf16.vlgmr.msra.gmra.mrb[4].mxu1 %vm919_vm2, %v1034_v1 }
 0x509   : > { %2285 = vmatpush3.bf16.xpose.msra.mxu1 %v1161_v3  ;;  %2286 = vmatprep.mubr.msk.bf16.mxu1 %vm3031_vm1, %v3030_v14 }
 0x50a   : > { %2296 = vmatprep.subr.bf16.mxu1 %v3030_v14 }
 0x50b   : > { %v1154_v4 = vpop.permute.xlu1 %1153 }
 0x50f   : > { %v1274_v7 = vpop.permute.xlu1 %1273 }
 0x510   : > { %v1279_v8 = vsel %vm919_vm2, %v1274_v7, 0  ;;  %2287 = vmatmul.mubr.msk.bf16.vlgmr.msra.gmra.mrb[8].mxu1 %vm919_vm2, %v1154_v4 }
 0x511   : > { %2297 = vmatpush3.bf16.xpose.msra.mxu1 %v1279_v8  ;;  %2298 = vmatprep.mubr.msk.bf16.mxu1 %vm3031_vm1, %v3030_v14 }
 0x512   : > { %2308 = vmatprep.subr.bf16.mxu1 %v3030_v14 }
 0x513   : > { %v1272_v9 = vpop.permute.xlu1 %1271 }
 0x518   : > { %2299 = vmatmul.mubr.msk.bf16.vlgmr.msra.gmra.mrb[12].mxu1 %vm919_vm2, %v1272_v9 }
 0x519   : > { %2312 = vmatprep.mubr.msk.bf16.mxu1 %vm3031_vm1, %v3030_v14 }
 0x568   : > { %v960_v13 = vpop.f32.mrb[0].mxu1 }
 0x569   : > { %v966_v15 = vmul.f32 0.35355338, %v960_v13  ;;  %v2264_v16 = vpop.f32.mrb[1].mxu1 }
 0x56a   : > { %v963_v17 = vpop.f32.mrb[2].mxu1 }
 0x56b   : > { %v2265_v18 = vpop.f32.mrb[3].mxu1  ;;  %v971_v19 = vadd.f32 %v970_v12, %v966_v15 }
 0x56d   : > { %v972_v21 = vsel %vm919_vm2, %v971_v19, -inf }
 0x56e   : > { %973 = vmax.xlane.f32.xlu0 %v972_v21 }
 0x5db   : > { %v1078_v23 = vpop.f32.mrb[4].mxu1 }
 0x5dc   : > { %v1084_v24 = vmul.f32 0.35355338, %v1078_v23  ;;  %v2276_v25 = vpop.f32.mrb[5].mxu1 }
 0x5dd   : > { %v1081_v26 = vpop.f32.mrb[6].mxu1 }
 0x5de   : > { %v2277_v27 = vpop.f32.mrb[7].mxu1  ;;  %v1085_v28 = vadd.f32 %v1084_v24, %v970_v12 }
 0x5e0   : > { %v1086_v29 = vsel %vm919_vm2, %v1085_v28, -inf }
 0x5e1   : > { %1087 = vmax.xlane.f32.xlu1 %v1086_v29 }
 0x5e3   : > { %v1197_v30 = vpop.f32.mrb[8].mxu1 }
 0x5e4   : > { %v1203_v31 = vmul.f32 0.35355338, %v1197_v30  ;;  %v2288_v32 = vpop.f32.mrb[9].mxu1 }
 0x5e5   : > { %v1200_v33 = vpop.f32.mrb[10].mxu1 }
 0x5e6   : > { %v2289_v34 = vpop.f32.mrb[11].mxu1  ;;  %v1204_v35 = vadd.f32 %v1203_v31, %v970_v12 }
 0x5e8   : > { %v1205_v36 = vsel %vm919_vm2, %v1204_v35, -inf }
 0x5e9   : > { %1206 = vmax.xlane.f32.xlu0 %v1205_v36  ;;  %v2512_v36 = vld [vmem:[#allocation14] sm:$0xff]  }
 0x5ea   : > { %2309 = vmatpush3.bf16.msra.mxu1 %v2512_v36 }
 0x5eb   : > { %v1315_v37 = vpop.f32.mrb[12].mxu1  ;;  %2310 = vmatprep.subr.bf16.mxu1 %v3030_v14 }
 0x5ec   : > { %v1321_v38 = vmul.f32 0.35355338, %v1315_v37  ;;  %v2300_v39 = vpop.f32.mrb[13].mxu1  ;;  %v2513_v37 = vld [vmem:[#allocation14 + $0x8] sm:$0xff]  }
 0x5ed   : > { %v1318_v40 = vpop.f32.mrb[14].mxu1 }
 0x5ee   : > { %v2301_v41 = vpop.f32.mrb[15].mxu1  ;;  %v1322_v42 = vadd.f32 %v1321_v38, %v970_v12  ;;  %2311 = vmatpush3.bf16.msra.mxu1 %v2513_v37 }
 0x5ef   : > { %2324 = vmatprep.subr.bf16.mxu1 %v3030_v14 }
 0x5f0   : > { %v1323_v43 = vsel %vm919_vm2, %v1322_v42, -inf }
 0x5f1   : > { %1324 = vmax.xlane.f32.xlu0 %v1323_v43 }
 0x5fb   : > { %v974_v44 = vpop.xlane.xlu0 %973 }
 0x5fc   : > { %v975_v45 = vsub.f32 %v971_v19, %v974_v44 }
 0x5fe   : > { %v976_v46 = vmul.f32 1.442695, %v975_v45 }
 0x600   : > { %2526 = vpow2.f32 %v976_v46 }
 0x60a   : > { %v2527_v47 = vpop.eup %2526 }
 0x60b   : > { %v978_v48 = vsel %vm919_vm2, %v2527_v47, 0.0 }
 0x60c   : > { %979 = vadd.xlane.f32.xlu1 %v978_v48 }
 0x61d   : > { %1099 = vrot.lane.b32.xlu1 %v3584_v59, %s3032_s17  ;;  %s2866_s17 = scalar_lea.vmem %s1847_s24, 64 }
 0x61e   : > { %p2867_p13 = scmp.ne.s32.totalorder %s1847_s24, %s2866_s17 }
 0x620   : > { %p2868_p3 = pnand %p2867_p13, %p3905_p2 }
 0x622   : > { %p2869_p10 = pneg %p2868_p3 }
 0x66e   : > { %v1088_v49 = vpop.xlane.xlu1 %1087 }
 0x66f   : > { %v1089_v50 = vsub.f32 %v1085_v28, %v1088_v49 }
 0x671   : > { %v1090_v51 = vmul.f32 1.442695, %v1089_v50 }
 0x673   : > { %2528 = vpow2.f32 %v1090_v51  ;;  %v1397_v51 = vsub.s32 3, %v3552_v20 }
 0x676   : > { %v1207_v52 = vpop.xlane.xlu0 %1206 }
 0x677   : > { %v1208_v53 = vsub.f32 %v1204_v35, %v1207_v52  ;;  %v1398_v52 = vrot.slane %v3555_v22, %v1397_v51 }
 0x679   : > { %v1209_v54 = vmul.f32 1.442695, %v1208_v53 }
 0x67b   : > { %2530 = vpow2.f32 %v1209_v54 }
 0x67d   : > { %v2529_v55 = vpop.eup %2528 }
 0x67e   : > { %v1325_v56 = vpop.xlane.xlu0 %1324  ;;  %v1092_v57 = vsel %vm919_vm2, %v2529_v55, 0.0 }
 0x67f   : > { %v1326_v58 = vsub.f32 %v1322_v42, %v1325_v56  ;;  %1093 = vadd.xlane.f32.xlu0 %v1092_v57 }
 0x681   : > { %v1327_v60 = vmul.f32 1.442695, %v1326_v58 }
 0x683   : > { %2532 = vpow2.f32 %v1327_v60 }
 0x685   : > { %v2531_v61 = vpop.eup %2530 }
 0x686   : > { %v1211_v62 = vsel %vm919_vm2, %v2531_v61, 0.0 }
 0x687   : > { %1212 = vadd.xlane.f32.xlu1 %v1211_v62 }
 0x68d   : > { %v2533_v63 = vpop.eup %2532 }
 0x68e   : > { %v1329_v1 = vsel %vm919_vm2, %v2533_v63, 0.0 }
 0x68f   : > { %1330 = vadd.xlane.f32.xlu0 %v1329_v1 }
 0x698   : > { %1335 = vrot.lane.b32.xlu1 %v3584_v59, %s3034_s3 }
 0x699   : > { %v980_v2 = vpop.xlane.xlu1 %979 }
 0x69a   : > { %2534 = vrcp.f32 %v980_v2 }
 0x69d   : > { %v1100_v7 = vpop.permute.xlu1 %1099 }
 0x69e   : > { %v1105_v9 = vsel %vm987_vm3, %v1100_v7, 0  ;;  %v2515_v7 = vld [vmem:[#allocation15 + $0x8] sm:$0xff]  }
 0x6a4   : > { %v2535_v3 = vpop.eup %2534 }
 0x6a5   : > { %v982_v4 = vmul.f32 %v2535_v3, %v2527_v47  ;;  %1217 = vrot.lane.b32.xlu0 %v3584_v59, %s3033_s29  ;;  %s2870_s29 = sshll.u32 %s3039_s2, 4  ;;  %s2871_s29 = int_to_ptr.vmem [resolvable:$false] %s2870_s29 }
 0x6a6   : > { %s2872_s3 = scalar_lea.vmem %s2871_s29, 128  ;;  %p2873_p4 = scmp.lt.s32.totalorder %s1847_s24, %s2871_s29 }
 0x6a7   : > { %v983_v8 = vpack.c.bf16 %v982_v4, %v982_v4  ;;  %v2514_v4 = vld [vmem:[#allocation15] sm:$0xff]   ;;  %p2874_p6 = scmp.lt.s32.totalorder %s2872_s3, %s2866_s17 }
 0x6a9   : > { %2269 = vmatmul.mubr.msk.bf16.vlgmr.msra.gmra.mrb[12].mxu0 %vm919_vm2, %v983_v8  ;;  %p2875_p12 = por %p2874_p6, %p2873_p4 }
 0x6aa   : > { %2279 = vmatpush3.bf16.msra.mxu0 %v1105_v9  ;;  %2280 = vmatprep.mubr.msk.bf16.mxu0 %vm3031_vm1, %v3030_v14 }
 0x6ab   : > { %2290 = vmatprep.subr.bf16.mxu0 %v3030_v14  ;;  %p2876_p0 = pnand %p2875_p12, %p2869_p10 }
 0x70c   : > { %v1094_v10 = vpop.xlane.xlu0 %1093 }
 0x70d   : > { %2536 = vrcp.f32 %v1094_v10  ;;  %v1471_v10 = vsub.s32 6, %v3552_v20 }
 0x714   : > { %v1213_v11 = vpop.xlane.xlu1 %1212 }
 0x715   : > { %2538 = vrcp.f32 %v1213_v11  ;;  %v1476_v11 = vsub.s32 7, %v3552_v20  ;;  %v2518_v20 = vld [vmem:[#allocation17 + $0x10] sm:$0xff]  }
 0x717   : > { %v2537_v12 = vpop.eup %2536 }
 0x718   : > { %v1096_v13 = vmul.f32 %v2537_v12, %v2529_v55  ;;  %v1336_v21 = vpop.permute.xlu1 %1335  ;;  %v1472_v12 = vrot.slane %v3555_v22, %v1471_v10 }
 0x719   : > { %v1341_v24 = vsel %vm987_vm3, %v1336_v21, 0  ;;  %v2516_v21 = vld [vmem:[#allocation17] sm:$0xff]  }
 0x71a   : > { %v1097_v15 = vpack.c.bf16 %v1096_v13, %v1096_v13 }
 0x71c   : > { %2281 = vmatmul.mubr.msk.bf16.vlgmr.msra.gmra.mrb[16].mxu0 %vm919_vm2, %v1097_v15  ;;  %v1331_v59 = vpop.xlane.xlu0 %1330 }
 0x71d   : > { %2540 = vrcp.f32 %v1331_v59  ;;  %2292 = vmatprep.mubr.msk.bf16.mxu0 %vm3031_vm1, %v3030_v14  ;;  %v1477_v59 = vrot.slane %v3555_v22, %v1476_v11  ;;  %v2519_v22 = vld [vmem:[#allocation17 + $0x18] sm:$0xff]  }
 0x71f   : > { %v2539_v16 = vpop.eup %2538 }
 0x720   : > { %v1215_v17 = vmul.f32 %v2539_v16, %v2531_v61  ;;  %v1218_v18 = vpop.permute.xlu0 %1217 }
 0x721   : > { %v1223_v19 = vsel %vm987_vm3, %v1218_v18, 0 }
 0x722   : > { %2291 = vmatpush3.bf16.msra.mxu0 %v1223_v19  ;;  %v1216_v23 = vpack.c.bf16 %v1215_v17, %v1215_v17 }
 0x723   : > { %2302 = vmatprep.subr.bf16.mxu0 %v3030_v14 }
 0x725   : > { %2293 = vmatmul.mubr.msk.bf16.vlgmr.msra.gmra.mrb[20].mxu0 %vm919_vm2, %v1216_v23  ;;  %v2517_v23 = vld [vmem:[#allocation17 + $0x8] sm:$0xff]  }
 0x726   : > { %2303 = vmatpush3.bf16.msra.mxu0 %v1341_v24  ;;  %2304 = vmatprep.mubr.msk.bf16.mxu0 %vm3031_vm1, %v3030_v14  ;;  %v2521_v24 = vld [vmem:[#allocation17 + $0x28] sm:$0xff]  }
 0x727   : > { %v2541_v25 = vpop.eup %2540  ;;  %2316 = vmatprep.subr.bf16.mxu0 %v3030_v14 }
 0x728   : > { %v1333_v26 = vmul.f32 %v2541_v25, %v2533_v63  ;;  %v2522_v25 = vld [vmem:[#allocation17 + $0x30] sm:$0xff]  }
 0x72a   : > { %v1334_v27 = vpack.c.bf16 %v1333_v26, %v1333_v26  ;;  %v2523_v26 = vld [vmem:[#allocation17 + $0x38] sm:$0xff]  }
 0x72d   : > { %2305 = vmatmul.mubr.msk.bf16.vlgmr.msra.gmra.mrb[24].mxu0 %vm919_vm2, %v1334_v27  ;;  %v2174_v27 = vld [vmem:[#allocation20] ss:$0 sm:$0xff] }
 0x72e   : > { %2320 = vmatprep.mubr.msk.bf16.mxu0 %vm3031_vm1, %v3030_v14  ;;  %2317 = vmatpush3.bf16.msra.mxu0 %v2514_v4 }
 0x72f   : > { %2318 = vmatprep.subr.bf16.mxu0 %v3030_v14 }
 0x732   : > { %2319 = vmatpush3.bf16.msra.mxu0 %v2515_v7 }
 0x77c   : > { %v1025_v28 = vpop.f32.mrb[12].mxu0 }
 0x77d   : > { %1031 = vst.msk [vmem:[#allocation2] sm:$0xff] %vm919_vm2, %v1025_v28  ;;  %v2270_v29 = vpop.f32.mrb[13].mxu0 }
 0x77e   : > { %v1028_v30 = vpop.f32.mrb[14].mxu0 }
 0x77f   : > { %v2271_v31 = vpop.f32.mrb[15].mxu0 }
 0x7ef   : > { %v1141_v32 = vpop.f32.mrb[16].mxu0 }
 0x7f0   : > { %1148 = vrot.lane.b32.xlu1 %v1141_v32, %s3035_s23  ;;  %v2282_v33 = vpop.f32.mrb[17].mxu0 }
 0x7f1   : > { %v1144_v34 = vpop.f32.mrb[18].mxu0 }
 0x7f2   : > { %v2283_v35 = vpop.f32.mrb[19].mxu0 }
 0x7f8   : > { %v1259_v38 = vpop.f32.mrb[20].mxu0 }
 0x7f9   : > { %1266 = vrot.lane.b32.xlu0 %v1259_v38, %s3036_s22  ;;  %v2294_v39 = vpop.f32.mrb[21].mxu0 }
 0x7fa   : > { %v1262_v40 = vpop.f32.mrb[22].mxu0 }
 0x7fb   : > { %v2295_v41 = vpop.f32.mrb[23].mxu0 }
 0x800   : > { %v1377_v42 = vpop.f32.mrb[24].mxu0 }
 0x801   : > { %1384 = vrot.lane.b32.xlu1 %v1377_v42, %s3037_s4  ;;  %v2306_v43 = vpop.f32.mrb[25].mxu0 }
 0x802   : > { %v1380_v44 = vpop.f32.mrb[26].mxu0 }
 0x803   : > { %v2307_v45 = vpop.f32.mrb[27].mxu0 }
 0x862   : > { %v1149_v46 = vpop.permute.xlu1 %1148 }
 0x863   : > { %1152 = vst.msk [vmem:[#allocation2] sm:$0xff] %vm1151_vm4, %v1149_v46 }
 0x86b   : > { %v1267_v47 = vpop.permute.xlu0 %1266 }
 0x86c   : > { %1270 = vst.msk [vmem:[#allocation2] sm:$0xff] %vm1269_vm5, %v1267_v47 }
 0x873   : > { %v1385_v48 = vpop.permute.xlu1 %1384 }
 0x874   : > { %1388 = vst.msk [vmem:[#allocation2] sm:$0xff] %vm1387_vm6, %v1385_v48 }
 0x87b   : > { %v1389_v49 = vld [vmem:[#allocation2] sm:$0xff] }
 0x87c   : > { %v1394_v50 = vpack.c.bf16 %v1389_v49, %v1389_v49 }
 0x87e   : > { %2313 = vmatmul.mubr.msk.bf16.vlgmr.msra.gmra.mrb[16].mxu1 %vm704_vm0, %v1394_v50 }
 0x87f   : > { %2340 = vmatprep.mubr.msk.bf16.mxu1 %vm3031_vm1, %v3030_v14  ;;  %2325 = vmatpush3.bf16.msra.mxu1 %v2516_v21 }
 0x880   : > { %2326 = vmatprep.subr.bf16.mxu1 %v3030_v14 }
 0x883   : > { %2327 = vmatpush3.bf16.msra.mxu1 %v2517_v23  ;;  %v1741_v23 = vrot.slane %v3532_v0, 6 }
 0x884   : > { %2328 = vmatprep.subr.bf16.mxu1 %v3030_v14 }
 0x887   : > { %2329 = vmatpush3.bf16.msra.mxu1 %v2518_v20 }
 0x888   : > { %2330 = vmatprep.subr.bf16.mxu1 %v3030_v14 }
 0x88b   : > { %2331 = vmatpush3.bf16.msra.mxu1 %v2519_v22 }
 0x88c   : > { %2332 = vmatprep.subr.bf16.mxu1 %v3030_v14 }
 0x951   : > { %v1448_v53 = vpop.f32.mrb[16].mxu1 }
 0x952   : > { %v1449_v54 = vadd.f32 %v1448_v53, %v1398_v52  ;;  %v2314_v55 = vpop.f32.mrb[17].mxu1  ;;  %v3038_v53 = vmov -1.0  }
 0x953   : > { %v1451_v56 = vpop.f32.mrb[18].mxu1 }
 0x954   : > { %v3653_v57 = vadd.f32 %v1449_v54, %v3538_v6  ;;  %v2315_v58 = vpop.f32.mrb[19].mxu1 }
 0x956   : > { %v1455_v60 = vmul.f32 %v3653_v57, %v3535_v5 }
 0x958   : > { %v1456_v61 = vsel %vm704_vm0, %v1455_v60, 0.0 }
 0x959   : > { %1457 = vadd.xlane.f32.xlu0 %v1456_v61 }
 0x9e6   : > { %v1458_v62 = vpop.xlane.xlu0 %1457 }
 0x9e7   : > { %v1459_v63 = vmul.f32 0.03125, %v1458_v62  ;;  %v2178_v62 = vld [vmem:[#allocation18 + $0x8] ss:$0 sm:$0xff] }
 0x9e9   : > { %v1460_v1 = vsub.f32 %v1455_v60, %v1459_v63 }
 0x9eb   : > { %v1461_v2 = vmul.f32 %v1460_v1, %v1460_v1 }
 0x9ed   : > { %v1462_v3 = vsel %vm704_vm0, %v1461_v2, 0.0 }
 0x9ee   : > { %1463 = vadd.xlane.f32.xlu1 %v1462_v3 }
 0xa7b   : > { %v1464_v6 = vpop.xlane.xlu1 %1463 }
 0xa7c   : > { %v1465_v8 = vmul.f32 0.03125, %v1464_v6 }
 0xa7e   : > { %v1466_v9 = vadd.f32 1e-06, %v1465_v8 }
 0xa80   : > { %2542 = vrsqrt.f32 %v1466_v9 }
 0xa8a   : > { %v2543_v13 = vpop.eup %2542 }
 0xa8b   : > { %v1468_v15 = vmul.f32 %v2543_v13, %v1460_v1 }
 0xa8d   : > { %v1473_v16 = vmul.f32 %v1472_v12, %v1468_v15 }
 0xa8f   : > { %v1478_v17 = vadd.f32 %v1477_v59, %v1473_v16 }
 0xa91   : > { %v1479_v18 = vmul.f32 %v1478_v17, %v3535_v5  ;;  %v2520_v5 = vld [vmem:[#allocation17 + $0x20] sm:$0xff]  }
 0xa92   : > { %2333 = vmatpush3.bf16.msra.mxu1 %v2520_v5 }
 0xa93   : > { %v1484_v19 = vpack.c.bf16 %v1479_v18, %v1479_v18  ;;  %2334 = vmatprep.subr.bf16.mxu1 %v3030_v14 }
 0xa95   : > { %2321 = vmatmul.mubr.msk.bf16.vlgmr.msra.gmra.mrb[28].mxu0 %vm704_vm0, %v1484_v19  ;;  %v1730_v19 = vrot.slane %v3532_v0, 5 }
 0xa96   : > { %2335 = vmatpush3.bf16.msra.mxu1 %v2521_v24 }
 0xa97   : > { %2336 = vmatprep.subr.bf16.mxu1 %v3030_v14  ;;  %v1732_v24 = vadd.f32 %v1730_v19, %v3532_v0 }
 0xa9a   : > { %2337 = vmatpush3.bf16.msra.mxu1 %v2522_v25 }
 0xa9b   : > { %2338 = vmatprep.subr.bf16.mxu1 %v3030_v14 }
 0xa9e   : > { %2339 = vmatpush3.bf16.msra.mxu1 %v2523_v26 }
 0xb68   : > { %v1540_v28 = vpop.f32.mrb[28].mxu0 }
 0xb69   : > { %v1541_v29 = vadd.f32 %v2174_v27, %v1540_v28  ;;  %v2322_v30 = vpop.f32.mrb[29].mxu0 }
 0xb6a   : > { %v1543_v31 = vpop.f32.mrb[30].mxu0 }
 0xb6b   : > { %v1547_v32 = vmul.f32 0.70710677, %v1541_v29  ;;  %v2323_v33 = vpop.f32.mrb[31].mxu0  ;;  %v1546_v56 = vmul.f32 0.5, %v1541_v29 }
 0xb6d   : > { %v1550_v34 = vand.u32 2147483647, %v1547_v32  ;;  %vm1548_vm7 = vcmp.ge.f32.partialorder %v1547_v32, 0.0 }
 0xb6e   : > { %v1549_v54 = vsel %vm1548_vm7, 1.0, %v3038_v53 }
 0xb6f   : > { %v1551_v35 = vmul.f32 0.3275911, %v1550_v34  ;;  %v1564_v37 = vsub.f32 0.0, %v1550_v34 }
 0xb71   : > { %v1552_v36 = vadd.f32 1.0, %v1551_v35  ;;  %v1565_v39 = vmul.f32 %v1564_v37, %v1550_v34 }
 0xb73   : > { %2544 = vrcp.f32 %v1552_v36  ;;  %v1566_v42 = vmul.f32 1.442695, %v1565_v39 }
 0xb75   : > { %2546 = vpow2.f32 %v1566_v42 }
 0xb7d   : > { %v2545_v38 = vpop.eup %2544 }
 0xb7e   : > { %v1555_v40 = vmul.f32 1.0614054, %v2545_v38 }
 0xb7f   : > { %v2547_v50 = vpop.eup %2546 }
 0xb80   : > { %v1556_v41 = vadd.f32 -1.4531521, %v1555_v40 }
 0xb82   : > { %v1557_v43 = vmul.f32 %v2545_v38, %v1556_v41 }
 0xb84   : > { %v1558_v44 = vadd.f32 1.4214138, %v1557_v43 }
 0xb86   : > { %v1559_v45 = vmul.f32 %v2545_v38, %v1558_v44 }
 0xb88   : > { %v1560_v46 = vadd.f32 -0.28449672, %v1559_v45 }
 0xb8a   : > { %v1561_v47 = vmul.f32 %v2545_v38, %v1560_v46 }
 0xb8c   : > { %v1562_v48 = vadd.f32 0.2548296, %v1561_v47 }
 0xb8e   : > { %v1563_v49 = vmul.f32 %v2545_v38, %v1562_v48 }
 0xb90   : > { %v1568_v51 = vmul.f32 %v2547_v50, %v1563_v49 }
 0xb92   : > { %v1569_v52 = vsub.f32 1.0, %v1568_v51 }
 0xb94   : > { %v1570_v55 = vmul.f32 %v1569_v52, %v1549_v54 }
 0xb96   : > { %v1571_v58 = vadd.f32 1.0, %v1570_v55 }
 0xb98   : > { %v1572_v60 = vmul.f32 %v1571_v58, %v1546_v56 }
 0xb9a   : > { %v1589_v61 = vpack.c.bf16 %v1572_v60, %v1572_v60 }
 0xb9c   : > { %2341 = vmatmul.mubr.bf16.vlgmr.msra.gmra.mrb[20].mxu1 %v1589_v61 }
 0xc6f   : > { %v1676_v63 = vpop.f32.mrb[20].mxu1 }
 0xc70   : > { %v1677_v1 = vadd.f32 %v2178_v62, %v1676_v63  ;;  %v2342_v2 = vpop.f32.mrb[21].mxu1 }
 0xc71   : > { %v1679_v3 = vpop.f32.mrb[22].mxu1 }
 0xc72   : > { %v3674_v4 = vadd.f32 %v1677_v1, %v3653_v57  ;;  %v2343_v7 = vpop.f32.mrb[23].mxu1 }
 0xc74   : > { %v1683_v6 = vpack.c.bf16 %v3674_v4, %v3674_v4  ;;  %v1686_v8 = vmul.f32 0.5, %v3674_v4 }
 0xc76   : > { %v1687_v9 = vadd.f32 -3.0, %v1686_v8  ;;  %1685 = vst.msk [vmem:[%s644_s12] sm:$0xf] %vm1684_vm8, %v1683_v6 }
 0xc78   : > { %v1688_v10 = vsub.f32 0.0, %v1687_v9 }
 0xc7a   : > { %v1689_v11 = vmul.f32 1.442695, %v1688_v10 }
 0xc7c   : > { %2548 = vpow2.f32 %v1689_v11 }
 0xc86   : > { %v2549_v12 = vpop.eup %2548 }
 0xc87   : > { %v1691_v13 = vadd.f32 1.0, %v2549_v12 }
 0xc89   : > { %2550 = vrcp.f32 %v1691_v13 }
 0xc93   : > { %v2551_v57 = vpop.eup %2550 }
 0xc94   : > { %1693 = vxpose.xlu0.b32.start.end [1/1] (short) (narrow) %v2551_v57, 8 }
 0xd14   : > { %v1709_v15 = vpop.trf.xlu0 }
 0xd15   : > { %v1726_v59 = vrot.slane %v1709_v15, 7  ;;  %v1806_v35 = vrot.slane %v1709_v15, 3 }
 0xd17   : > { %v1728_v16 = vadd.f32 %v1726_v59, %v3532_v0 }
 0xd19   : > { %vm1733_vm9 = vcmp.ge.f32.partialorder %v1728_v16, 0.99 }
 0xd1a   : > { %v2187_v17 = vsel %vm1733_vm9, 1.0, %v3030_v14 }
 0xd1b   : > { %v1736_v18 = vsub.f32 1.0, %v2187_v17  ;;  %v1738_v21 = vrot.slane %v2187_v17, 7 }
 0xd1d   : > { %v1749_v20 = vrot.slane %v1736_v18, 1  ;;  %v1740_v22 = vmul.f32 %v1738_v21, %v3532_v0  ;;  %v1757_v26 = vrot.slane %v1736_v18, 5 }
 0xd1f   : > { %v1751_v5 = vmul.f32 %v1749_v20, %v1709_v15  ;;  %v1743_v25 = vmul.f32 %v1741_v23, %v1740_v22  ;;  %v1809_v31 = vsel %vm1808_vm10, %v1749_v20, %v1728_v16  ;;  %v1759_v32 = vadd.f32 %v1757_v26, %v3532_v0 }
 0xd21   : > { %v1745_v27 = vrot.slane %v1743_v25, 7  ;;  %v1753_v28 = vrot.slane %v1751_v5, 6 }
 0xd23   : > { %v1747_v29 = vadd.f32 %v1745_v27, %v1732_v24  ;;  %v1755_v14 = vadd.f32 %v1753_v28, %v1740_v22  ;;  %v1756_v30 = vsub.f32 %v3532_v0, %v1753_v28 }
 0xd25   : > { %v1763_v33 = vrot.slane %v1755_v14, 2  ;;  %v1811_v34 = vsel %vm1810_vm11, %v1809_v31, %v1756_v30 }
 0xd26   : > { %v1813_v36 = vsel %vm1812_vm12, %v1811_v34, %v1747_v29 }
 0xd27   : > { %v1814_v37 = vsel %vm987_vm3, %v1813_v36, %v1759_v32  ;;  %1765 = vxpose.xlu1.b32.start.end [1/1] (short) (narrow) %v1763_v33, 8 }
 0xd28   : > { %v1816_v38 = vsel %vm1815_vm13, %v1814_v37, %v1806_v35 }
 0xd29   : > { %v1818_v39 = vsel %vm1817_vm14, %v1816_v38, 0.0 }
 0xd2a   : > { %v1820_v40 = vsel %vm1819_vm15, %v1818_v39, 0.0 }
 0xd2b   : > { %1821 = vst.msk [vmem:[%s3694_s16] sm:$0xff] %vm919_vm2, %v1820_v40 }
 0xda7   : > { %v1781_v0 = vpop.trf.xlu1 }
 0xda8   : > { %1799 = vperm.xlu0 %2505, %v1781_v0  }
 0xda9   : > { %2879 = shalt.err (!%p2876_p0)
}
 0xdaa   : > { %s2880_s9 = scalar_lea.hbm %s3704_s1, 64  ;;  %s2884_s4 = scalar_lea.hbm %s3904_s15, 128 }
 0xdab   : > { %p2881_p5 = scmp.ne.s32.totalorder %s3704_s1, %s2880_s9  ;;  %p2885_p8 = scmp.lt.u32.totalorder %s3704_s1, %s3904_s15 }
 0xdac   : > { %p2886_p1 = scmp.lt.u32.totalorder %s2884_s4, %s2880_s9  ;;  %p2888_p13 = scmp.lt.u32.totalorder %s2880_s9, %s3704_s1 }
 0xdad   : > { %p2882_p9 = pnand %p2881_p5, %p3905_p2 }
 0xdae   : > { %p2887_p11 = por %p2886_p1, %p2885_p8 }
 0xdaf   : > { %p2883_p7 = pneg %p2882_p9 }
 0xdb0   : > { %p2889_p3 = por %p2888_p13, %p2887_p11 }
 0xdb2   : > { %p2890_p10 = pnand %p2889_p3, %p2883_p7 }
 0xdb4   : > { %2893 = shalt.err (!%p2890_p10)
}
 0xdb5   : > { %2382 = dma.vmem_to_hbm [thread:$0]  (%p3905_p2), %s1847_s24, 64, %s3704_s1, %s1823_s21   ;;  %v1760_v41 = vld [vmem:[%s564_s7] sm:$0xf] }
 0xdb6   : > { %v1761_v42 = vunpack.c.l.bf16 %v1760_v41  ;;  %s651_s13 = scalar_lea.vmem [#allocation22], %s3497_s18  ;;  %s2193_s2 = sshll.u32 %s3133_s14, 7 }
 0xdb7   : > { %s1859_s17 = sshll.u32 %s651_s13, 4  ;;  %s1872_s29 = sshll.u32 %s3694_s16, 4  ;;  %s3739_s17 = int_to_ptr.vmem [resolvable:$true] %s1859_s17  ;;  %s3746_s29 = int_to_ptr.vmem [resolvable:$true] %s1872_s29 }
 0xdb8   : > { %s3906_s23 = sld [smem:[#allocation45_spill]]  ;;  %s3907_s24 = sld [smem:[#allocation46_spill]] }
 0xdb9   : > { %s3751_s16 = scalar_lea.sflag [#allocation23], %s551_s5  ;;  %s2894_s21 = scalar_lea.vmem %s3739_s17, 64 }
 0xdba   : > { %p2895_p4 = scmp.ne.s32.totalorder %s3739_s17, %s2894_s21 }
 0xdbc   : > { %p2896_p6 = pnand %p2895_p4, %p3905_p2 }
 0xdbe   : > { %s3737_s22 = scalar_lea.hbm %s3906_s23, %s2191_s27  ;;  %s3744_s18 = scalar_lea.hbm %s3907_s24, %s2193_s2 }
 0xdbf   : > { %p2897_p12 = pneg %p2896_p6  ;;  %s3040_s27 = smov [#allocation22]  }
 0xdc0   : > { %s2898_s4 = sshll.u32 %s3040_s27, 4  ;;  %s2899_s4 = int_to_ptr.vmem [resolvable:$false] %s2898_s4 }
 0xdc1   : > { %s2900_s12 = scalar_lea.vmem %s2899_s4, 128  ;;  %p2901_p0 = scmp.lt.s32.totalorder %s3739_s17, %s2899_s4 }
 0xdc2   : > { %p2902_p5 = scmp.lt.s32.totalorder %s2900_s12, %s2894_s21 }
 0xdc4   : > { %p2903_p9 = por %p2902_p5, %p2901_p0 }
 0xdc6   : > { %p2904_p7 = pnand %p2903_p9, %p2897_p12 }
 0xe27   : > { %v1800_v43 = vpop.permute.xlu0 %1799 }
 0xe28   : > { %v1802_v44 = vmul.f32 %v1800_v43, %v3674_v4 }
 0xe2a   : > { %v1803_v45 = vadd.f32 %v1802_v44, %v1761_v42 }
 0xe2c   : > { %v1804_v46 = vpack.c.bf16 %v1803_v45, %v1803_v45 }
 0xe2e   : > { %1805 = vst.msk [vmem:[%s651_s13] sm:$0xf] %vm1684_vm8, %v1804_v46 }
 0xe2f   : > { %2907 = shalt.err (!%p2904_p7)
}
 0xe30   : > { %s2908_s14 = scalar_lea.hbm %s3737_s22, 64  ;;  %s2912_s13 = scalar_lea.hbm %s3906_s23, 128 }
 0xe31   : > { %p2909_p8 = scmp.ne.s32.totalorder %s3737_s22, %s2908_s14  ;;  %p2913_p13 = scmp.lt.u32.totalorder %s3737_s22, %s3906_s23 }
 0xe32   : > { %p2914_p3 = scmp.lt.u32.totalorder %s2912_s13, %s2908_s14  ;;  %p2916_p4 = scmp.lt.u32.totalorder %s2908_s14, %s3737_s22 }
 0xe33   : > { %p2910_p1 = pnand %p2909_p8, %p3905_p2 }
 0xe34   : > { %p2915_p10 = por %p2914_p3, %p2913_p13 }
 0xe35   : > { %p2911_p11 = pneg %p2910_p1 }
 0xe36   : > { %p2917_p6 = por %p2916_p4, %p2915_p10 }
 0xe38   : > { %p2918_p12 = pnand %p2917_p6, %p2911_p11 }
 0xe3a   : > { %2921 = shalt.err (!%p2918_p12)
}
 0xe3b   : > { %2383 = dma.vmem_to_hbm [thread:$0]  (%p3905_p2), %s3739_s17, 64, %s3737_s22, %s3751_s16  }
 0xe3c   : > { %s2922_s9 = scalar_lea.vmem %s3746_s29, 128  ;;  %s3041_s7 = smov [#allocation24]  }
 0xe3d   : > { %p2923_p0 = scmp.ne.s32.totalorder %s3746_s29, %s2922_s9  ;;  %s2926_s1 = sshll.u32 %s3041_s7, 4  ;;  %s2927_s1 = int_to_ptr.vmem [resolvable:$false] %s2926_s1 }
 0xe3e   : > { %s2928_s21 = scalar_lea.vmem %s2927_s1, 256  ;;  %p2929_p7 = scmp.lt.s32.totalorder %s3746_s29, %s2927_s1 }
 0xe3f   : > { %p2924_p5 = pnand %p2923_p0, %p3905_p2  ;;  %p2930_p8 = scmp.lt.s32.totalorder %s2928_s21, %s2922_s9 }
 0xe41   : > { %p2925_p9 = pneg %p2924_p5  ;;  %p2931_p1 = por %p2930_p8, %p2929_p7 }
 0xe43   : > { %p2932_p11 = pnand %p2931_p1, %p2925_p9 }
 0xe45   : > { %2935 = shalt.err (!%p2932_p11)
}
 0xe46   : > { %s2936_s17 = scalar_lea.hbm %s3744_s18, 128  ;;  %s2940_s4 = scalar_lea.hbm %s3907_s24, 256 }
 0xe47   : > { %p2937_p13 = scmp.ne.s32.totalorder %s3744_s18, %s2936_s17  ;;  %p2941_p4 = scmp.lt.u32.totalorder %s3744_s18, %s3907_s24 }
 0xe48   : > { %p2942_p6 = scmp.lt.u32.totalorder %s2940_s4, %s2936_s17  ;;  %p2944_p0 = scmp.lt.u32.totalorder %s2936_s17, %s3744_s18 }
 0xe49   : > { %p2938_p3 = pnand %p2937_p13, %p3905_p2 }
 0xe4a   : > { %p2943_p12 = por %p2942_p6, %p2941_p4 }
 0xe4b   : > { %p2939_p10 = pneg %p2938_p3 }
 0xe4c   : > { %p2945_p5 = por %p2944_p0, %p2943_p12 }
 0xe4e   : > { %p2946_p9 = pnand %p2945_p5, %p2939_p10 }
 0xe50   : > { %2949 = shalt.err (!%p2946_p9)
}
 0xe51   : > { %2384 = dma.vmem_to_hbm [thread:$0]  (%p3905_p2), %s3746_s29, 128, %s3744_s18, %s3751_s16  }
 0xe52 PF: > { %s1884_s5 = sand.u32 1, %s3000_s25   ;;  %p3908_p7 = scmp.ne.s32.totalorder %s3880_s30, 0 }
 0xe53   : > { %p3909_p8 = scmp.ge.s32.totalorder %s3012_s28, 2  ;;  %s1885_s19 = scalar_lea.sflag [#allocation5], %s1884_s5 }
 0xe55   : > { %p2424_p1 = pnand %p3909_p8, %p3908_p7 }
 0xe57   : > { %2991 = dma.done.wait (!%p2424_p1), %s1885_s19, 64  }
 0xe58   : > { %2993 = vsyncadd (!%p2424_p1), %s1885_s19, 4294967232  ;;  %s3910_s13 = sadd.s32 4294967294, %s3012_s28  }
 0xe59   : > { %s1893_s2 = sand.u32 1, %s3910_s13  }
 0xe5a   : > { %s1894_s3 = scalar_lea.sflag [#allocation23], %s1893_s2 }
 0xe5b   : > { %2995 = dma.done.wait (!%p2424_p1), %s1894_s3, 192  }
 0xe5c   : > { %2997 = vsyncadd (!%p2424_p1), %s1894_s3, 4294967104  ;;  %s3911_s28 = sld [smem:[#allocation35_spill]]  ;;  %s3912_s20 = sld [smem:[#allocation33_spill]] }
 0xe5d   : > { %s3913_s27 = sld [smem:[#allocation36_spill]]  ;;  %s3914_s25 = smov %s3004_s26 }
 0xe62   : > { %p37_p2 = scmp.ge.s32.totalorder %s3911_s28, 4   ;;  %s3915_s26 = smov %s3912_s20 }
 0xe64   :  { %39 = sbr.rel (!%p37_p2) target bundleno = 24 (0x18), region = 197 }
 0xe6b   :  { %1908 = vsyncpa [#allocation4], 1 }
 0xe6c   :  { %1910 = vsyncpa [#allocation4 + $0x1], 1 }
 0xe6d   :  { %1911 = vsyncpa [#allocation7], 1 }
 0xe6e   :  { %1913 = vsyncpa [#allocation7 + $0x1], 1 }
 0xe6f   :  { %1914 = vsyncpa [#allocation10], 1 }
 0xe70   :  { %1915 = vsyncpa [#allocation13], 1 }
 0xe71   :  { %1916 = vsyncpa [#allocation16], 1 }
 0xe72   :  { %1917 = vsyncpa [#allocation19], 1 }
 0xe73   :  { %1918 = vsyncpa [#allocation5], 1 }
 0xe74   :  { %1920 = vsyncpa [#allocation5 + $0x1], 1 }
 0xe75   :  { %1921 = vsyncpa [#allocation23], 1 }
 0xe76   :  { %1923 = vsyncpa [#allocation23 + $0x1], 1 }

// kernel: avit_encoder_forward.5
= control target key start
LH: loop header
LB: loop body
LE: loop exit
PB: predicated region body
PF: predicated region fallthrough
CT: control target
= control target key end

     0   :  { %s3784_s0 = inlined_call_operand.hbm [shape: bf16[2,8,32], index: 0, kind: input, shape index: {}, may-alias: {0,11}]   ;;  %s3785_s1 = inlined_call_operand.hbm [shape: f32[2,8,8], index: 1, kind: input, shape index: {}, may-alias: {1,13}]   ;;  %s3786_s2 = inlined_call_operand.hbm [shape: bf16[2,8,32], index: 2, kind: input, shape index: {}, may-alias: {2,12}]   ;;  %s3787_s3 = inlined_call_operand.hbm [shape: bf16[32,32], index: 3, kind: input, shape index: {}]   ;;  %s3788_s4 = inlined_call_operand.hbm [shape: bf16[32,32], index: 4, kind: input, shape index: {}]   ;;  %s3789_s5 = inlined_call_operand.hbm [shape: bf16[32,32], index: 5, kind: input, shape index: {}]   ;;  %s3790_s6 = inlined_call_operand.hbm [shape: bf16[32,32], index: 6, kind: input, shape index: {}]   ;;  %s3791_s7 = inlined_call_operand.hbm [shape: bf16[32,128], index: 7, kind: input, shape index: {}]   ;;  %s3792_s8 = inlined_call_operand.hbm [shape: bf16[128,32], index: 8, kind: input, shape index: {}]   ;;  %s3793_s9 = inlined_call_operand.hbm [shape: f32[9,32], index: 9, kind: input, shape index: {}]   ;;  %s3794_s10 = inlined_call_operand.hbm [shape: f32[1,128], index: 10, kind: input, shape index: {}]   ;;  %s3795_s11 = inlined_call_operand.hbm [shape: bf16[2,8,32], index: 11, kind: output, shape index: {0}, may-alias: {0,11}]   ;;  %s3796_s12 = inlined_call_operand.hbm [shape: bf16[2,8,32], index: 12, kind: output, shape index: {1}, may-alias: {2,12}]   ;;  %s3797_s13 = inlined_call_operand.hbm [shape: f32[2,8,8], index: 13, kind: output, shape index: {2}, may-alias: {1,13}]  }
   0x1   :  { %3823 = sst [smem:[#allocation37_spill]] %s3785_s1 }
   0x2   :  { %3824 = sst [smem:[#allocation38_spill]] %s3786_s2 }
   0x3   :  { %3825 = sst [smem:[#allocation39_spill]] %s3787_s3 }
   0x4   :  { %3826 = sst [smem:[#allocation40_spill]] %s3788_s4 }
   0x5   :  { %3827 = sst [smem:[#allocation41_spill]] %s3789_s5 }
   0x6   :  { %3828 = sst [smem:[#allocation42_spill]] %s3791_s7 }
   0x7   :  { %3829 = sst [smem:[#allocation43_spill]] %s3793_s9 }
   0x8   :  { %3830 = sst [smem:[#allocation44_spill]] %s3795_s11 }
   0x9   :  { %3831 = sst [smem:[#allocation45_spill]] %s3796_s12 }
   0xa   :  { %3832 = sst [smem:[#allocation46_spill]] %s3797_s13 }
   0xb   :  { %19 = vsyncpa [#allocation4], 0 }
   0xc   :  { %21 = vsyncpa [#allocation4 + $0x1], 0 }
   0xd   :  { %22 = vsyncpa [#allocation7], 0 }
   0xe   :  { %24 = vsyncpa [#allocation7 + $0x1], 0 }
   0xf   :  { %25 = vsyncpa [#allocation10], 0 }
  0x10   :  { %26 = vsyncpa [#allocation13], 0 }
  0x11   :  { %27 = vsyncpa [#allocation16], 0 }
  0x12   :  { %28 = vsyncpa [#allocation19], 0 }
  0x13   :  { %29 = vsyncpa [#allocation5], 0 }
  0x14   :  { %31 = vsyncpa [#allocation5 + $0x1], 0 }
  0x15   :  { %32 = vsyncpa [#allocation23], 0 }
  0x16   :  { %34 = vsyncpa [#allocation23 + $0x1], 0  ;;  %s3063_s25 = smov 0   ;;  %s3065_s26 = smov 0  }
  0x17   :  { %s3067_s27 = smov 0   ;;  %s3069_s28 = smov 0  }
  0x18 LB: > { %3833 = sst [smem:[#allocation33_spill]] %s2959_s27  ;;  %s2965_s29 = smov [#allocation9]   ;;  %s2963_s28 = sphi %s3069_s28, %s3878_s28   ;;  %s2959_s27 = sphi %s3067_s27, %s3880_s27   ;;  %s2955_s26 = sphi %s3065_s26, %s3882_s26   ;;  %s2951_s25 = sphi %s3063_s25, %s3881_s25  }
  0x19   : > { %s381_s30 = sshll.u32 %s2965_s29, 4  ;;  %s3084_s14 = sadd.s32 4294967295, %s2963_s28   ;;  %s3089_s30 = int_to_ptr.vmem [resolvable:$true] %s381_s30 }
  0x1a   : > { %p2077_p0 = scmp.ge.s32.totalorder %s2963_s28, 1  ;;  %p3803_p1 = scmp.eq.s32.totalorder %s3084_s14, 0 }
  0x1b   : > { %p369_p2 = scmp.lt.s32.totalorder %s2963_s28, 3  ;;  %s2966_s16 = smov [#allocation12]  }
  0x1c   : > { %s407_s17 = sshll.u32 %s2966_s16, 4  ;;  %s2967_s19 = smov [#allocation15]   ;;  %s3104_s17 = int_to_ptr.vmem [resolvable:$true] %s407_s17 }
  0x1d   : > { %p3091_p3 = pnand %p2077_p0, %p369_p2  ;;  %s433_s20 = sshll.u32 %s2967_s19, 4  ;;  %s3106_s20 = int_to_ptr.vmem [resolvable:$true] %s433_s20 }
  0x1e   : > { %s3837_s3 = sld [smem:[#allocation39_spill]] }
  0x1f   : > { %s3834_s15 = scalar_select %p3091_p3, 1, 0 }
  0x20   : > { %p2342_p5 = pneg %p3091_p3 }
  0x21   : > { %3835 = sst [smem:[#allocation34_spill]] %s3834_s15 }
  0x22   : > { %p3100_p6 = pnand %p2342_p5, %p3803_p1 }
  0x24   : > { %s3836_s18 = scalar_select %p3100_p6, 1, 0 }
  0x25   : > { %s2503_s23 = scalar_lea.hbm %s3837_s3, 256  ;;  %p3116_p8 = pneg %p3100_p6 }
  0x26   : > { %p2504_p7 = scmp.ne.s32.totalorder %s3837_s3, %s2503_s23  ;;  %p2510_p11 = scmp.lt.u32.totalorder %s2503_s23, %s3837_s3 }
  0x27   : > { %s3838_s16 = scalar_select %p3116_p8, 1, 0 }
  0x28   : > { %p2506_p9 = pnand %p3116_p8, %p2504_p7 }
  0x2a   : > { %p2507_p10 = pneg %p2506_p9 }
  0x2c   : > { %p2512_p12 = pnand %p2510_p11, %p2507_p10 }
  0x2e   : > { %2515 = shalt.err (!%p2512_p12)
}
  0x2f   : > { %s2516_s21 = scalar_lea.vmem %s3089_s30, 256  ;;  %p2524_p5 = scmp.lt.s32.totalorder %s3089_s30, %s3089_s30 }
  0x30   : > { %p2517_p13 = scmp.ne.s32.totalorder %s3089_s30, %s2516_s21  ;;  %p2525_p4 = scmp.lt.s32.totalorder %s2516_s21, %s2516_s21 }
  0x32   : > { %p2519_p0 = pnand %p2517_p13, %p3116_p8  ;;  %p2526_p7 = por %p2525_p4, %p2524_p5 }
  0x34   : > { %p2520_p2 = pneg %p2519_p0 }
  0x36   : > { %p2527_p9 = pnand %p2526_p7, %p2520_p2 }
  0x38   : > { %2530 = shalt.err (!%p2527_p9)
}
  0x39   : > { %s3806_s22 = smov 64   ;;  %s3808_s13 = smov 4  }
  0x3a   : > { %2345 = dma.hbm_to_vmem [thread:$0]  (!%p3100_p6), %s3837_s3, 256, %s3089_s30, [#allocation10], %s3806_s22, %s3806_s22, %s3808_s13  }
  0x3b   : > { %s3839_s5 = sld [smem:[#allocation41_spill]] }
  0x41   : > { %s2531_s21 = scalar_lea.hbm %s3839_s5, 256 }
  0x42   : > { %p2532_p4 = scmp.ne.s32.totalorder %s3839_s5, %s2531_s21  ;;  %p2538_p12 = scmp.lt.u32.totalorder %s2531_s21, %s3839_s5 }
  0x44   : > { %p2534_p10 = pnand %p2532_p4, %p3116_p8 }
  0x46   : > { %p2535_p11 = pneg %p2534_p10 }
  0x48   : > { %p2540_p13 = pnand %p2538_p12, %p2535_p11 }
  0x4a   : > { %2543 = shalt.err (!%p2540_p13)
}
  0x4b   : > { %s2544_s30 = scalar_lea.vmem %s3104_s17, 256  ;;  %p2552_p7 = scmp.lt.s32.totalorder %s3104_s17, %s3104_s17 }
  0x4c   : > { %p2545_p0 = scmp.ne.s32.totalorder %s3104_s17, %s2544_s30  ;;  %p2553_p9 = scmp.lt.s32.totalorder %s2544_s30, %s2544_s30 }
  0x4e   : > { %p2547_p2 = pnand %p2545_p0, %p3116_p8  ;;  %p2554_p4 = por %p2553_p9, %p2552_p7 }
  0x50   : > { %p2548_p5 = pneg %p2547_p2 }
  0x52   : > { %p2555_p10 = pnand %p2554_p4, %p2548_p5 }
  0x54   : > { %2558 = shalt.err (!%p2555_p10)
}
  0x55   : > { %2351 = dma.hbm_to_vmem [thread:$0]  (!%p3100_p6), %s3839_s5, 256, %s3104_s17, [#allocation13], %s3806_s22, %s3806_s22, %s3808_s13  }
  0x56   : > { %s3840_s7 = sld [smem:[#allocation42_spill]] }
  0x5c   : > { %s2559_s23 = scalar_lea.hbm %s3840_s7, 256 }
  0x5d   : > { %p2560_p11 = scmp.ne.s32.totalorder %s3840_s7, %s2559_s23  ;;  %p2566_p0 = scmp.lt.u32.totalorder %s2559_s23, %s3840_s7 }
  0x5f   : > { %p2562_p12 = pnand %p2560_p11, %p3116_p8 }
  0x61   : > { %p2563_p13 = pneg %p2562_p12 }
  0x63   : > { %p2568_p2 = pnand %p2566_p0, %p2563_p13 }
  0x65   : > { %2571 = shalt.err (!%p2568_p2)
}
  0x66   : > { %s2572_s17 = scalar_lea.vmem %s3106_s20, 256  ;;  %p2580_p4 = scmp.lt.s32.totalorder %s3106_s20, %s3106_s20 }
  0x67   : > { %p2573_p5 = scmp.ne.s32.totalorder %s3106_s20, %s2572_s17  ;;  %p2581_p10 = scmp.lt.s32.totalorder %s2572_s17, %s2572_s17 }
  0x69   : > { %p2575_p7 = pnand %p2573_p5, %p3116_p8  ;;  %p2582_p11 = por %p2581_p10, %p2580_p4 }
  0x6b   : > { %p2576_p9 = pneg %p2575_p7 }
  0x6d   : > { %p2583_p12 = pnand %p2582_p11, %p2576_p9 }
  0x6f   : > { %2586 = shalt.err (!%p2583_p12)
}
  0x70   : > { %2357 = dma.hbm_to_vmem [thread:$0]  (!%p3100_p6), %s3840_s7, 256, %s3106_s20, [#allocation16], %s3806_s22, %s3806_s22, %s3808_s13  }
  0x71   : > { %s2970_s11 = smov [#allocation18]   ;;  %s3841_s9 = sld [smem:[#allocation43_spill]] }
  0x72   : > { %s459_s12 = sshll.u32 %s2970_s11, 4  ;;  %s460_s12 = int_to_ptr.vmem [resolvable:$true] %s459_s12 }
  0x77   : > { %s2587_s24 = scalar_lea.hbm %s3841_s9, 256 }
  0x78   : > { %p2588_p13 = scmp.ne.s32.totalorder %s3841_s9, %s2587_s24  ;;  %p2594_p5 = scmp.lt.u32.totalorder %s2587_s24, %s3841_s9 }
  0x7a   : > { %p2590_p0 = pnand %p2588_p13, %p3116_p8 }
  0x7c   : > { %p2591_p2 = pneg %p2590_p0 }
  0x7e   : > { %p2596_p7 = pnand %p2594_p5, %p2591_p2 }
  0x80   : > { %2599 = shalt.err (!%p2596_p7)
}
  0x81   : > { %s2600_s20 = scalar_lea.vmem %s460_s12, 256  ;;  %p2608_p11 = scmp.lt.s32.totalorder %s460_s12, %s460_s12 }
  0x82   : > { %p2601_p9 = scmp.ne.s32.totalorder %s460_s12, %s2600_s20  ;;  %p2609_p12 = scmp.lt.s32.totalorder %s2600_s20, %s2600_s20 }
  0x84   : > { %p2603_p4 = pnand %p2601_p9, %p3116_p8  ;;  %p2610_p1 = por %p2609_p12, %p2608_p11 }
  0x86   : > { %p2604_p10 = pneg %p2603_p4 }
  0x88   : > { %p2611_p3 = pnand %p2610_p1, %p2604_p10 }
  0x8a   : > { %2614 = shalt.err (!%p2611_p3)
}
  0x8b   : > { %s2971_s30 = smov 128   ;;  %s2972_s2 = smov 8  }
  0x8c   : > { %2363 = dma.hbm_to_vmem [thread:$0]  (!%p3100_p6), %s3841_s9, 256, %s460_s12, [#allocation19], %s2971_s30, %s2971_s30, %s2972_s2  }
  0x8d   : > { %s3805_s23 = sadd.s32 4294967294, %s2963_s28   ;;  %s3212_s24 = sadd.s32 1, %s2963_s28  }
  0x8e   : > { %3842 = sst [smem:[#allocation35_spill]] %s3212_s24  ;;  %s44_s29 = ssub.s32 %s2963_s28, %s3212_s24 }
  0x8f   : > { %s47_s19 = sadd.s32 1, %s2959_s27  ;;  %p45_p1 = scmp.eq.s32.totalorder %s44_s29, 0 }
  0x90   : > { %p54_p3 = scmp.ne.s32.totalorder %s2959_s27, %s2955_s26  ;;  %p55_p13 = scmp.eq.s32.totalorder %s2963_s28, 0 }
  0x91   : > { %p60_p0 = scmp.ne.s32.totalorder %s2955_s26, %s2951_s25  ;;  %p3844_p5 = scmp.eq.s32.totalorder %s3084_s14, 0 }
  0x92   : > { %s3223_s21 = scalar_select %p45_p1, %s2959_s27, %s47_s19  }
  0x93   : > { %p56_p2 = por %p55_p13, %p54_p3  ;;  %p3227_p7 = por %p3844_p5, %p60_p0 }
  0x94   : > { %3843 = sst [smem:[#allocation36_spill]] %s3223_s21  ;;  %p304_p9 = scmp.eq.s32.totalorder %s3084_s14, 1 }
  0x95   : > { %s3845_s17 = scalar_select %p3227_p7, 1, 0 }
  0x96   : > { %p310_p4 = scmp.eq.s32.totalorder %s3805_s23, 1  ;;  %p2395_p10 = scmp.lt.s32.totalorder %s2963_s28, 2 }
  0x97   : > { %s3236_s12 = sand.u32 1, %s2959_s27   ;;  %p3238_p11 = por %p304_p9, %p54_p3 }
  0x98   : > { %p3242_p12 = por %p310_p4, %p60_p0  ;;  %p3246_p1 = pnand %p2395_p10, %p56_p2 }
  0x99   : > { %s3846_s20 = scalar_select %p3238_p11, 1, 0 }
  0x9a   : > { %s3847_s30 = scalar_select %p3242_p12, 1, 0 }
  0x9b   : > { %s3848_s2 = scalar_select %p3246_p1, 1, 0 }
  0x9c   : > { %s502_s11 = sand.u32 1, %s2963_s28   ;;  %s2089_s15 = sshll.u32 %s3236_s12, 3 }
  0x9d   : > { %s2090_s29 = sshll.u32 %s2963_s28, 7  ;;  %s506_s19 = scalar_lea.vmem [#allocation6], %s2089_s15 }
  0x9e   : > { %s513_s23 = sshll.u32 %s506_s19, 4  ;;  %s3849_s1 = sld [smem:[#allocation37_spill]]  ;;  %s3258_s23 = int_to_ptr.vmem [resolvable:$true] %s513_s23 }
  0x9f   : > { %s3260_s5 = scalar_lea.sflag [#allocation7], %s502_s11  ;;  %p3266_p13 = pneg %p3246_p1 }
  0xa1   : > { %s3850_s9 = scalar_select %p3266_p13, 1, 0 }
  0xa4   : > { %s3256_s3 = scalar_lea.hbm %s3849_s1, %s2090_s29  ;;  %s2620_s15 = scalar_lea.hbm %s3849_s1, 256 }
  0xa5   : > { %s2615_s7 = scalar_lea.hbm %s3256_s3, 128  ;;  %p2621_p5 = scmp.lt.u32.totalorder %s3256_s3, %s3849_s1 }
  0xa6   : > { %p2616_p3 = scmp.ne.s32.totalorder %s3256_s3, %s2615_s7  ;;  %p2622_p9 = scmp.lt.u32.totalorder %s2620_s15, %s2615_s7 }
  0xa7   : > { %p2624_p10 = scmp.lt.u32.totalorder %s2615_s7, %s3256_s3 }
  0xa8   : > { %p2618_p0 = pnand %p3266_p13, %p2616_p3  ;;  %p2623_p4 = por %p2622_p9, %p2621_p5 }
  0xaa   : > { %p2619_p2 = pneg %p2618_p0  ;;  %p2625_p12 = por %p2624_p10, %p2623_p4 }
  0xac   : > { %p2626_p11 = pnand %p2625_p12, %p2619_p2 }
  0xae   : > { %2629 = shalt.err (!%p2626_p11)
}
  0xaf   : > { %s2630_s11 = scalar_lea.vmem %s3258_s23, 128  ;;  %s2973_s22 = smov [#allocation6]  }
  0xb0   : > { %p2631_p3 = scmp.ne.s32.totalorder %s3258_s23, %s2630_s11  ;;  %s2635_s13 = sshll.u32 %s2973_s22, 4  ;;  %s2636_s13 = int_to_ptr.vmem [resolvable:$false] %s2635_s13 }
  0xb1   : > { %s2637_s29 = scalar_lea.vmem %s2636_s13, 256  ;;  %p2638_p6 = scmp.lt.s32.totalorder %s3258_s23, %s2636_s13 }
  0xb2   : > { %p2633_p0 = pnand %p2631_p3, %p3266_p13  ;;  %p2639_p8 = scmp.lt.s32.totalorder %s2637_s29, %s2630_s11 }
  0xb4   : > { %p2634_p7 = pneg %p2633_p0  ;;  %p2640_p5 = por %p2639_p8, %p2638_p6 }
  0xb6   : > { %p2641_p9 = pnand %p2640_p5, %p2634_p7 }
  0xb8   : > { %2644 = shalt.err (!%p2641_p9)
}
  0xb9   : > { %2373 = dma.hbm_to_vmem [thread:$0]  (!%p3246_p1), %s3256_s3, 128, %s3258_s23, %s3260_s5  }
  0xba   : > { %s2974_s7 = smov [#allocation11]   ;;  %s2975_s19 = smov [#allocation14]  }
  0xbb   : > { %s394_s15 = sshll.u32 %s2974_s7, 4  ;;  %s420_s1 = sshll.u32 %s2975_s19, 4  ;;  %s395_s15 = int_to_ptr.vmem [resolvable:$true] %s394_s15  ;;  %s3290_s1 = int_to_ptr.vmem [resolvable:$true] %s420_s1 }
  0xbc   : > { %s3851_s4 = sld [smem:[#allocation40_spill]]  ;;  %p3852_p8 = scmp.ne.s32.totalorder %s3838_s16, 0 }
  0xc2   : > { %s2645_s11 = scalar_lea.hbm %s3851_s4, 256 }
  0xc3   : > { %p2646_p6 = scmp.ne.s32.totalorder %s3851_s4, %s2645_s11  ;;  %p2652_p12 = scmp.lt.u32.totalorder %s2645_s11, %s3851_s4 }
  0xc5   : > { %p2648_p7 = pnand %p2646_p6, %p3852_p8 }
  0xc7   : > { %p2649_p11 = pneg %p2648_p7 }
  0xc9   : > { %p2654_p2 = pnand %p2652_p12, %p2649_p11 }
  0xcb   : > { %2657 = shalt.err (!%p2654_p2)
}
  0xcc   : > { %s2658_s23 = scalar_lea.vmem %s395_s15, 256  ;;  %p2666_p0 = scmp.lt.s32.totalorder %s395_s15, %s395_s15 }
  0xcd   : > { %p2659_p4 = scmp.ne.s32.totalorder %s395_s15, %s2658_s23  ;;  %p2667_p5 = scmp.lt.s32.totalorder %s2658_s23, %s2658_s23 }
  0xcf   : > { %p2661_p10 = pnand %p2659_p4, %p3852_p8  ;;  %p2668_p9 = por %p2667_p5, %p2666_p0 }
  0xd1   : > { %p2662_p3 = pneg %p2661_p10 }
  0xd3   : > { %p2669_p1 = pnand %p2668_p9, %p2662_p3 }
  0xd5   : > { %2672 = shalt.err (!%p2669_p1)
}
  0xd6   : > { %p3853_p6 = scmp.ne.s32.totalorder %s3836_s18, 0  ;;  %s3854_s21 = smov 4  }
  0xd7   : > { %s3855_s7 = smov 64   ;;  %s2673_s11 = scalar_lea.hbm %s3790_s6, 256 }
  0xd8   : > { %2348 = dma.hbm_to_vmem [thread:$0]  (!%p3853_p6), %s3851_s4, 256, %s395_s15, [#allocation10], %s3855_s7, %s3855_s7, %s3854_s21  }
  0xd9   : > { %p2674_p7 = scmp.ne.s32.totalorder %s3790_s6, %s2673_s11  ;;  %p2680_p12 = scmp.lt.u32.totalorder %s2673_s11, %s3790_s6 }
  0xdb   : > { %p2676_p1 = pnand %p2674_p7, %p3852_p8 }
  0xdd   : > { %p2677_p11 = pneg %p2676_p1 }
  0xdf   : > { %p2682_p2 = pnand %p2680_p12, %p2677_p11 }
  0xe1   : > { %2685 = shalt.err (!%p2682_p2)
}
  0xe2   : > { %s2686_s15 = scalar_lea.vmem %s3290_s1, 256  ;;  %p2694_p0 = scmp.lt.s32.totalorder %s3290_s1, %s3290_s1 }
  0xe3   : > { %p2687_p4 = scmp.ne.s32.totalorder %s3290_s1, %s2686_s15  ;;  %p2695_p5 = scmp.lt.s32.totalorder %s2686_s15, %s2686_s15 }
  0xe5   : > { %p2689_p10 = pnand %p2687_p4, %p3852_p8  ;;  %p2696_p9 = por %p2695_p5, %p2694_p0 }
  0xe7   : > { %p2690_p3 = pneg %p2689_p10 }
  0xe9   : > { %p2697_p7 = pnand %p2696_p9, %p2690_p3 }
  0xeb   : > { %2700 = shalt.err (!%p2697_p7)
}
  0xec   : > { %2354 = dma.hbm_to_vmem [thread:$0]  (!%p3853_p6), %s3790_s6, 256, %s3290_s1, [#allocation13], %s3855_s7, %s3855_s7, %s3854_s21  }
  0xed   : > { %s2976_s19 = smov [#allocation17]   ;;  %s2977_s13 = smov [#allocation20]  }
  0xee   : > { %s446_s22 = sshll.u32 %s2976_s19, 4  ;;  %s473_s11 = sshll.u32 %s2977_s13, 4  ;;  %s447_s22 = int_to_ptr.vmem [resolvable:$true] %s446_s22  ;;  %s3339_s11 = int_to_ptr.vmem [resolvable:$true] %s473_s11 }
  0xef   : > { %s2701_s23 = scalar_lea.hbm %s3792_s8, 1024 }
  0xf0   : > { %p2702_p1 = scmp.ne.s32.totalorder %s3792_s8, %s2701_s23  ;;  %p2708_p2 = scmp.lt.u32.totalorder %s2701_s23, %s3792_s8 }
  0xf2   : > { %p2704_p11 = pnand %p2702_p1, %p3852_p8 }
  0xf4   : > { %p2705_p12 = pneg %p2704_p11 }
  0xf6   : > { %p2710_p4 = pnand %p2708_p2, %p2705_p12 }
  0xf8   : > { %2713 = shalt.err (!%p2710_p4)
}
  0xf9   : > { %s2714_s27 = scalar_lea.vmem %s447_s22, 1024  ;;  %p2722_p5 = scmp.lt.s32.totalorder %s447_s22, %s447_s22 }
  0xfa   : > { %p2715_p10 = scmp.ne.s32.totalorder %s447_s22, %s2714_s27  ;;  %p2723_p9 = scmp.lt.s32.totalorder %s2714_s27, %s2714_s27 }
  0xfc   : > { %p2717_p3 = pnand %p2715_p10, %p3852_p8  ;;  %p2724_p7 = por %p2723_p9, %p2722_p5 }
  0xfe   : > { %p2718_p0 = pneg %p2717_p3 }
 0x100   : > { %p2725_p13 = pnand %p2724_p7, %p2718_p0 }
 0x102   : > { %2728 = shalt.err (!%p2725_p13)
}
 0x103   : > { %2360 = dma.hbm_to_vmem [thread:$0]  (!%p3853_p6), %s3792_s8, 1024, %s447_s22, [#allocation16], %s3855_s7, %s3855_s7, %s3854_s21  }
 0x104   : > { %s2729_s3 = scalar_lea.hbm %s3794_s10, 16 }
 0x105   : > { %p2730_p1 = scmp.ne.s32.totalorder %s3794_s10, %s2729_s3  ;;  %p2736_p12 = scmp.lt.u32.totalorder %s2729_s3, %s3794_s10 }
 0x107   : > { %p2732_p13 = pnand %p2730_p1, %p3852_p8 }
 0x109   : > { %p2733_p11 = pneg %p2732_p13 }
 0x10b   : > { %p2738_p2 = pnand %p2736_p12, %p2733_p11 }
 0x10d   : > { %2741 = shalt.err (!%p2738_p2)
}
 0x10e   : > { %s2742_s21 = scalar_lea.vmem %s3339_s11, 16  ;;  %s2749_s7 = scalar_lea.vmem %s3339_s11, 32 }
 0x10f   : > { %p2743_p4 = scmp.ne.s32.totalorder %s3339_s11, %s2742_s21  ;;  %p2750_p0 = scmp.lt.s32.totalorder %s3339_s11, %s3339_s11 }
 0x110   : > { %p2751_p5 = scmp.lt.s32.totalorder %s2749_s7, %s2742_s21 }
 0x111   : > { %p2745_p10 = pnand %p2743_p4, %p3852_p8 }
 0x112   : > { %p2752_p9 = por %p2751_p5, %p2750_p0 }
 0x113   : > { %p2746_p3 = pneg %p2745_p10 }
 0x115   : > { %p2753_p7 = pnand %p2752_p9, %p2746_p3 }
 0x117   : > { %2756 = shalt.err (!%p2753_p7)
}
 0x118   : > { %2366 = dma.hbm_to_vmem [thread:$0]  (!%p3853_p6), %s3794_s10, 16, %s3339_s11, [#allocation19]  }
 0x119   : > { %s2087_s16 = sshll.u32 %s3236_s12, 2  ;;  %s2088_s4 = sshll.u32 %s2963_s28, 6 }
 0x11a   : > { %s3393_s29 = scalar_lea.hbm %s3784_s0, %s2088_s4  ;;  %s488_s18 = scalar_lea.vmem [#allocation3], %s2087_s16 }
 0x11b   : > { %s495_s3 = sshll.u32 %s488_s18, 4  ;;  %s485_s23 = scalar_lea.sflag [#allocation4], %s3236_s12  ;;  %s496_s3 = int_to_ptr.vmem [resolvable:$true] %s495_s3 }
 0x11c   : > { %s2757_s15 = scalar_lea.hbm %s3393_s29, 64  ;;  %p3856_p6 = scmp.ne.s32.totalorder %s3850_s9, 0 }
 0x11d   : > { %p2758_p8 = scmp.ne.s32.totalorder %s3393_s29, %s2757_s15  ;;  %s2762_s1 = scalar_lea.hbm %s3784_s0, 128 }
 0x11e   : > { %p2763_p11 = scmp.lt.u32.totalorder %s3393_s29, %s3784_s0  ;;  %p2764_p12 = scmp.lt.u32.totalorder %s2762_s1, %s2757_s15 }
 0x11f   : > { %p2760_p1 = pnand %p2758_p8, %p3856_p6  ;;  %p2766_p4 = scmp.lt.u32.totalorder %s2757_s15, %s3393_s29 }
 0x120   : > { %p2765_p2 = por %p2764_p12, %p2763_p11 }
 0x121   : > { %p2761_p13 = pneg %p2760_p1 }
 0x122   : > { %p2767_p10 = por %p2766_p4, %p2765_p2 }
 0x124   : > { %p2768_p3 = pnand %p2767_p10, %p2761_p13 }
 0x126   : > { %2771 = shalt.err (!%p2768_p3)
}
 0x127   : > { %s2772_s22 = scalar_lea.vmem %s496_s3, 64  ;;  %s2978_s27 = smov [#allocation3]  }
 0x128   : > { %p2773_p0 = scmp.ne.s32.totalorder %s496_s3, %s2772_s22  ;;  %s2777_s19 = sshll.u32 %s2978_s27, 4  ;;  %s2778_s19 = int_to_ptr.vmem [resolvable:$false] %s2777_s19 }
 0x129   : > { %s2779_s13 = scalar_lea.vmem %s2778_s19, 128  ;;  %p2780_p7 = scmp.lt.s32.totalorder %s496_s3, %s2778_s19 }
 0x12a   : > { %p2775_p5 = pnand %p2773_p0, %p3856_p6  ;;  %p2781_p8 = scmp.lt.s32.totalorder %s2779_s13, %s2772_s22 }
 0x12c   : > { %p2776_p9 = pneg %p2775_p5  ;;  %p2782_p1 = por %p2781_p8, %p2780_p7 }
 0x12e   : > { %p2783_p11 = pnand %p2782_p1, %p2776_p9 }
 0x130   : > { %2786 = shalt.err (!%p2783_p11)
}
 0x131   : > { %p3857_p12 = scmp.ne.s32.totalorder %s3848_s2, 0  ;;  %s3858_s11 = sld [smem:[#allocation38_spill]] }
 0x132   : > { %s524_s1 = scalar_lea.vmem [#allocation8], %s2087_s16 }
 0x133   : > { %2370 = dma.hbm_to_vmem [thread:$0]  (!%p3857_p12), %s3393_s29, 64, %s496_s3, %s485_s23  }
 0x134   : > { %s531_s21 = sshll.u32 %s524_s1, 4  ;;  %s532_s21 = int_to_ptr.vmem [resolvable:$true] %s531_s21 }
 0x137   : > { %s3420_s24 = scalar_lea.hbm %s3858_s11, %s2088_s4  ;;  %s2792_s23 = scalar_lea.hbm %s3858_s11, 128 }
 0x138   : > { %s2787_s7 = scalar_lea.hbm %s3420_s24, 64  ;;  %p2793_p10 = scmp.lt.u32.totalorder %s3420_s24, %s3858_s11 }
 0x139   : > { %p2788_p13 = scmp.ne.s32.totalorder %s3420_s24, %s2787_s7  ;;  %p2794_p3 = scmp.lt.u32.totalorder %s2792_s23, %s2787_s7 }
 0x13a   : > { %p2796_p5 = scmp.lt.u32.totalorder %s2787_s7, %s3420_s24 }
 0x13b   : > { %p2790_p2 = pnand %p2788_p13, %p3856_p6  ;;  %p2795_p0 = por %p2794_p3, %p2793_p10 }
 0x13d   : > { %p2791_p4 = pneg %p2790_p2  ;;  %p2797_p9 = por %p2796_p5, %p2795_p0 }
 0x13f   : > { %p2798_p7 = pnand %p2797_p9, %p2791_p4 }
 0x141   : > { %2801 = shalt.err (!%p2798_p7)
}
 0x142   : > { %s2802_s12 = scalar_lea.vmem %s532_s21, 64  ;;  %s2979_s16 = smov [#allocation8]  }
 0x143   : > { %p2803_p8 = scmp.ne.s32.totalorder %s532_s21, %s2802_s12  ;;  %s2807_s27 = sshll.u32 %s2979_s16, 4  ;;  %s2808_s27 = int_to_ptr.vmem [resolvable:$false] %s2807_s27 }
 0x144   : > { %s2809_s19 = scalar_lea.vmem %s2808_s27, 128  ;;  %p2810_p13 = scmp.lt.s32.totalorder %s532_s21, %s2808_s27 }
 0x145   : > { %p2805_p1 = pnand %p2803_p8, %p3856_p6  ;;  %p2811_p2 = scmp.lt.s32.totalorder %s2809_s19, %s2802_s12 }
 0x147   : > { %p2806_p11 = pneg %p2805_p1  ;;  %p2812_p12 = por %p2811_p2, %p2810_p13 }
 0x149   : > { %p2813_p3 = pnand %p2812_p12, %p2806_p11 }
 0x14b   : > { %2816 = shalt.err (!%p2813_p3)
}
 0x14c   : > { %p3859_p10 = scmp.ne.s32.totalorder %s3848_s2, 0  ;;  %s3860_s13 = sld [smem:[#allocation34_spill]] }
 0x14e   : > { %2376 = dma.hbm_to_vmem [thread:$0]  (!%p3859_p10), %s3420_s24, 64, %s532_s21, %s3260_s5  }
 0x152   : > { %p3861_p4 = scmp.ne.s32.totalorder %s3860_s13, 0 }
 0x153   : > { %s3445_s9 = sand.u32 (!%p3861_p4), 1, %s2955_s26   ;;  %p3862_p6 = scmp.ne.s32.totalorder (!%p3861_p4), %s3845_s17, 0 }
 0x154   : > { %540 = sbr.rel (%p3861_p4) target bundleno = 3251 (0xcb3), region = 64  ;;  %s3448_s18 = sshll.u32 (!%p3861_p4), %s3445_s9, 2 }
 0x155   : > { %s543_s15 = scalar_lea.sflag (!%p3861_p4), [#allocation4], %s3445_s9  ;;  %s546_s1 = scalar_lea.vmem (!%p3861_p4), [#allocation3], %s3448_s18 }
 0x15b   : > { %2918 = dma.done.wait (%p3862_p6), %s543_s15, 64  }
 0x15c   : > { %2920 = vsyncadd (%p3862_p6), %s543_s15, 4294967232  ;;  %s551_s5 = sand.u32 1, %s3084_s14   ;;  %s2095_s2 = sshll.u32 %s3445_s9, 3 }
 0x15d   : > { %s552_s24 = scalar_lea.sflag [#allocation7], %s551_s5  ;;  %s555_s21 = scalar_lea.vmem [#allocation6], %s2095_s2 }
 0x15e   : > { %2922 = dma.done.wait (%p3862_p6), %s552_s24, 192  }
 0x15f   : > { %2924 = vsyncadd (%p3862_p6), %s552_s24, 4294967104  ;;  %s564_s7 = scalar_lea.vmem [#allocation8], %s3448_s18  ;;  %p3863_p12 = scmp.eq.s32.totalorder %s3084_s14, 0 }
 0x161   : > { %2926 = dma.done.wait (%p3863_p12), [#allocation10], 512   ;;  %p3864_p0 = pmov %p3863_p12 }
 0x163   : > { %2928 = vsyncadd (%p3864_p0), [#allocation10], 4294966784  ;;  %p3865_p5 = pmov %p3864_p0 }
 0x164   : > { %p3866_p9 = pmov %p3864_p0 }
 0x165   : > { %2930 = dma.done.wait (%p3865_p5), [#allocation13], 512  }
 0x166   : > { %2932 = vsyncadd (%p3866_p9), [#allocation13], 4294966784  ;;  %p3867_p7 = pmov %p3864_p0 }
 0x167   : > { %p3868_p8 = pmov %p3864_p0 }
 0x168   : > { %2934 = dma.done.wait (%p3867_p7), [#allocation16], 1280  }
 0x169   : > { %2936 = vsyncadd (%p3868_p8), [#allocation16], 4294966016  ;;  %p3869_p1 = pmov %p3864_p0 }
 0x16a   : > { %p3870_p11 = pmov %p3864_p0 }
 0x16b   : > { %2938 = dma.done.wait (%p3869_p1), [#allocation19], 272  }
 0x16c   : > { %2940 = vsyncadd (%p3870_p11), [#allocation19], 4294967024  ;;  %v2980_v0 = vmov 0   ;;  %v3483_v1 = vld [vmem:[%s555_s21] sm:$0xff]  ;;  %v696_v3 = vld [vmem:[%s546_s1] sm:$0xf]  ;;  %v719_v18 = vlaneseq }
 0x16d   : > { %2460 = vset.pattern.permute.xlu1 %v2980_v0  ;;  %661 = vxpose.xlu0.b32.start.end [1/1] (short) (narrow) %v3483_v1, 8  ;;  %v697_v4 = vunpack.c.l.bf16 %v696_v3  ;;  %vm704_vm0 = vcmask 261120   ;;  %v2461_v13 = vld [vmem:[#allocation9] sm:$0xff]   ;;  %v2981_v14 = vmov 0.0   ;;  %vm2982_vm1 = vmmov 0   ;;  %v2462_v15 = vld [vmem:[#allocation9 + $0x8] sm:$0xff]  }
 0x16e   : > { %2190 = vmatprep.subr.bf16.mxu0 %v2981_v14  ;;  %2194 = vmatprep.mubr.msk.bf16.mxu0 %vm2982_vm1, %v2981_v14  ;;  %v3503_v20 = vshrl.u32 %v719_v18, 7  ;;  %v3506_v22 = vld [vmem:[#allocation18] sm:$0xff]  ;;  %v2464_v33 = vld [vmem:[#allocation11 + $0x8] sm:$0xff]   ;;  %v2465_v34 = vld [vmem:[#allocation12] sm:$0xff]   ;;  %vm919_vm2 = vcmask 64512   ;;  %s2983_s17 = smov 120  }
 0x16f   : > { %2191 = vmatpush3.bf16.msra.mxu0 %v2461_v13  ;;  %2214 = vmatprep.subr.bf16.mxu1 %v2981_v14  ;;  %v2463_v31 = vld [vmem:[#allocation11] sm:$0xff]   ;;  %v2466_v35 = vld [vmem:[#allocation12 + $0x8] sm:$0xff]   ;;  %vm987_vm3 = vcmask 1043456   ;;  %s2984_s29 = smov 112   ;;  %s2985_s3 = smov 104   ;;  %vm1151_vm4 = vcmask 130112  }
 0x170   : > { %2192 = vmatprep.subr.bf16.mxu0 %v2981_v14  ;;  %2216 = vmatprep.mubr.msk.bf16.mxu1 %vm2982_vm1, %v2981_v14  ;;  %v721_v21 = vsub.s32 4, %v3503_v20  ;;  %v726_v23 = vsub.s32 5, %v3503_v20  ;;  %v800_v38 = vsub.s32 1, %v3503_v20  ;;  %v737_v40 = vsub.s32 0, %v3503_v20  ;;  %s2986_s23 = smov 8   ;;  %s2987_s22 = smov 16  }
 0x171   : > { %v860_v47 = vsub.s32 2, %v3503_v20  ;;  %s2988_s4 = smov 24   ;;  %vm1269_vm5 = vcmask 195712   ;;  %vm1387_vm6 = vcmask 261312   ;;  %vm1762_vm8 = vcmask 1040384   ;;  %s3644_s12 = scalar_lea.vmem [#allocation24], %s2095_s2 }
 0x172   : > { %v722_v24 = vrot.slane %v3506_v22, %v721_v21  ;;  %v727_v27 = vrot.slane %v3506_v22, %v726_v23  ;;  %v801_v42 = vrot.slane %v3506_v22, %v800_v38  ;;  %v738_v43 = vrot.slane %v3506_v22, %v737_v40  ;;  %s2145_s16 = sshll.u32 %s3084_s14, 6  ;;  %s644_s27 = scalar_lea.vmem [#allocation21], %s3448_s18 }
 0x173   : > { %2193 = vmatpush3.bf16.msra.mxu0 %v2462_v15  ;;  %v861_v53 = vrot.slane %v3506_v22, %v860_v47  ;;  %vm1764_vm9 = vcmask 1041408   ;;  %vm1766_vm11 = vcmask 1042432   ;;  %vm1769_vm12 = vcmask 1044480   ;;  %s1800_s19 = sshll.u32 %s644_s27, 4  ;;  %s3871_s1 = sld [smem:[#allocation44_spill]]  ;;  %s3660_s19 = int_to_ptr.vmem [resolvable:$true] %s1800_s19 }
 0x174   : > { %2198 = vmatprep.subr.bf16.mxu0 %v2981_v14  ;;  %vm1771_vm13 = vcmask 1045504   ;;  %vm1773_vm14 = vcmask 1046528   ;;  %vm1684_vm15 = vcmask 257024   ;;  %s651_s24 = scalar_lea.vmem [#allocation22], %s3448_s18  ;;  %p3872_p2 = scmp.ne.s32.totalorder %s3846_s20, 0 }
 0x175   : > { %s3665_s21 = sshll.u32 %s651_s24, 4  ;;  %s3700_s21 = int_to_ptr.vmem [resolvable:$true] %s3665_s21 }
 0x179   : > { %s3658_s2 = scalar_lea.hbm %s3871_s1, %s2145_s16 }
 0x196   : > { %2459 = vset.pattern.permute.xlu0 %v2980_v0 }
 0x1ed   : > { %v677_v2 = vpop.trf.xlu0 }
 0x1ee   : > { %700 = vperm.xlu0 %2459, %v677_v2  }
 0x26d   : > { %v3486_v5 = vpop.permute.xlu0 %700 }
 0x26e   : > { %v3489_v6 = vmul.f32 %v3486_v5, %v697_v4 }
 0x270   : > { %v705_v7 = vsel %vm704_vm0, %v3489_v6, 0.0 }
 0x271   : > { %706 = vadd.xlane.f32.xlu1 %v705_v7 }
 0x2fe   : > { %v707_v8 = vpop.xlane.xlu1 %706 }
 0x2ff   : > { %v709_v9 = vmul.f32 0.03125, %v707_v8 }
 0x301   : > { %v710_v10 = vsub.f32 %v3489_v6, %v709_v9 }
 0x303   : > { %v711_v11 = vmul.f32 %v710_v10, %v710_v10 }
 0x305   : > { %v712_v12 = vsel %vm704_vm0, %v711_v11, 0.0 }
 0x306   : > { %713 = vadd.xlane.f32.xlu1 %v712_v12 }
 0x393   : > { %v714_v16 = vpop.xlane.xlu1 %713 }
 0x394   : > { %v715_v17 = vmul.f32 0.03125, %v714_v16 }
 0x396   : > { %v716_v19 = vadd.f32 1e-06, %v715_v17 }
 0x398   : > { %2479 = vrsqrt.f32 %v716_v19 }
 0x3a2   : > { %v2480_v25 = vpop.eup %2479 }
 0x3a3   : > { %v718_v26 = vmul.f32 %v2480_v25, %v710_v10  ;;  %v914_v10 = vsub.f32 1.0, %v3483_v1 }
 0x3a5   : > { %v723_v28 = vmul.f32 %v722_v24, %v718_v26  ;;  %v915_v11 = vmul.f32 -1e+08, %v914_v10 }
 0x3a7   : > { %v728_v29 = vadd.f32 %v727_v27, %v723_v28  ;;  %v970_v12 = vrot.slane %v915_v11, %v737_v40 }
 0x3a9   : > { %v729_v30 = vmul.f32 %v728_v29, %v3486_v5 }
 0x3ab   : > { %v734_v32 = vpack.c.bf16 %v729_v30, %v729_v30 }
 0x3ad   : > { %2195 = vmatmul.mubr.msk.bf16.vlgmr.msra.gmra.mrb[0].mxu0 %vm704_vm0, %v734_v32 }
 0x3ae   : > { %2199 = vmatpush3.bf16.msra.mxu0 %v2463_v31  ;;  %2202 = vmatprep.mubr.msk.bf16.mxu0 %vm2982_vm1, %v2981_v14 }
 0x3af   : > { %2200 = vmatprep.subr.bf16.mxu0 %v2981_v14 }
 0x3b2   : > { %2201 = vmatpush3.bf16.msra.mxu0 %v2464_v33 }
 0x3b3   : > { %2206 = vmatprep.subr.bf16.mxu0 %v2981_v14 }
 0x3b5   : > { %2203 = vmatmul.mubr.msk.bf16.vlgmr.msra.gmra.mrb[4].mxu0 %vm704_vm0, %v734_v32 }
 0x3b6   : > { %2207 = vmatpush3.bf16.msra.mxu0 %v2465_v34  ;;  %2210 = vmatprep.mubr.msk.bf16.mxu0 %vm2982_vm1, %v2981_v14 }
 0x3b7   : > { %2208 = vmatprep.subr.bf16.mxu0 %v2981_v14 }
 0x3ba   : > { %2209 = vmatpush3.bf16.msra.mxu0 %v2466_v35 }
 0x3bb   : > { %2220 = vmatprep.subr.bf16.mxu0 %v2981_v14 }
 0x3bd   : > { %2211 = vmatmul.mubr.msk.bf16.vlgmr.msra.gmra.mrb[8].mxu0 %vm704_vm0, %v734_v32 }
 0x3be   : > { %2222 = vmatprep.mubr.msk.bf16.mxu0 %vm2982_vm1, %v2981_v14 }
 0x480   : > { %v788_v36 = vpop.f32.mrb[0].mxu0 }
 0x481   : > { %v2196_v37 = vpop.f32.mrb[1].mxu0  ;;  %v789_v49 = vadd.f32 %v788_v36, %v738_v43 }
 0x482   : > { %v791_v39 = vpop.f32.mrb[2].mxu0 }
 0x483   : > { %v2197_v41 = vpop.f32.mrb[3].mxu0  ;;  %v916_v54 = vpack.c.bf16 %v789_v49, %v789_v49 }
 0x488   : > { %v848_v44 = vpop.f32.mrb[4].mxu0 }
 0x489   : > { %v849_v45 = vadd.f32 %v848_v44, %v801_v42  ;;  %v2204_v46 = vpop.f32.mrb[5].mxu0 }
 0x48a   : > { %v851_v48 = vpop.f32.mrb[6].mxu0 }
 0x48b   : > { %v917_v50 = vpack.c.bf16 %v849_v45, %v849_v45  ;;  %v2205_v51 = vpop.f32.mrb[7].mxu0 }
 0x48d   : > { %1036 = vrot.lane.b32.xlu1 %v917_v50, %s2983_s17  ;;  %v924_v52 = vsel %vm919_vm2, %v917_v50, 0 }
 0x48e   : > { %2215 = vmatpush3.bf16.xpose.msra.mxu1 %v924_v52 }
 0x48f   : > { %2226 = vmatprep.subr.bf16.mxu1 %v2981_v14 }
 0x490   : > { %v908_v55 = vpop.f32.mrb[8].mxu0 }
 0x491   : > { %v909_v56 = vadd.f32 %v908_v55, %v861_v53  ;;  %1033 = vrot.lane.b32.xlu1 %v916_v54, %s2983_s17  ;;  %v2212_v57 = vpop.f32.mrb[9].mxu0 }
 0x492   : > { %v911_v58 = vpop.f32.mrb[10].mxu0 }
 0x493   : > { %v3535_v59 = vpack.c.bf16 %v909_v56, %v909_v56  ;;  %v2213_v60 = vpop.f32.mrb[11].mxu0 }
 0x495   : > { %1155 = vrot.lane.b32.xlu1 %v917_v50, %s2984_s29  ;;  %2217 = vmatmul.mubr.msk.bf16.vlgmr.msra.gmra.mrb[0].mxu1 %vm919_vm2, %v916_v54  ;;  %v989_v61 = vsel %vm987_vm3, %v3535_v59, 0 }
 0x496   : > { %2221 = vmatpush3.bf16.msra.mxu0 %v989_v61  ;;  %2228 = vmatprep.mubr.msk.bf16.mxu1 %vm2982_vm1, %v2981_v14 }
 0x497   : > { %2232 = vmatprep.subr.bf16.mxu0 %v2981_v14 }
 0x499   : > { %1153 = vrot.lane.b32.xlu1 %v916_v54, %s2984_s29 }
 0x49d   : > { %1273 = vrot.lane.b32.xlu1 %v917_v50, %s2985_s3 }
 0x4a1   : > { %1271 = vrot.lane.b32.xlu1 %v916_v54, %s2985_s3 }
 0x4ff   : > { %v1037_v62 = vpop.permute.xlu1 %1036 }
 0x500   : > { %v1042_v63 = vsel %vm919_vm2, %v1037_v62, 0 }
 0x501   : > { %2227 = vmatpush3.bf16.xpose.msra.mxu1 %v1042_v63 }
 0x502   : > { %2238 = vmatprep.subr.bf16.mxu1 %v2981_v14 }
 0x503   : > { %v1034_v0 = vpop.permute.xlu1 %1033 }
 0x507   : > { %v1156_v2 = vpop.permute.xlu1 %1155 }
 0x508   : > { %v1161_v3 = vsel %vm919_vm2, %v1156_v2, 0  ;;  %2229 = vmatmul.mubr.msk.bf16.vlgmr.msra.gmra.mrb[4].mxu1 %vm919_vm2, %v1034_v0 }
 0x509   : > { %2239 = vmatpush3.bf16.xpose.msra.mxu1 %v1161_v3  ;;  %2240 = vmatprep.mubr.msk.bf16.mxu1 %vm2982_vm1, %v2981_v14 }
 0x50a   : > { %2250 = vmatprep.subr.bf16.mxu1 %v2981_v14 }
 0x50b   : > { %v1154_v4 = vpop.permute.xlu1 %1153 }
 0x50f   : > { %v1274_v7 = vpop.permute.xlu1 %1273 }
 0x510   : > { %v1279_v8 = vsel %vm919_vm2, %v1274_v7, 0  ;;  %2241 = vmatmul.mubr.msk.bf16.vlgmr.msra.gmra.mrb[8].mxu1 %vm919_vm2, %v1154_v4 }
 0x511   : > { %2251 = vmatpush3.bf16.xpose.msra.mxu1 %v1279_v8  ;;  %2252 = vmatprep.mubr.msk.bf16.mxu1 %vm2982_vm1, %v2981_v14 }
 0x512   : > { %2262 = vmatprep.subr.bf16.mxu1 %v2981_v14 }
 0x513   : > { %v1272_v9 = vpop.permute.xlu1 %1271 }
 0x518   : > { %2253 = vmatmul.mubr.msk.bf16.vlgmr.msra.gmra.mrb[12].mxu1 %vm919_vm2, %v1272_v9 }
 0x519   : > { %2266 = vmatprep.mubr.msk.bf16.mxu1 %vm2982_vm1, %v2981_v14 }
 0x568   : > { %v960_v13 = vpop.f32.mrb[0].mxu1 }
 0x569   : > { %v966_v15 = vmul.f32 0.35355338, %v960_v13  ;;  %v2218_v16 = vpop.f32.mrb[1].mxu1 }
 0x56a   : > { %v963_v17 = vpop.f32.mrb[2].mxu1 }
 0x56b   : > { %v2219_v18 = vpop.f32.mrb[3].mxu1  ;;  %v971_v19 = vadd.f32 %v970_v12, %v966_v15 }
 0x56d   : > { %v972_v21 = vsel %vm919_vm2, %v971_v19, -inf }
 0x56e   : > { %973 = vmax.xlane.f32.xlu0 %v972_v21 }
 0x5db   : > { %v1078_v23 = vpop.f32.mrb[4].mxu1 }
 0x5dc   : > { %v1084_v24 = vmul.f32 0.35355338, %v1078_v23  ;;  %v2230_v25 = vpop.f32.mrb[5].mxu1 }
 0x5dd   : > { %v1081_v26 = vpop.f32.mrb[6].mxu1 }
 0x5de   : > { %v2231_v27 = vpop.f32.mrb[7].mxu1  ;;  %v1085_v28 = vadd.f32 %v1084_v24, %v970_v12 }
 0x5e0   : > { %v1086_v29 = vsel %vm919_vm2, %v1085_v28, -inf }
 0x5e1   : > { %1087 = vmax.xlane.f32.xlu1 %v1086_v29 }
 0x5e3   : > { %v1197_v30 = vpop.f32.mrb[8].mxu1 }
 0x5e4   : > { %v1203_v31 = vmul.f32 0.35355338, %v1197_v30  ;;  %v2242_v32 = vpop.f32.mrb[9].mxu1 }
 0x5e5   : > { %v1200_v33 = vpop.f32.mrb[10].mxu1 }
 0x5e6   : > { %v2243_v34 = vpop.f32.mrb[11].mxu1  ;;  %v1204_v35 = vadd.f32 %v1203_v31, %v970_v12 }
 0x5e8   : > { %v1205_v36 = vsel %vm919_vm2, %v1204_v35, -inf }
 0x5e9   : > { %1206 = vmax.xlane.f32.xlu0 %v1205_v36  ;;  %v2467_v36 = vld [vmem:[#allocation14] sm:$0xff]  }
 0x5ea   : > { %2263 = vmatpush3.bf16.msra.mxu1 %v2467_v36 }
 0x5eb   : > { %v1315_v37 = vpop.f32.mrb[12].mxu1  ;;  %2264 = vmatprep.subr.bf16.mxu1 %v2981_v14 }
 0x5ec   : > { %v1321_v38 = vmul.f32 0.35355338, %v1315_v37  ;;  %v2254_v39 = vpop.f32.mrb[13].mxu1  ;;  %v2468_v37 = vld [vmem:[#allocation14 + $0x8] sm:$0xff]  }
 0x5ed   : > { %v1318_v40 = vpop.f32.mrb[14].mxu1 }
 0x5ee   : > { %v2255_v41 = vpop.f32.mrb[15].mxu1  ;;  %v1322_v42 = vadd.f32 %v1321_v38, %v970_v12  ;;  %2265 = vmatpush3.bf16.msra.mxu1 %v2468_v37 }
 0x5ef   : > { %2278 = vmatprep.subr.bf16.mxu1 %v2981_v14 }
 0x5f0   : > { %v1323_v43 = vsel %vm919_vm2, %v1322_v42, -inf }
 0x5f1   : > { %1324 = vmax.xlane.f32.xlu0 %v1323_v43 }
 0x5fb   : > { %v974_v44 = vpop.xlane.xlu0 %973 }
 0x5fc   : > { %v975_v45 = vsub.f32 %v971_v19, %v974_v44 }
 0x5fe   : > { %v976_v46 = vmul.f32 1.442695, %v975_v45 }
 0x600   : > { %2481 = vpow2.f32 %v976_v46 }
 0x60a   : > { %v2482_v47 = vpop.eup %2481 }
 0x60b   : > { %v978_v48 = vsel %vm919_vm2, %v2482_v47, 0.0 }
 0x60c   : > { %979 = vadd.xlane.f32.xlu1 %v978_v48 }
 0x61d   : > { %1099 = vrot.lane.b32.xlu1 %v3535_v59, %s2983_s17  ;;  %s1826_s17 = sshll.u32 %s3644_s12, 4  ;;  %s3711_s17 = int_to_ptr.vmem [resolvable:$true] %s1826_s17 }
 0x66e   : > { %v1088_v49 = vpop.xlane.xlu1 %1087 }
 0x66f   : > { %v1089_v50 = vsub.f32 %v1085_v28, %v1088_v49 }
 0x671   : > { %v1090_v51 = vmul.f32 1.442695, %v1089_v50 }
 0x673   : > { %2483 = vpow2.f32 %v1090_v51  ;;  %v1397_v51 = vsub.s32 3, %v3503_v20 }
 0x676   : > { %v1207_v52 = vpop.xlane.xlu0 %1206 }
 0x677   : > { %v1208_v53 = vsub.f32 %v1204_v35, %v1207_v52  ;;  %v1398_v52 = vrot.slane %v3506_v22, %v1397_v51 }
 0x679   : > { %v1209_v54 = vmul.f32 1.442695, %v1208_v53 }
 0x67b   : > { %2485 = vpow2.f32 %v1209_v54 }
 0x67d   : > { %v2484_v55 = vpop.eup %2483 }
 0x67e   : > { %v1325_v56 = vpop.xlane.xlu0 %1324  ;;  %v1092_v57 = vsel %vm919_vm2, %v2484_v55, 0.0 }
 0x67f   : > { %v1326_v58 = vsub.f32 %v1322_v42, %v1325_v56  ;;  %1093 = vadd.xlane.f32.xlu0 %v1092_v57 }
 0x681   : > { %v1327_v60 = vmul.f32 1.442695, %v1326_v58 }
 0x683   : > { %2487 = vpow2.f32 %v1327_v60 }
 0x685   : > { %v2486_v61 = vpop.eup %2485 }
 0x686   : > { %v1211_v62 = vsel %vm919_vm2, %v2486_v61, 0.0 }
 0x687   : > { %1212 = vadd.xlane.f32.xlu1 %v1211_v62 }
 0x68d   : > { %v2488_v63 = vpop.eup %2487 }
 0x68e   : > { %v1329_v0 = vsel %vm919_vm2, %v2488_v63, 0.0 }
 0x68f   : > { %1330 = vadd.xlane.f32.xlu0 %v1329_v0 }
 0x698   : > { %1335 = vrot.lane.b32.xlu1 %v3535_v59, %s2985_s3  ;;  %s2817_s3 = scalar_lea.vmem %s3660_s19, 64 }
 0x699   : > { %v980_v2 = vpop.xlane.xlu1 %979  ;;  %p2818_p13 = scmp.ne.s32.totalorder %s3660_s19, %s2817_s3 }
 0x69a   : > { %2489 = vrcp.f32 %v980_v2 }
 0x69b   : > { %p2819_p3 = pnand %p2818_p13, %p3872_p2 }
 0x69d   : > { %v1100_v7 = vpop.permute.xlu1 %1099  ;;  %p2820_p10 = pneg %p2819_p3 }
 0x69e   : > { %v1105_v9 = vsel %vm987_vm3, %v1100_v7, 0  ;;  %v2470_v7 = vld [vmem:[#allocation15 + $0x8] sm:$0xff]  }
 0x6a4   : > { %v2490_v3 = vpop.eup %2489 }
 0x6a5   : > { %v982_v4 = vmul.f32 %v2490_v3, %v2482_v47  ;;  %1217 = vrot.lane.b32.xlu0 %v3535_v59, %s2984_s29  ;;  %s1777_s29 = scalar_lea.sflag [#allocation5], %s3445_s9 }
 0x6a7   : > { %v983_v8 = vpack.c.bf16 %v982_v4, %v982_v4  ;;  %v2469_v4 = vld [vmem:[#allocation15] sm:$0xff]  }
 0x6a9   : > { %2223 = vmatmul.mubr.msk.bf16.vlgmr.msra.gmra.mrb[12].mxu0 %vm919_vm2, %v983_v8 }
 0x6aa   : > { %2233 = vmatpush3.bf16.msra.mxu0 %v1105_v9  ;;  %2234 = vmatprep.mubr.msk.bf16.mxu0 %vm2982_vm1, %v2981_v14 }
 0x6ab   : > { %2244 = vmatprep.subr.bf16.mxu0 %v2981_v14 }
 0x70c   : > { %v1094_v10 = vpop.xlane.xlu0 %1093 }
 0x70d   : > { %2491 = vrcp.f32 %v1094_v10  ;;  %v1471_v10 = vsub.s32 6, %v3503_v20 }
 0x714   : > { %v1213_v11 = vpop.xlane.xlu1 %1212 }
 0x715   : > { %2493 = vrcp.f32 %v1213_v11  ;;  %v1476_v11 = vsub.s32 7, %v3503_v20 }
 0x717   : > { %v2492_v12 = vpop.eup %2491 }
 0x718   : > { %v1096_v13 = vmul.f32 %v2492_v12, %v2484_v55  ;;  %v1336_v21 = vpop.permute.xlu1 %1335  ;;  %v1472_v12 = vrot.slane %v3506_v22, %v1471_v10 }
 0x719   : > { %v1341_v24 = vsel %vm987_vm3, %v1336_v21, 0  ;;  %v1686_v21 = vadd.f32 1.0, %v3483_v1 }
 0x71a   : > { %v1097_v15 = vpack.c.bf16 %v1096_v13, %v1096_v13 }
 0x71b   : > { %vm1691_vm7 = vcmp.ge.f32.partialorder %v1686_v21, 0.99 }
 0x71c   : > { %2235 = vmatmul.mubr.msk.bf16.vlgmr.msra.gmra.mrb[16].mxu0 %vm919_vm2, %v1097_v15  ;;  %v1331_v59 = vpop.xlane.xlu0 %1330 }
 0x71d   : > { %2495 = vrcp.f32 %v1331_v59  ;;  %2246 = vmatprep.mubr.msk.bf16.mxu0 %vm2982_vm1, %v2981_v14  ;;  %v1477_v59 = vrot.slane %v3506_v22, %v1476_v11 }
 0x71f   : > { %v2494_v16 = vpop.eup %2493 }
 0x720   : > { %v1215_v17 = vmul.f32 %v2494_v16, %v2486_v61  ;;  %v1218_v18 = vpop.permute.xlu0 %1217 }
 0x721   : > { %v1223_v19 = vsel %vm987_vm3, %v1218_v18, 0 }
 0x722   : > { %2245 = vmatpush3.bf16.msra.mxu0 %v1223_v19  ;;  %v1216_v23 = vpack.c.bf16 %v1215_v17, %v1215_v17 }
 0x723   : > { %2256 = vmatprep.subr.bf16.mxu0 %v2981_v14 }
 0x725   : > { %2247 = vmatmul.mubr.msk.bf16.vlgmr.msra.gmra.mrb[20].mxu0 %vm919_vm2, %v1216_v23  ;;  %v2141_v23 = vsel %vm1691_vm7, 1.0, %v2981_v14 }
 0x726   : > { %2257 = vmatpush3.bf16.msra.mxu0 %v1341_v24  ;;  %2258 = vmatprep.mubr.msk.bf16.mxu0 %vm2982_vm1, %v2981_v14  ;;  %v3619_v24 = vsub.f32 1.0, %v2141_v23  ;;  %v1696_v20 = vrot.slane %v2141_v23, 7 }
 0x727   : > { %v2496_v25 = vpop.eup %2495  ;;  %2270 = vmatprep.subr.bf16.mxu0 %v2981_v14 }
 0x728   : > { %v1333_v26 = vmul.f32 %v2496_v25, %v2488_v63  ;;  %v3622_v25 = vmul.f32 %v1696_v20, %v3483_v1  ;;  %v1707_v22 = vrot.slane %v3619_v24, 7  ;;  %v1760_v36 = vrot.slane %v3619_v24, 1 }
 0x72a   : > { %v1334_v27 = vpack.c.bf16 %v1333_v26, %v1333_v26  ;;  %v1709_v26 = vadd.f32 %v1707_v22, %v3622_v25  ;;  %v1763_v37 = vsel %vm1762_vm8, %v1760_v36, %v1686_v21 }
 0x72d   : > { %2259 = vmatmul.mubr.msk.bf16.vlgmr.msra.gmra.mrb[24].mxu0 %vm919_vm2, %v1334_v27  ;;  %v1717_v27 = vrot.slane %v1709_v26, 2  ;;  %v1714_v26 = vld [vmem:[%s564_s7] sm:$0xf]  ;;  %s2147_s7 = sshll.u32 %s3084_s14, 7 }
 0x72e   : > { %2274 = vmatprep.mubr.msk.bf16.mxu0 %vm2982_vm1, %v2981_v14  ;;  %2271 = vmatpush3.bf16.msra.mxu0 %v2469_v4  ;;  %v2989_v4 = vmov -1.0  }
 0x72f   : > { %2272 = vmatprep.subr.bf16.mxu0 %v2981_v14 }
 0x732   : > { %2273 = vmatpush3.bf16.msra.mxu0 %v2470_v7 }
 0x77c   : > { %v1025_v28 = vpop.f32.mrb[12].mxu0 }
 0x77d   : > { %1031 = vst.msk [vmem:[#allocation2] sm:$0xff] %vm919_vm2, %v1025_v28  ;;  %v2224_v29 = vpop.f32.mrb[13].mxu0  ;;  %v2472_v28 = vld [vmem:[#allocation17 + $0x8] sm:$0xff]  }
 0x77e   : > { %v1028_v30 = vpop.f32.mrb[14].mxu0  ;;  %v2473_v29 = vld [vmem:[#allocation17 + $0x10] sm:$0xff]  }
 0x77f   : > { %v2225_v31 = vpop.f32.mrb[15].mxu0  ;;  %v2474_v30 = vld [vmem:[#allocation17 + $0x18] sm:$0xff]  }
 0x780   : > { %v2475_v31 = vld [vmem:[#allocation17 + $0x20] sm:$0xff]  }
 0x7ef   : > { %v1141_v32 = vpop.f32.mrb[16].mxu0 }
 0x7f0   : > { %1148 = vrot.lane.b32.xlu1 %v1141_v32, %s2986_s23  ;;  %v2236_v33 = vpop.f32.mrb[17].mxu0  ;;  %v2476_v32 = vld [vmem:[#allocation17 + $0x28] sm:$0xff]   ;;  %s2990_s23 = smov [#allocation21]  }
 0x7f1   : > { %v1144_v34 = vpop.f32.mrb[18].mxu0  ;;  %v2477_v33 = vld [vmem:[#allocation17 + $0x30] sm:$0xff]  }
 0x7f2   : > { %v2237_v35 = vpop.f32.mrb[19].mxu0  ;;  %v2478_v34 = vld [vmem:[#allocation17 + $0x38] sm:$0xff]  }
 0x7f3   : > { %v1710_v35 = vsub.f32 %v3483_v1, %v1707_v22 }
 0x7f8   : > { %v1259_v38 = vpop.f32.mrb[20].mxu0 }
 0x7f9   : > { %1266 = vrot.lane.b32.xlu0 %v1259_v38, %s2987_s22  ;;  %v2248_v39 = vpop.f32.mrb[21].mxu0  ;;  %v1765_v38 = vsel %vm1764_vm9, %v1763_v37, %v1710_v35  ;;  %s2821_s22 = sshll.u32 %s2990_s23, 4  ;;  %s2822_s22 = int_to_ptr.vmem [resolvable:$false] %s2821_s22 }
 0x7fa   : > { %v1262_v40 = vpop.f32.mrb[22].mxu0  ;;  %v2128_v39 = vld [vmem:[#allocation20] ss:$0 sm:$0xff]  ;;  %p2824_p4 = scmp.lt.s32.totalorder %s3660_s19, %s2822_s22 }
 0x7fb   : > { %v2249_v41 = vpop.f32.mrb[23].mxu0 }
 0x800   : > { %v1377_v42 = vpop.f32.mrb[24].mxu0 }
 0x801   : > { %1384 = vrot.lane.b32.xlu1 %v1377_v42, %s2988_s4  ;;  %v2260_v43 = vpop.f32.mrb[25].mxu0  ;;  %s2823_s4 = scalar_lea.vmem %s2822_s22, 128 }
 0x802   : > { %v1380_v44 = vpop.f32.mrb[26].mxu0  ;;  %p2825_p6 = scmp.lt.s32.totalorder %s2823_s4, %s2817_s3 }
 0x803   : > { %v2261_v45 = vpop.f32.mrb[27].mxu0 }
 0x804   : > { %p2826_p12 = por %p2825_p6, %p2824_p4 }
 0x806   : > { %p2827_p0 = pnand %p2826_p12, %p2820_p10 }
 0x862   : > { %v1149_v46 = vpop.permute.xlu1 %1148 }
 0x863   : > { %1152 = vst.msk [vmem:[#allocation2] sm:$0xff] %vm1151_vm4, %v1149_v46 }
 0x86b   : > { %v1267_v47 = vpop.permute.xlu0 %1266 }
 0x86c   : > { %1270 = vst.msk [vmem:[#allocation2] sm:$0xff] %vm1269_vm5, %v1267_v47 }
 0x873   : > { %v1385_v48 = vpop.permute.xlu1 %1384 }
 0x874   : > { %1388 = vst.msk [vmem:[#allocation2] sm:$0xff] %vm1387_vm6, %v1385_v48 }
 0x87b   : > { %v1389_v49 = vld [vmem:[#allocation2] sm:$0xff] }
 0x87c   : > { %v1394_v50 = vpack.c.bf16 %v1389_v49, %v1389_v49 }
 0x87e   : > { %2267 = vmatmul.mubr.msk.bf16.vlgmr.msra.gmra.mrb[16].mxu1 %vm704_vm0, %v1394_v50 }
 0x87f   : > { %2294 = vmatprep.mubr.msk.bf16.mxu1 %vm2982_vm1, %v2981_v14 }
 0x951   : > { %v1448_v53 = vpop.f32.mrb[16].mxu1 }
 0x952   : > { %v1449_v54 = vadd.f32 %v1448_v53, %v1398_v52  ;;  %v2268_v55 = vpop.f32.mrb[17].mxu1 }
 0x953   : > { %v1451_v56 = vpop.f32.mrb[18].mxu1 }
 0x954   : > { %v3604_v57 = vadd.f32 %v1449_v54, %v3489_v6  ;;  %v2269_v58 = vpop.f32.mrb[19].mxu1 }
 0x956   : > { %v1455_v60 = vmul.f32 %v3604_v57, %v3486_v5 }
 0x958   : > { %v1456_v61 = vsel %vm704_vm0, %v1455_v60, 0.0 }
 0x959   : > { %1457 = vadd.xlane.f32.xlu0 %v1456_v61 }
 0x986   : > { %1719 = vxpose.xlu0.b32.start.end [1/1] (short) (narrow) %v1717_v27, 8 }
 0x9e6   : > { %v1458_v62 = vpop.xlane.xlu0 %1457 }
 0x9e7   : > { %v1459_v63 = vmul.f32 0.03125, %v1458_v62 }
 0x9e9   : > { %v1460_v0 = vsub.f32 %v1455_v60, %v1459_v63 }
 0x9eb   : > { %v1461_v2 = vmul.f32 %v1460_v0, %v1460_v0 }
 0x9ed   : > { %v1462_v3 = vsel %vm704_vm0, %v1461_v2, 0.0 }
 0x9ee   : > { %1463 = vadd.xlane.f32.xlu1 %v1462_v3 }
 0xa06   : > { %v1735_v48 = vpop.trf.xlu0 }
 0xa07   : > { %1753 = vperm.xlu1 %2460, %v1735_v48  }
 0xa7b   : > { %v1464_v6 = vpop.xlane.xlu1 %1463 }
 0xa7c   : > { %v1465_v8 = vmul.f32 0.03125, %v1464_v6 }
 0xa7e   : > { %v1466_v9 = vadd.f32 1e-06, %v1465_v8 }
 0xa80   : > { %2497 = vrsqrt.f32 %v1466_v9 }
 0xa8a   : > { %v2498_v13 = vpop.eup %2497 }
 0xa8b   : > { %v1468_v15 = vmul.f32 %v2498_v13, %v1460_v0  ;;  %v1688_v13 = vrot.slane %v3483_v1, 5 }
 0xa8d   : > { %v1473_v16 = vmul.f32 %v1472_v12, %v1468_v15  ;;  %v1699_v12 = vrot.slane %v3483_v1, 6 }
 0xa8f   : > { %v1478_v17 = vadd.f32 %v1477_v59, %v1473_v16  ;;  %v1701_v15 = vmul.f32 %v1699_v12, %v3622_v25  ;;  %v1690_v59 = vadd.f32 %v1688_v13, %v3483_v1 }
 0xa91   : > { %v1479_v18 = vmul.f32 %v1478_v17, %v3486_v5  ;;  %v2471_v5 = vld [vmem:[#allocation17] sm:$0xff]   ;;  %v1703_v16 = vrot.slane %v1701_v15, 7  ;;  %v1711_v17 = vrot.slane %v3619_v24, 5  ;;  %v2132_v24 = vld [vmem:[#allocation18 + $0x8] ss:$0 sm:$0xff] }
 0xa92   : > { %2279 = vmatpush3.bf16.msra.mxu1 %v2471_v5 }
 0xa93   : > { %v1484_v19 = vpack.c.bf16 %v1479_v18, %v1479_v18  ;;  %2280 = vmatprep.subr.bf16.mxu1 %v2981_v14  ;;  %v1705_v18 = vadd.f32 %v1703_v16, %v1690_v59 }
 0xa95   : > { %2275 = vmatmul.mubr.msk.bf16.vlgmr.msra.gmra.mrb[28].mxu0 %vm704_vm0, %v1484_v19  ;;  %v1713_v19 = vadd.f32 %v1711_v17, %v3483_v1  ;;  %v1767_v21 = vsel %vm1766_vm11, %v1765_v38, %v1705_v18 }
 0xa96   : > { %2281 = vmatpush3.bf16.msra.mxu1 %v2472_v28 }
 0xa97   : > { %2282 = vmatprep.subr.bf16.mxu1 %v2981_v14  ;;  %v1768_v23 = vsel %vm987_vm3, %v1767_v21, %v1713_v19 }
 0xa98   : > { %v1770_v20 = vsel %vm1769_vm12, %v1768_v23, 1.0 }
 0xa99   : > { %v1772_v22 = vsel %vm1771_vm13, %v1770_v20, 0.0 }
 0xa9a   : > { %2283 = vmatpush3.bf16.msra.mxu1 %v2473_v29  ;;  %v1774_v25 = vsel %vm1773_vm14, %v1772_v22, 0.0  ;;  %v1754_v29 = vpop.permute.xlu1 %1753 }
 0xa9b   : > { %2284 = vmatprep.subr.bf16.mxu1 %v2981_v14  ;;  %1775 = vst.msk [vmem:[%s3644_s12] sm:$0xff] %vm919_vm2, %v1774_v25 }
 0xa9e   : > { %2285 = vmatpush3.bf16.msra.mxu1 %v2474_v30 }
 0xa9f   : > { %2286 = vmatprep.subr.bf16.mxu1 %v2981_v14 }
 0xaa2   : > { %2287 = vmatpush3.bf16.msra.mxu1 %v2475_v31  ;;  %v1715_v31 = vunpack.c.l.bf16 %v1714_v26 }
 0xaa3   : > { %2288 = vmatprep.subr.bf16.mxu1 %v2981_v14 }
 0xaa6   : > { %2289 = vmatpush3.bf16.msra.mxu1 %v2476_v32 }
 0xaa7   : > { %2290 = vmatprep.subr.bf16.mxu1 %v2981_v14 }
 0xaaa   : > { %2291 = vmatpush3.bf16.msra.mxu1 %v2477_v33 }
 0xaab   : > { %2292 = vmatprep.subr.bf16.mxu1 %v2981_v14 }
 0xaae   : > { %2293 = vmatpush3.bf16.msra.mxu1 %v2478_v34 }
 0xb68   : > { %v1540_v40 = vpop.f32.mrb[28].mxu0 }
 0xb69   : > { %v1541_v41 = vadd.f32 %v2128_v39, %v1540_v40  ;;  %v2276_v42 = vpop.f32.mrb[29].mxu0 }
 0xb6a   : > { %v1543_v43 = vpop.f32.mrb[30].mxu0 }
 0xb6b   : > { %v1547_v44 = vmul.f32 0.70710677, %v1541_v41  ;;  %v2277_v45 = vpop.f32.mrb[31].mxu0  ;;  %v1546_v8 = vmul.f32 0.5, %v1541_v41 }
 0xb6d   : > { %v1550_v46 = vand.u32 2147483647, %v1547_v44  ;;  %vm1548_vm10 = vcmp.ge.f32.partialorder %v1547_v44, 0.0 }
 0xb6e   : > { %v1549_v7 = vsel %vm1548_vm10, 1.0, %v2989_v4 }
 0xb6f   : > { %v1551_v47 = vmul.f32 0.3275911, %v1550_v46  ;;  %v1564_v49 = vsub.f32 0.0, %v1550_v46 }
 0xb71   : > { %v1552_v14 = vadd.f32 1.0, %v1551_v47  ;;  %v1565_v51 = vmul.f32 %v1564_v49, %v1550_v46 }
 0xb73   : > { %2499 = vrcp.f32 %v1552_v14  ;;  %v1566_v54 = vmul.f32 1.442695, %v1565_v51 }
 0xb75   : > { %2501 = vpow2.f32 %v1566_v54 }
 0xb7d   : > { %v2500_v50 = vpop.eup %2499 }
 0xb7e   : > { %v1555_v52 = vmul.f32 1.0614054, %v2500_v50 }
 0xb7f   : > { %v2502_v0 = vpop.eup %2501 }
 0xb80   : > { %v1556_v53 = vadd.f32 -1.4531521, %v1555_v52 }
 0xb82   : > { %v1557_v55 = vmul.f32 %v2500_v50, %v1556_v53 }
 0xb84   : > { %v1558_v56 = vadd.f32 1.4214138, %v1557_v55 }
 0xb86   : > { %v1559_v58 = vmul.f32 %v2500_v50, %v1558_v56 }
 0xb88   : > { %v1560_v60 = vadd.f32 -0.28449672, %v1559_v58 }
 0xb8a   : > { %v1561_v61 = vmul.f32 %v2500_v50, %v1560_v60 }
 0xb8c   : > { %v1562_v62 = vadd.f32 0.2548296, %v1561_v61 }
 0xb8e   : > { %v1563_v63 = vmul.f32 %v2500_v50, %v1562_v62 }
 0xb90   : > { %v1568_v2 = vmul.f32 %v2502_v0, %v1563_v63 }
 0xb92   : > { %v1569_v3 = vsub.f32 1.0, %v1568_v2 }
 0xb94   : > { %v1570_v6 = vmul.f32 %v1569_v3, %v1549_v7 }
 0xb96   : > { %v1571_v9 = vadd.f32 1.0, %v1570_v6 }
 0xb98   : > { %v1572_v10 = vmul.f32 %v1571_v9, %v1546_v8 }
 0xb9a   : > { %v1589_v11 = vpack.c.bf16 %v1572_v10, %v1572_v10 }
 0xb9c   : > { %2295 = vmatmul.mubr.bf16.vlgmr.msra.gmra.mrb[20].mxu1 %v1589_v11 }
 0xc6f   : > { %v1676_v1 = vpop.f32.mrb[20].mxu1 }
 0xc70   : > { %v1677_v27 = vadd.f32 %v2132_v24, %v1676_v1  ;;  %v2296_v5 = vpop.f32.mrb[21].mxu1 }
 0xc71   : > { %v1679_v28 = vpop.f32.mrb[22].mxu1 }
 0xc72   : > { %v2297_v30 = vpop.f32.mrb[23].mxu1  ;;  %v1682_v32 = vadd.f32 %v1677_v27, %v3604_v57 }
 0xc74   : > { %v1683_v33 = vpack.c.bf16 %v1682_v32, %v1682_v32  ;;  %v1756_v34 = vmul.f32 %v1754_v29, %v1682_v32 }
 0xc76   : > { %v1757_v35 = vadd.f32 %v1756_v34, %v1715_v31  ;;  %1685 = vst.msk [vmem:[%s644_s27] sm:$0xf] %vm1684_vm15, %v1683_v33 }
 0xc77   : > { %2830 = shalt.err (!%p2827_p0)
}
 0xc78   : > { %s2831_s9 = scalar_lea.hbm %s3658_s2, 64  ;;  %s2835_s15 = scalar_lea.hbm %s3871_s1, 128 }
 0xc79   : > { %p2832_p5 = scmp.ne.s32.totalorder %s3658_s2, %s2831_s9  ;;  %p2836_p8 = scmp.lt.u32.totalorder %s3658_s2, %s3871_s1 }
 0xc7a   : > { %p2837_p1 = scmp.lt.u32.totalorder %s2835_s15, %s2831_s9  ;;  %p2839_p13 = scmp.lt.u32.totalorder %s2831_s9, %s3658_s2 }
 0xc7b   : > { %p2833_p9 = pnand %p2832_p5, %p3872_p2 }
 0xc7c   : > { %p2838_p11 = por %p2837_p1, %p2836_p8 }
 0xc7d   : > { %p2834_p7 = pneg %p2833_p9 }
 0xc7e   : > { %p2840_p3 = por %p2839_p13, %p2838_p11 }
 0xc80   : > { %p2841_p10 = pnand %p2840_p3, %p2834_p7 }
 0xc82   : > { %2844 = shalt.err (!%p2841_p10)
}
 0xc83   : > { %2336 = dma.vmem_to_hbm [thread:$0]  (%p3872_p2), %s3660_s19, 64, %s3658_s2, %s1777_s29   ;;  %v1758_v57 = vpack.c.bf16 %v1757_v35, %v1757_v35 }
 0xc84   : > { %s3873_s9 = sld [smem:[#allocation45_spill]]  ;;  %s3874_s23 = sld [smem:[#allocation46_spill]] }
 0xc85   : > { %1759 = vst.msk [vmem:[%s651_s24] sm:$0xf] %vm1684_vm15, %v1758_v57  ;;  %s2845_s19 = scalar_lea.vmem %s3700_s21, 64  ;;  %s2991_s2 = smov [#allocation22]  }
 0xc86   : > { %p2846_p4 = scmp.ne.s32.totalorder %s3700_s21, %s2845_s19  ;;  %s2849_s29 = sshll.u32 %s2991_s2, 4  ;;  %s2850_s29 = int_to_ptr.vmem [resolvable:$false] %s2849_s29 }
 0xc87   : > { %s2851_s3 = scalar_lea.vmem %s2850_s29, 128  ;;  %p2852_p0 = scmp.lt.s32.totalorder %s3700_s21, %s2850_s29 }
 0xc88   : > { %p2847_p6 = pnand %p2846_p4, %p3872_p2  ;;  %p2853_p5 = scmp.lt.s32.totalorder %s2851_s3, %s2845_s19 }
 0xc8a   : > { %s3697_s27 = scalar_lea.hbm %s3873_s9, %s2145_s16  ;;  %s3707_s22 = scalar_lea.hbm %s3874_s23, %s2147_s7 }
 0xc8b   : > { %s3718_s16 = scalar_lea.sflag [#allocation23], %s551_s5  ;;  %p2848_p12 = pneg %p2847_p6 }
 0xc8c   : > { %p2854_p9 = por %p2853_p5, %p2852_p0 }
 0xc8e   : > { %p2855_p7 = pnand %p2854_p9, %p2848_p12 }
 0xc90   : > { %2858 = shalt.err (!%p2855_p7)
}
 0xc91   : > { %s2859_s14 = scalar_lea.hbm %s3697_s27, 64  ;;  %s2863_s12 = scalar_lea.hbm %s3873_s9, 128 }
 0xc92   : > { %p2860_p8 = scmp.ne.s32.totalorder %s3697_s27, %s2859_s14  ;;  %p2864_p13 = scmp.lt.u32.totalorder %s3697_s27, %s3873_s9 }
 0xc93   : > { %p2865_p3 = scmp.lt.u32.totalorder %s2863_s12, %s2859_s14  ;;  %p2867_p4 = scmp.lt.u32.totalorder %s2859_s14, %s3697_s27 }
 0xc94   : > { %p2861_p1 = pnand %p2860_p8, %p3872_p2 }
 0xc95   : > { %p2866_p10 = por %p2865_p3, %p2864_p13 }
 0xc96   : > { %p2862_p11 = pneg %p2861_p1 }
 0xc97   : > { %p2868_p6 = por %p2867_p4, %p2866_p10 }
 0xc99   : > { %p2869_p12 = pnand %p2868_p6, %p2862_p11 }
 0xc9b   : > { %2872 = shalt.err (!%p2869_p12)
}
 0xc9c   : > { %2337 = dma.vmem_to_hbm [thread:$0]  (%p3872_p2), %s3700_s21, 64, %s3697_s27, %s3718_s16  }
 0xc9d   : > { %s2873_s4 = scalar_lea.vmem %s3711_s17, 128  ;;  %s2992_s13 = smov [#allocation24]  }
 0xc9e   : > { %p2874_p0 = scmp.ne.s32.totalorder %s3711_s17, %s2873_s4  ;;  %s2877_s15 = sshll.u32 %s2992_s13, 4  ;;  %s2878_s15 = int_to_ptr.vmem [resolvable:$false] %s2877_s15 }
 0xc9f   : > { %s2879_s19 = scalar_lea.vmem %s2878_s15, 256  ;;  %p2880_p7 = scmp.lt.s32.totalorder %s3711_s17, %s2878_s15 }
 0xca0   : > { %p2875_p5 = pnand %p2874_p0, %p3872_p2  ;;  %p2881_p8 = scmp.lt.s32.totalorder %s2879_s19, %s2873_s4 }
 0xca2   : > { %p2876_p9 = pneg %p2875_p5  ;;  %p2882_p1 = por %p2881_p8, %p2880_p7 }
 0xca4   : > { %p2883_p11 = pnand %p2882_p1, %p2876_p9 }
 0xca6   : > { %2886 = shalt.err (!%p2883_p11)
}
 0xca7   : > { %s2887_s21 = scalar_lea.hbm %s3707_s22, 128  ;;  %s2891_s29 = scalar_lea.hbm %s3874_s23, 256 }
 0xca8   : > { %p2888_p13 = scmp.ne.s32.totalorder %s3707_s22, %s2887_s21  ;;  %p2892_p4 = scmp.lt.u32.totalorder %s3707_s22, %s3874_s23 }
 0xca9   : > { %p2893_p6 = scmp.lt.u32.totalorder %s2891_s29, %s2887_s21  ;;  %p2895_p0 = scmp.lt.u32.totalorder %s2887_s21, %s3707_s22 }
 0xcaa   : > { %p2889_p3 = pnand %p2888_p13, %p3872_p2 }
 0xcab   : > { %p2894_p12 = por %p2893_p6, %p2892_p4 }
 0xcac   : > { %p2890_p10 = pneg %p2889_p3 }
 0xcad   : > { %p2896_p5 = por %p2895_p0, %p2894_p12 }
 0xcaf   : > { %p2897_p9 = pnand %p2896_p5, %p2890_p10 }
 0xcb1   : > { %2900 = shalt.err (!%p2897_p9)
}
 0xcb2   : > { %2338 = dma.vmem_to_hbm [thread:$0]  (%p3872_p2), %s3711_s17, 128, %s3707_s22, %s3718_s16  }
 0xcb3 PF: > { %s1838_s18 = sand.u32 1, %s2951_s25   ;;  %p3875_p7 = scmp.ne.s32.totalorder %s3847_s30, 0 }
 0xcb4   : > { %p3876_p8 = scmp.ge.s32.totalorder %s2963_s28, 2  ;;  %s1839_s5 = scalar_lea.sflag [#allocation5], %s1838_s18 }
 0xcb6   : > { %p2378_p1 = pnand %p3876_p8, %p3875_p7 }
 0xcb8   : > { %2942 = dma.done.wait (!%p2378_p1), %s1839_s5, 64  }
 0xcb9   : > { %2944 = vsyncadd (!%p2378_p1), %s1839_s5, 4294967232  ;;  %s3877_s12 = sadd.s32 4294967294, %s2963_s28  }
 0xcba   : > { %s1847_s24 = sand.u32 1, %s3877_s12  }
 0xcbb   : > { %s1848_s7 = scalar_lea.sflag [#allocation23], %s1847_s24 }
 0xcbc   : > { %2946 = dma.done.wait (!%p2378_p1), %s1848_s7, 192  }
 0xcbd   : > { %2948 = vsyncadd (!%p2378_p1), %s1848_s7, 4294967104  ;;  %s3878_s28 = sld [smem:[#allocation35_spill]]  ;;  %s3879_s20 = sld [smem:[#allocation33_spill]] }
 0xcbe   : > { %s3880_s27 = sld [smem:[#allocation36_spill]]  ;;  %s3881_s25 = smov %s2955_s26 }
 0xcc3   : > { %p37_p2 = scmp.ge.s32.totalorder %s3878_s28, 4   ;;  %s3882_s26 = smov %s3879_s20 }
 0xcc5   :  { %39 = sbr.rel (!%p37_p2) target bundleno = 24 (0x18), region = 197 }
 0xccc   :  { %1862 = vsyncpa [#allocation4], 1 }
 0xccd   :  { %1864 = vsyncpa [#allocation4 + $0x1], 1 }
 0xcce   :  { %1865 = vsyncpa [#allocation7], 1 }
 0xccf   :  { %1867 = vsyncpa [#allocation7 + $0x1], 1 }
 0xcd0   :  { %1868 = vsyncpa [#allocation10], 1 }
 0xcd1   :  { %1869 = vsyncpa [#allocation13], 1 }
 0xcd2   :  { %1870 = vsyncpa [#allocation16], 1 }
 0xcd3   :  { %1871 = vsyncpa [#allocation19], 1 }
 0xcd4   :  { %1872 = vsyncpa [#allocation5], 1 }
 0xcd5   :  { %1874 = vsyncpa [#allocation5 + $0x1], 1 }
 0xcd6   :  { %1875 = vsyncpa [#allocation23], 1 }
 0xcd7   :  { %1877 = vsyncpa [#allocation23 + $0x1], 1 }

</bundles_post_ra>
